<compile_context>
chip_gen: v6e
topology: v6e:2x2x1
jax: 0.10.0
libtpu: 0.0.40
codegen_flags: <defaults>
</compile_context>

<pallas_src>
import functools
import math
import random

import jax
import jax.numpy as jnp
from jax import lax
from jax.experimental import pallas as pl
from jax.experimental.pallas import tpu as pltpu


# ----------------------------------------------------------------------------
# helpers
# ----------------------------------------------------------------------------
def _round_up(x, m):
    return ((x + m - 1) // m) * m


def _pick_tile(dim, prefs):
    for t in prefs:
        if dim >= t and dim % t == 0:
            return t
    return dim


# ----------------------------------------------------------------------------
# Pallas kernel 1: tiled matmul + bias + activation (all convs, interpolation)
#   grid = (M/TM, N/TN, K/TK); bf16 operands on the MXU, f32 accumulator in
#   VMEM scratch, bias + activation fused into the last-K epilogue.
# ----------------------------------------------------------------------------
def _mm_kernel(x_ref, w_ref, b_ref, o_ref, acc_ref, *, act):
    k = pl.program_id(2)

    @pl.when(k == 0)
    def _():
        acc_ref[...] = jnp.zeros_like(acc_ref)

    acc_ref[...] += jnp.dot(x_ref[...], w_ref[...],
                            preferred_element_type=jnp.float32)

    @pl.when(k == pl.num_programs(2) - 1)
    def _():
        acc = acc_ref[...] + b_ref[...]
        if act == "leaky":
            acc = jnp.where(acc >= 0.0, acc, 0.2 * acc)
        elif act == "relu":
            acc = jnp.maximum(acc, 0.0)
        elif act == "tanh":
            acc = jnp.tanh(acc)
        o_ref[...] = acc.astype(o_ref.dtype)


def matmul_bias_act(x, w, b=None, act="none", out_dtype=jnp.bfloat16):
    M, K = x.shape
    N = w.shape[1]
    x = x.astype(jnp.bfloat16)
    w = w.astype(jnp.bfloat16)
    if b is None:
        b = jnp.zeros((N,), jnp.float32)
    b = b.astype(jnp.float32)

    # Zero-pad K and N up to multiples of 128 (exact for a contraction; padded
    # output columns are sliced off below).  Lane-dense output blocks avoid
    # masked vst.msk partial stores on small-Cout layers, and an aligned K
    # avoids masked loads / partial MXU passes.  The activation-side pad
    # normally fuses into the producing copy (im2col stack / transpose).
    Kp = _round_up(K, 128)
    Np = _round_up(N, 128)
    if Kp != K:
        x = jnp.pad(x, ((0, 0), (0, Kp - K)))
        w = jnp.pad(w, ((0, Kp - K), (0, 0)))
    if Np != N:
        w = jnp.pad(w, ((0, 0), (0, Np - N)))
        b = jnp.pad(b, (0, Np - N))
    b2 = b.reshape(1, Np)

    orig_m = M
    if M % 8 != 0:
        x = jnp.pad(x, ((0, _round_up(M, 8) - M), (0, 0)))
        M = x.shape[0]

    # Large row tiles amortize the ~0.35us/grid-step overhead; ragged final M
    # block (cdiv grid) keeps writes clipped by Pallas instead of a pad+slice
    # round trip.  128-granule N/K tiles map onto v5e's 128x128 MXU too.
    if M >= 4096:
        TM = 1024
    elif M >= 512:
        TM = 512
    else:
        TM = M
    TN = _pick_tile(Np, (512, 256, 128))
    TK = _pick_tile(Kp, (512, 256, 128))

    grid = (pl.cdiv(M, TM), Np // TN, Kp // TK)
    out = pl.pallas_call(
        functools.partial(_mm_kernel, act=act),
        out_shape=jax.ShapeDtypeStruct((M, Np), out_dtype),
        grid=grid,
        in_specs=[
            pl.BlockSpec((TM, TK), lambda i, j, k: (i, k)),
            pl.BlockSpec((TK, TN), lambda i, j, k: (k, j)),
            pl.BlockSpec((1, TN), lambda i, j, k: (0, j)),
        ],
        out_specs=pl.BlockSpec((TM, TN), lambda i, j, k: (i, j)),
        scratch_shapes=[pltpu.VMEM((TM, TN), jnp.float32)],
        compiler_params=pltpu.CompilerParams(
            dimension_semantics=("parallel", "parallel", "arbitrary")),
    )(x, w, b2)
    if M != orig_m or Np != N:
        out = out[:orig_m, :N]
    return out


# ----------------------------------------------------------------------------
# Pallas kernel 2: fused instance-norm (+ optional SPADE modulation,
# activation and residual add).  Biased variance, eps=1e-5 (PyTorch default).
# Small feature maps use one fused per-image kernel; large ones use a tiled
# two-pass kernel (sum / sum-of-squares reduction, then elementwise apply).
# ----------------------------------------------------------------------------
_IN_SMALL_BYTES = 4 << 20


def _in_small_kernel(*refs, eps, act, has_mod, has_res):
    x = refs[0][0].astype(jnp.float32)              # (HW, C)
    pos = 1
    mean = jnp.mean(x, axis=0, keepdims=True)
    xc = x - mean
    var = jnp.mean(xc * xc, axis=0, keepdims=True)
    y = xc * lax.rsqrt(var + eps)
    if has_mod:                                     # SPADE: y*(1+gamma)+beta
        y = (y * (1.0 + refs[pos][0].astype(jnp.float32))
             + refs[pos + 1][0].astype(jnp.float32))
        pos += 2
    if act == "leaky":
        y = jnp.where(y >= 0.0, y, 0.2 * y)
    elif act == "relu":
        y = jnp.maximum(y, 0.0)
    if has_res:                                     # ResBlock: x + IN(...)
        y = y + refs[pos][0].astype(jnp.float32)
        pos += 1
    refs[-1][0] = y.astype(refs[-1].dtype)


def _in_stats_kernel(x_ref, stat_ref, sum_ref, sq_ref, *, eps, inv_hw):
    t = pl.program_id(1)

    @pl.when(t == 0)
    def _():
        sum_ref[...] = jnp.zeros_like(sum_ref)
        sq_ref[...] = jnp.zeros_like(sq_ref)

    x = x_ref[0].astype(jnp.float32)                # (THW, C)
    sum_ref[...] += jnp.sum(x, axis=0, keepdims=True)
    sq_ref[...] += jnp.sum(x * x, axis=0, keepdims=True)

    @pl.when(t == pl.num_programs(1) - 1)
    def _():
        mean = sum_ref[...] * inv_hw
        var = sq_ref[...] * inv_hw - mean * mean
        stat_ref[0, 0:1, :] = mean
        stat_ref[0, 1:2, :] = lax.rsqrt(var + eps)


def _in_apply_kernel(*refs, act, has_mod, has_res):
    x = refs[0][0].astype(jnp.float32)              # (THW, C)
    mean = refs[1][0, 0:1, :]
    rstd = refs[1][0, 1:2, :]
    pos = 2
    y = (x - mean) * rstd
    if has_mod:
        y = (y * (1.0 + refs[pos][0].astype(jnp.float32))
             + refs[pos + 1][0].astype(jnp.float32))
        pos += 2
    if act == "leaky":
        y = jnp.where(y >= 0.0, y, 0.2 * y)
    elif act == "relu":
        y = jnp.maximum(y, 0.0)
    if has_res:
        y = y + refs[pos][0].astype(jnp.float32)
        pos += 1
    refs[-1][0] = y.astype(refs[-1].dtype)


def _pick_hw_tile(HW, C):
    # largest exact divisor of HW that is a multiple of 8 and keeps one f32
    # operand block around ~2 MiB (fits comfortably double-buffered even in
    # v7x's smaller scoped VMEM)
    cap = max(8, ((2 << 20) // max(4 * C, 1)) // 8 * 8)
    if HW <= cap:
        return HW
    d = cap
    while d >= 8:
        if HW % d == 0:
            return d
        d -= 8
    return HW


def instance_norm_fused(x, gamma=None, beta=None, residual=None,
                        act="none", eps=1e-5, out_dtype=jnp.bfloat16):
    # TODO(synk): for C < 128 a factor of HW could be folded into the lane dim
    # to avoid half-masked vregs; left as-is for clarity.
    N, H, W, C = x.shape
    HW = H * W
    has_mod = gamma is not None
    has_res = residual is not None

    xs = [x.reshape(N, HW, C)]
    if has_mod:
        xs += [gamma.reshape(N, HW, C), beta.reshape(N, HW, C)]
    if has_res:
        xs += [residual.reshape(N, HW, C)]

    n_ops = len(xs) + 1
    small = HW * C * 4 * n_ops <= _IN_SMALL_BYTES

    if small:
        spec = pl.BlockSpec((1, HW, C), lambda i: (i, 0, 0))
        out = pl.pallas_call(
            functools.partial(_in_small_kernel, eps=eps, act=act,
                              has_mod=has_mod, has_res=has_res),
            out_shape=jax.ShapeDtypeStruct((N, HW, C), out_dtype),
            grid=(N,),
            in_specs=[spec] * len(xs),
            out_specs=spec,
            compiler_params=pltpu.CompilerParams(
                dimension_semantics=("parallel",)),
        )(*xs)
        return out.reshape(N, H, W, C)

    # ---- tiled two-pass path (production HW): pass 1 reduces sum/sum-sq over
    # HW tiles into VMEM scratch and emits per-image (mean, rstd); pass 2 is
    # elementwise over the same tiles with the SPADE / act / residual epilogue
    # fused.  Inputs stay in their (typically bf16) storage dtype and are
    # upcast inside the kernels. ----
    THW = _pick_hw_tile(HW, C)
    T = HW // THW
    tile_spec = pl.BlockSpec((1, THW, C), lambda i, t: (i, t, 0))
    stat_spec = pl.BlockSpec((1, 2, C), lambda i, t: (i, 0, 0))
    stats = pl.pallas_call(
        functools.partial(_in_stats_kernel, eps=eps, inv_hw=1.0 / HW),
        out_shape=jax.ShapeDtypeStruct((N, 2, C), jnp.float32),
        grid=(N, T),
        in_specs=[tile_spec],
        out_specs=stat_spec,
        scratch_shapes=[pltpu.VMEM((1, C), jnp.float32),
                        pltpu.VMEM((1, C), jnp.float32)],
        compiler_params=pltpu.CompilerParams(
            dimension_semantics=("parallel", "arbitrary")),
    )(xs[0])
    out = pl.pallas_call(
        functools.partial(_in_apply_kernel, act=act,
                          has_mod=has_mod, has_res=has_res),
        out_shape=jax.ShapeDtypeStruct((N, HW, C), out_dtype),
        grid=(N, T),
        in_specs=[tile_spec, stat_spec] + [tile_spec] * (len(xs) - 1),
        out_specs=tile_spec,
        compiler_params=pltpu.CompilerParams(
            dimension_semantics=("parallel", "parallel")),
    )(xs[0], stats, *xs[1:])
    return out.reshape(N, H, W, C)


# ----------------------------------------------------------------------------
# Pallas kernel 3: 5x5 Gaussian depthwise conv, separable (5-tap W pass then
# 5-tap H pass) on the VPU: 10 shifted adds instead of 25, one grid step per
# image (all channels blocked together).
# ----------------------------------------------------------------------------
_G5 = (1.0, 4.0, 6.0, 4.0, 1.0)


def _gauss_kernel(x_ref, o_ref, *, H, W, scale):
    x = x_ref[0].astype(jnp.float32)                # (C, H+4, W+4)
    tmp = None
    for k in range(5):                              # lane (W) pass
        part = (_G5[k] / 16.0) * x[:, :, k:k + W]
        tmp = part if tmp is None else tmp + part   # (C, H+4, W)
    acc = None
    for k in range(5):                              # sublane (H) pass
        part = (scale * _G5[k] / 16.0) * tmp[:, k:k + H, :]
        acc = part if acc is None else acc + part   # (C, H, W)
    o_ref[0] = acc


def conv_gauss_planar(x, scale):
    # x: (N, C, H, W) float32; reflect pad 2, depthwise 5x5 Gaussian.
    # TODO(synk): lane shifts could ride the XLU via pltpu.roll instead of
    # slicing; slicing keeps the border semantics trivially identical.
    N, C, H, W = x.shape
    xp = jnp.pad(x, ((0, 0), (0, 0), (2, 2), (2, 2)),
                 mode="reflect").astype(jnp.float32)
    out = pl.pallas_call(
        functools.partial(_gauss_kernel, H=H, W=W, scale=scale),
        out_shape=jax.ShapeDtypeStruct((N, C, H, W), jnp.float32),
        grid=(N,),
        in_specs=[pl.BlockSpec((1, C, H + 4, W + 4), lambda i: (i, 0, 0, 0))],
        out_specs=pl.BlockSpec((1, C, H, W), lambda i: (i, 0, 0, 0)),
        compiler_params=pltpu.CompilerParams(dimension_semantics=("parallel",)),
    )(xp)
    return out


# ----------------------------------------------------------------------------
# Pallas kernels 4a/4b: cross-attention
#   4a: per-image spatial-mean removal + channel-wise L2 normalization of the
#       projected features (needs the full hw extent, so it runs once per
#       image, on the cheap (hw, c) matrices).
#   4b: correlation + softmax + warp, tiled over the hw_a (query column) axis
#       so the (hw, hw) corr block never has to be resident in VMEM at once.
# ----------------------------------------------------------------------------
def _attn_norm_kernel(fa_ref, fb_ref, fan_ref, fbn_ref, *, eps):
    def norm(f):
        f = f - jnp.mean(f, axis=0, keepdims=True)          # spatial mean
        nrm = jnp.sqrt(jnp.sum(f * f, axis=1, keepdims=True)) + eps
        return f * (1.0 / nrm)                              # channel L2 norm

    fan_ref[0] = norm(fa_ref[0].astype(jnp.float32))
    fbn_ref[0] = norm(fb_ref[0].astype(jnp.float32))


def _attn_kernel(fan_ref, fbn_ref, fc_ref, warp_ref, corr_ref, *, alpha):
    fa_t = fan_ref[0]                               # (Tcol, c)  query cols
    fbn = fbn_ref[0]                                # (hw, c)
    # energy[p, q] = sum_c fb[p, c] * fa[q, c]; kept in f32 because the
    # alpha=100 softmax is sharp and bf16 logits drift too much.
    energy = lax.dot_general(
        fbn, fa_t, (((1,), (1,)), ((), ())),
        preferred_element_type=jnp.float32) * alpha          # (hw, Tcol)
    # F.softmax(dim=1) over the hw_b axis -> axis 0 here (fully resident per
    # column tile, so no flash-style rescaling is needed).
    m = jnp.max(energy, axis=0, keepdims=True)
    e = jnp.exp(energy - m)
    corr = e * (1.0 / jnp.sum(e, axis=0, keepdims=True))
    corr_ref[0] = corr
    warp_ref[0] = jnp.dot(fc_ref[0].astype(jnp.bfloat16),
                          corr.astype(jnp.bfloat16),
                          preferred_element_type=jnp.float32)


def attn_corr_warp(fa, fb, fc, alpha=100.0, eps=1e-5):
    # fa, fb: (n, hw, c) (plain reshape of NHWC, no HBM transpose);
    # fc: (n, Cc, hw) with tiny Cc.
    n, hw, c = fa.shape
    Cc = fc.shape[1]

    full_spec = pl.BlockSpec((1, hw, c), lambda i: (i, 0, 0))
    fan, fbn = pl.pallas_call(
        functools.partial(_attn_norm_kernel, eps=eps),
        out_shape=(jax.ShapeDtypeStruct((n, hw, c), jnp.float32),
                   jax.ShapeDtypeStruct((n, hw, c), jnp.float32)),
        grid=(n,),
        in_specs=[full_spec, full_spec],
        out_specs=(full_spec, full_spec),
        compiler_params=pltpu.CompilerParams(dimension_semantics=("parallel",)),
    )(fa, fb)

    Tcol = _pick_tile(hw, (256, 128)) if hw % 128 == 0 else hw
    warp, corr = pl.pallas_call(
        functools.partial(_attn_kernel, alpha=alpha),
        out_shape=(
            jax.ShapeDtypeStruct((n, Cc, hw), jnp.float32),
            jax.ShapeDtypeStruct((n, hw, hw), jnp.float32),
        ),
        grid=(n, hw // Tcol),
        in_specs=[
            pl.BlockSpec((1, Tcol, c), lambda i, j: (i, j, 0)),
            pl.BlockSpec((1, hw, c), lambda i, j: (i, 0, 0)),
            pl.BlockSpec((1, Cc, hw), lambda i, j: (i, 0, 0)),
        ],
        out_specs=(
            pl.BlockSpec((1, Cc, Tcol), lambda i, j: (i, 0, j)),
            pl.BlockSpec((1, hw, Tcol), lambda i, j: (i, 0, j)),
        ),
        compiler_params=pltpu.CompilerParams(
            dimension_semantics=("parallel", "parallel")),
    )(fan, fbn, fc.astype(jnp.float32))
    return warp, corr


# ----------------------------------------------------------------------------
# conv2d (im2col in JAX glue, matmul + bias + act in Pallas)
# ----------------------------------------------------------------------------
def conv2d(x, w, b, stride=1, padding=0, pad_mode="constant", act="none",
           out_dtype=jnp.bfloat16):
    # x: NHWC, w: (Cout, Cin, kh, kw) PyTorch layout, b: (Cout,) or None
    # TODO(synk): im2col is still materialized in HBM (kh*kw blow-up); an
    # implicit-GEMM with overlapping-window DMA would remove it.
    N, H, W, C = x.shape
    Cout, Cin, kh, kw = w.shape
    if padding > 0:
        x = jnp.pad(x, ((0, 0), (padding, padding), (padding, padding), (0, 0)),
                    mode=pad_mode)
    x = x.astype(jnp.bfloat16)          # halve patch materialization traffic
    Hp, Wp = x.shape[1], x.shape[2]
    Ho = (Hp - kh) // stride + 1
    Wo = (Wp - kw) // stride + 1
    taps = []
    for i in range(kh):
        for j in range(kw):
            taps.append(x[:, i:i + stride * (Ho - 1) + 1:stride,
                          j:j + stride * (Wo - 1) + 1:stride, :])
    patches = jnp.stack(taps, axis=3)                    # (N,Ho,Wo,kh*kw,C)
    Xm = patches.reshape(N * Ho * Wo, kh * kw * Cin)
    Wm = jnp.transpose(w, (2, 3, 1, 0)).reshape(kh * kw * Cin, Cout)
    out = matmul_bias_act(Xm, Wm, b, act=act, out_dtype=out_dtype)
    return out.reshape(N, Ho, Wo, Cout)


# ----------------------------------------------------------------------------
# bilinear interpolation as matmul (routed through the Pallas matmul kernel)
# ----------------------------------------------------------------------------
def _interp_matrix(n_in, n_out, align_corners):
    if n_in == 1:
        return jnp.ones((n_out, 1), jnp.float32)
    idx = jnp.arange(n_out, dtype=jnp.float32)
    if align_corners:
        coords = idx * (n_in - 1) / max(n_out - 1, 1)
    else:
        coords = jnp.clip((idx + 0.5) * (n_in / n_out) - 0.5, 0.0, n_in - 1)
    i0 = jnp.clip(jnp.floor(coords).astype(jnp.int32), 0, n_in - 2)
    frac = coords - i0.astype(jnp.float32)
    mat = jnp.zeros((n_out, n_in), jnp.float32)
    r = jnp.arange(n_out)
    mat = mat.at[r, i0].add(1.0 - frac)
    mat = mat.at[r, i0 + 1].add(frac)
    return mat


def interp_axis(x, mat, axis, out_dtype=jnp.bfloat16):
    # TODO(synk): a 2-tap gather/shifted-add VPU kernel would avoid the dense
    # n_in-wide matmul and the moveaxis round trips.
    x_m = jnp.moveaxis(x, axis, -1)
    shp = x_m.shape
    flat = x_m.reshape(-1, shp[-1])
    out = matmul_bias_act(flat, mat.T, None, act="none", out_dtype=out_dtype)
    out = out.reshape(shp[:-1] + (mat.shape[0],))
    return jnp.moveaxis(out, -1, axis)


# ----------------------------------------------------------------------------
# Content / Style separation (Gaussian pyramid)
# ----------------------------------------------------------------------------
def content_style_separation(img_nhwc, rand_factor):
    N, H, W, C = img_nhwc.shape
    x = jnp.transpose(img_nhwc, (0, 3, 1, 2)).astype(jnp.float32)   # (N,C,H,W)
    filtered = conv_gauss_planar(x, 1.0)
    down = filtered[:, :, ::2, ::2]
    up = jnp.zeros((N, C, H, W), jnp.float32).at[:, :, ::2, ::2].set(down)
    up = conv_gauss_planar(up, 4.0)
    content = x - up
    style = up
    content = (0.299 * content[:, 0:1] + 0.587 * content[:, 1:2]
               + 0.114 * content[:, 2:3])
    content = content * rand_factor
    return (jnp.transpose(content, (0, 2, 3, 1)),
            jnp.transpose(style, (0, 2, 3, 1)))


# ----------------------------------------------------------------------------
# Network blocks
# ----------------------------------------------------------------------------
def resblock(p, prefix, x):
    y = conv2d(x, p[prefix + ".conv1.w"], None, 1, 1, "constant", "none")
    y = instance_norm_fused(y, act="relu")
    y = conv2d(y, p[prefix + ".conv2.w"], p[prefix + ".conv2.b"], 1, 1,
               "constant", "none")
    return instance_norm_fused(y, residual=x, act="none")   # x + IN(conv2)


def upsample_block(p, prefix, x):
    N, H, W, C = x.shape
    Uh = _interp_matrix(H, 2 * H, align_corners=True)   # UpsamplingBilinear2d
    Uw = _interp_matrix(W, 2 * W, align_corners=True)
    x = interp_axis(x, Uh, 1)
    x = interp_axis(x, Uw, 2)
    x = conv2d(x, p[prefix + ".conv.w"], p[prefix + ".conv.b"], 1, 1,
               "constant", "none")
    return instance_norm_fused(x, act="leaky")


def encoder_semantic(p, parse):
    # note: LeakyReLUConv2d(norm='instance') != 'Instance' -> NO instance norm
    N, H, W, _ = parse.shape
    xr = jnp.linspace(-1.0, 1.0, W)
    yr = jnp.linspace(-1.0, 1.0, H)
    yy, xx = jnp.meshgrid(yr, xr, indexing="ij")
    xx = jnp.broadcast_to(xx[None, :, :, None], (N, H, W, 1))
    yy = jnp.broadcast_to(yy[None, :, :, None], (N, H, W, 1))
    inp = jnp.concatenate([parse, xx, yy], axis=-1)
    o1 = conv2d(inp, p["sem.conv1.w"], p["sem.conv1.b"], 1, 3, "reflect", "leaky")
    o2 = conv2d(o1, p["sem.conv2.w"], p["sem.conv2.b"], 2, 1, "reflect", "leaky")
    o3 = conv2d(o2, p["sem.conv3.w"], p["sem.conv3.b"], 2, 1, "reflect", "leaky")
    o4 = conv2d(o3, p["sem.conv4.w"], p["sem.conv4.b"], 2, 1, "reflect", "leaky")
    o5 = conv2d(o4, p["sem.conv5.w"], p["sem.conv5.b"], 2, 1, "reflect", "leaky")
    o = resblock(p, "sem.res1", o5)
    o = resblock(p, "sem.res2", o)
    o = upsample_block(p, "sem.up1", o + o5)
    o = upsample_block(p, "sem.up2", o + o4)
    return o


def encoder_down4(p, x):
    o1 = conv2d(x, p["cont.conv1.w"], p["cont.conv1.b"], 1, 1, "reflect", "leaky")
    o2 = conv2d(o1, p["cont.conv2.w"], p["cont.conv2.b"], 2, 1, "reflect", "leaky")
    o3 = conv2d(o2, p["cont.conv3.w"], p["cont.conv3.b"], 2, 1, "reflect", "leaky")
    o4 = resblock(p, "cont.res1", o3)
    o4 = resblock(p, "cont.res2", o4)
    return [o1, o2, o3, o4]


def attention(p, fa_raw, fb_raw, fc_raw):
    # fa_conv / fb_conv: 1x1 conv + InstanceNorm ('Instance') + LeakyReLU
    fa = conv2d(fa_raw, p["att.fa.w"], p["att.fa.b"], 1, 0, "constant", "none")
    fa = instance_norm_fused(fa, act="leaky")
    fb = conv2d(fb_raw, p["att.fb.w"], p["att.fb.b"], 1, 0, "constant", "none")
    fb = instance_norm_fused(fb, act="leaky")
    n, h, w, c = fa.shape
    Cc = fc_raw.shape[-1]
    fa_m = fa.reshape(n, h * w, c)                 # free reshape, no transpose
    fb_m = fb.reshape(n, h * w, c)
    fc_m = jnp.transpose(fc_raw, (0, 3, 1, 2)).reshape(n, Cc, h * w)  # tiny Cc
    warp, corr = attn_corr_warp(fa_m, fb_m, fc_m, alpha=100.0, eps=1e-5)
    warp = jnp.transpose(warp.reshape(n, Cc, h, w), (0, 2, 3, 1))
    return warp, corr


def spade(p, prefix, x, segmap, act="none"):
    f = x.shape[1] // segmap.shape[1]                    # nearest up to x's size
    seg = segmap if f == 1 else jnp.repeat(jnp.repeat(segmap, f, 1), f, 2)
    actv = conv2d(seg, p[prefix + ".shared.w"], p[prefix + ".shared.b"],
                  1, 1, "constant", "relu")
    gamma = conv2d(actv, p[prefix + ".gamma.w"], p[prefix + ".gamma.b"],
                   1, 1, "constant", "none")
    beta = conv2d(actv, p[prefix + ".beta.w"], p[prefix + ".beta.b"],
                  1, 1, "constant", "none")
    # instance norm + SPADE modulation + activation fused in one kernel
    return instance_norm_fused(x, gamma=gamma, beta=beta, act=act)


def spade_resblock(p, prefix, x, seg):
    # fin == fout everywhere in Decoder_up4 -> no learned shortcut
    dx = spade(p, prefix + ".norm_0", x, seg, act="leaky")
    dx = conv2d(dx, p[prefix + ".conv_0.w"], p[prefix + ".conv_0.b"],
                1, 1, "constant", "none")
    dx = spade(p, prefix + ".norm_1", dx, seg, act="leaky")
    dx = conv2d(dx, p[prefix + ".conv_1.w"], p[prefix + ".conv_1.b"],
                1, 1, "constant", "none")
    return x + dx


def decoder_up4(p, content_list, makeup):
    y = content_list[-1]
    y = spade_resblock(p, "dec.spade1", y, makeup)
    y = spade_resblock(p, "dec.spade2", y, makeup)
    y = upsample_block(p, "dec.up1", y + content_list[-2])
    y = spade_resblock(p, "dec.spade5", y, makeup)
    y = upsample_block(p, "dec.up2", y + content_list[-3])
    y = spade_resblock(p, "dec.spade6", y, makeup)
    # last_conv: reflect pad, conv, LeakyReLU (norm='instance' -> no IN)
    y = conv2d(y + content_list[-4], p["dec.last.w"], p["dec.last.b"],
               1, 1, "reflect", "leaky")
    y = conv2d(y, p["dec.img.w"], p["dec.img.b"], 1, 1, "constant", "tanh",
               out_dtype=jnp.float32)
    return y


# ----------------------------------------------------------------------------
# Generator forward
# ----------------------------------------------------------------------------
def generator_forward(p, source_img, source_parse, source_all_mask,
                      ref_img, ref_parse, ref_all_mask, rf_src, rf_ref):
    nhwc = lambda t: jnp.transpose(t, (0, 2, 3, 1)).astype(jnp.float32)
    nchw = lambda t: jnp.transpose(t, (0, 3, 1, 2))
    s_img, s_parse, s_mask = nhwc(source_img), nhwc(source_parse), nhwc(source_all_mask)
    r_img, r_parse, r_mask = nhwc(ref_img), nhwc(ref_parse), nhwc(ref_all_mask)

    source_back = s_img * (1.0 - s_mask)
    source_face = s_img * s_mask
    src_content, src_style = content_style_separation(source_face, rf_src)
    ref_face = r_img * r_mask
    _ref_content, ref_style = content_style_separation(ref_face, rf_ref)

    src_sem = encoder_semantic(p, s_parse)
    ref_sem = encoder_semantic(p, r_parse)

    content_list = encoder_down4(p, jnp.concatenate([src_content, source_back], -1))

    H, W = r_img.shape[1], r_img.shape[2]
    Dh = _interp_matrix(H, H // 4, align_corners=False)   # F.interpolate bilinear 0.25
    Dw = _interp_matrix(W, W // 4, align_corners=False)
    ref_makeup = interp_axis(interp_axis(ref_style, Dh, 1, jnp.float32),
                             Dw, 2, jnp.float32)

    ref_makeup_warp, corr = attention(p, src_sem, ref_sem, ref_makeup)
    mask_ds = s_mask[:, ::4, ::4, :]                       # nearest 0.25
    ref_makeup_warp = ref_makeup_warp * mask_ds

    transfer = decoder_up4(p, content_list, ref_makeup_warp)

    return {
        "source_face_content": nchw(src_content),
        "ref_face_style": nchw(ref_style),
        "transfer_img": nchw(transfer),
        "corr_ref2source": corr,
        "ref_makeup_warp": nchw(ref_makeup_warp),
    }


# ----------------------------------------------------------------------------
# deterministic parameter init (synthetic weights, PyTorch conv shapes)
# ----------------------------------------------------------------------------
def init_params(key, ngf, input_dim, parse_dim):
    params = {}
    counter = [0]

    def conv_p(name, cout, cin, k, bias=True):
        sub = jax.random.fold_in(key, counter[0])
        counter[0] += 1
        bound = 1.0 / math.sqrt(cin * k * k)
        kw, kb = jax.random.split(sub)
        params[name + ".w"] = jax.random.uniform(
            kw, (cout, cin, k, k), jnp.float32, -bound, bound)
        params[name + ".b"] = (jax.random.uniform(kb, (cout,), jnp.float32,
                                                  -bound, bound) if bias else None)

    # semantic encoder (input = parse_dim + 2 coord channels)
    ps = parse_dim + 2
    conv_p("sem.conv1", ngf, ps, 7)
    conv_p("sem.conv2", ngf * 2, ngf, 3)
    conv_p("sem.conv3", ngf * 4, ngf * 2, 3)
    conv_p("sem.conv4", ngf * 8, ngf * 4, 3)
    conv_p("sem.conv5", ngf * 16, ngf * 8, 3)
    for r in ("sem.res1", "sem.res2"):
        conv_p(r + ".conv1", ngf * 16, ngf * 16, 3, bias=False)
        conv_p(r + ".conv2", ngf * 16, ngf * 16, 3)
    conv_p("sem.up1.conv", ngf * 8, ngf * 16, 3)
    conv_p("sem.up2.conv", ngf * 4, ngf * 8, 3)

    # content encoder (ngf*2, input_dim+1 channels)
    ngc = ngf * 2
    conv_p("cont.conv1", ngc, input_dim + 1, 3)
    conv_p("cont.conv2", ngc * 2, ngc, 3)
    conv_p("cont.conv3", ngc * 4, ngc * 2, 3)
    for r in ("cont.res1", "cont.res2"):
        conv_p(r + ".conv1", ngc * 4, ngc * 4, 3, bias=False)
        conv_p(r + ".conv2", ngc * 4, ngc * 4, 3)

    # cross attention (channels = ngf*4)
    ca = ngf * 4
    conv_p("att.fa", ca // 4, ca, 1)
    conv_p("att.fb", ca // 4, ca, 1)

    # decoder (ngf*2)
    ngd = ngf * 2

    def spade_p(prefix, norm_nc, label_nc=3, nhidden=128):
        conv_p(prefix + ".shared", nhidden, label_nc, 3)
        conv_p(prefix + ".gamma", norm_nc, nhidden, 3)
        conv_p(prefix + ".beta", norm_nc, nhidden, 3)

    def spade_res_p(prefix, fin, fout):
        fmid = min(fin, fout)
        conv_p(prefix + ".conv_0", fmid, fin, 3)
        conv_p(prefix + ".conv_1", fout, fmid, 3)
        spade_p(prefix + ".norm_0", fin)
        spade_p(prefix + ".norm_1", fmid)

    spade_res_p("dec.spade1", ngd * 4, ngd * 4)
    spade_res_p("dec.spade2", ngd * 4, ngd * 4)
    conv_p("dec.up1.conv", ngd * 2, ngd * 4, 3)
    spade_res_p("dec.spade5", ngd * 2, ngd * 2)
    conv_p("dec.up2.conv", ngd, ngd * 2, 3)
    spade_res_p("dec.spade6", ngd, ngd)
    conv_p("dec.last", ngd, ngd, 3)
    conv_p("dec.img", 3, ngd, 3)
    # TODO(synk): makeup_enc (Encoder_down4) is created in __init__ but never
    # used in Generator.forward, so its parameters are omitted here.
    return params


# ----------------------------------------------------------------------------
if __name__ == "__main__":
    key = jax.random.PRNGKey(0)
    N, H, W = 2, 32, 32
    input_dim, parse_dim, ngf = 3, 3, 4

    ks = jax.random.split(key, 8)
    source_img = jax.random.normal(ks[0], (N, input_dim, H, W), jnp.float32)
    source_parse = jax.random.normal(ks[1], (N, parse_dim, H, W), jnp.float32)
    source_all_mask = (jax.random.uniform(ks[2], (N, 1, H, W)) > 0.5).astype(jnp.float32)
    ref_img = jax.random.normal(ks[3], (N, input_dim, H, W), jnp.float32)
    ref_parse = jax.random.normal(ks[4], (N, parse_dim, H, W), jnp.float32)
    ref_all_mask = (jax.random.uniform(ks[5], (N, 1, H, W)) > 0.5).astype(jnp.float32)

    params = init_params(ks[6], ngf, input_dim, parse_dim)

    # PyTorch code draws random.random() once per Content_Style_Separation call
    random.seed(0)
    rf_src = 0.6 + 0.6 * random.random()
    rf_ref = 0.6 + 0.6 * random.random()

    # exercise the tiled two-pass instance-norm path (production-size feature
    # map) so it is compile-checked even though the toy model takes the small
    # fused path everywhere
    chk = instance_norm_fused(
        jax.random.normal(ks[7], (1, 64, 64, 256), jnp.float32), act="leaky")
    jax.block_until_ready(chk)

    out = generator_forward(params, source_img, source_parse, source_all_mask,
                            ref_img, ref_parse, ref_all_mask, rf_src, rf_ref)
    jax.block_until_ready(out)
    print("KERNEL_OK")
</pallas_src>

<mosaic_0001>
module attributes {stable_mosaic.version = 11 : i64} {
  func.func @_in_stats_kernel(%arg0: i32, %arg1: i32, %arg2: memref<1x2048x256xf32, #tpu.memory_space<vmem>>, %arg3: memref<1x2x256xf32, #tpu.memory_space<vmem>>, %arg4: memref<1x256xf32, #tpu.memory_space<vmem>>, %arg5: memref<1x256xf32, #tpu.memory_space<vmem>>) attributes {dimension_semantics = [#tpu.dimension_semantics<parallel>, #tpu.dimension_semantics<arbitrary>], iteration_bounds = array<i64: 1, 2>, scalar_prefetch = 0 : i64, scratch_operands = 2 : i64, tpu.core_type = #tpu.core_type<tc>, window_params = [{transform_indices = @transform_0, window_bounds = array<i64: 1, 2048, 256>}, {transform_indices = @transform_1, window_bounds = array<i64: 1, 2, 256>}]} {
    %c0_i32 = arith.constant 0 : i32
    %0 = arith.cmpi eq, %arg1, %c0_i32 : i32
    %1 = arith.extui %0 : i1 to i32
    %c0_i32_0 = arith.constant 0 : i32
    %2 = arith.cmpi ne, %1, %c0_i32_0 : i32
    scf.if %2 {
      %cst_13 = arith.constant 0.000000e+00 : f32
      %19 = vector.broadcast %cst_13 : f32 to vector<1x256xf32>
      %c0_14 = arith.constant 0 : index
      %c0_15 = arith.constant 0 : index
      %20 = vector.load %arg4[%c0_14, %c0_15] : memref<1x256xf32, #tpu.memory_space<vmem>>, vector<1x256xf32>
      tpu.vector_store %arg4[%c0_14, %c0_15], %19 {strides = array<i32>} : memref<1x256xf32, #tpu.memory_space<vmem>>, vector<1x256xf32>,
      %cst_16 = arith.constant 0.000000e+00 : f32
      %21 = vector.broadcast %cst_16 : f32 to vector<1x256xf32>
      %c0_17 = arith.constant 0 : index
      %c0_18 = arith.constant 0 : index
      %22 = vector.load %arg5[%c0_17, %c0_18] : memref<1x256xf32, #tpu.memory_space<vmem>>, vector<1x256xf32>
      tpu.vector_store %arg5[%c0_17, %c0_18], %21 {strides = array<i32>} : memref<1x256xf32, #tpu.memory_space<vmem>>, vector<1x256xf32>,
    } else {
    }
    %c0 = arith.constant 0 : index
    %c0_1 = arith.constant 0 : index
    %c0_2 = arith.constant 0 : index
    %3 = vector.load %arg2[%c0, %c0_1, %c0_2] : memref<1x2048x256xf32, #tpu.memory_space<vmem>>, vector<1x2048x256xf32>
    %4 = vector.shape_cast %3 : vector<1x2048x256xf32> to vector<2048x256xf32>
    %c0_3 = arith.constant 0 : index
    %c0_4 = arith.constant 0 : index
    %5 = vector.load %arg4[%c0_3, %c0_4] : memref<1x256xf32, #tpu.memory_space<vmem>>, vector<1x256xf32>
    %cst = arith.constant dense<0.000000e+00> : vector<256xf32>
    %6 = vector.multi_reduction <add>, %4, %cst [0] : vector<2048x256xf32> to vector<256xf32>
    %7 = vector.shape_cast %6 : vector<256xf32> to vector<1x256xf32>
    %8 = arith.addf %5, %7 : vector<1x256xf32>
    %c0_5 = arith.constant 0 : index
    %c0_6 = arith.constant 0 : index
    %9 = vector.load %arg4[%c0_5, %c0_6] : memref<1x256xf32, #tpu.memory_space<vmem>>, vector<1x256xf32>
    tpu.vector_store %arg4[%c0_5, %c0_6], %8 {strides = array<i32>} : memref<1x256xf32, #tpu.memory_space<vmem>>, vector<1x256xf32>,
    %c0_7 = arith.constant 0 : index
    %c0_8 = arith.constant 0 : index
    %10 = vector.load %arg5[%c0_7, %c0_8] : memref<1x256xf32, #tpu.memory_space<vmem>>, vector<1x256xf32>
    %11 = arith.mulf %4, %4 : vector<2048x256xf32>
    %cst_9 = arith.constant dense<0.000000e+00> : vector<256xf32>
    %12 = vector.multi_reduction <add>, %11, %cst_9 [0] : vector<2048x256xf32> to vector<256xf32>
    %13 = vector.shape_cast %12 : vector<256xf32> to vector<1x256xf32>
    %14 = arith.addf %10, %13 : vector<1x256xf32>
    %c0_10 = arith.constant 0 : index
    %c0_11 = arith.constant 0 : index
    %15 = vector.load %arg5[%c0_10, %c0_11] : memref<1x256xf32, #tpu.memory_space<vmem>>, vector<1x256xf32>
    tpu.vector_store %arg5[%c0_10, %c0_11], %14 {strides = array<i32>} : memref<1x256xf32, #tpu.memory_space<vmem>>, vector<1x256xf32>,
    %c1_i32 = arith.constant 1 : i32
    %16 = arith.cmpi eq, %arg1, %c1_i32 : i32
    %17 = arith.extui %16 : i1 to i32
    %c0_i32_12 = arith.constant 0 : i32
    %18 = arith.cmpi ne, %17, %c0_i32_12 : i32
    scf.if %18 {
      %c0_13 = arith.constant 0 : index
      %c0_14 = arith.constant 0 : index
      %19 = vector.load %arg4[%c0_13, %c0_14] : memref<1x256xf32, #tpu.memory_space<vmem>>, vector<1x256xf32>
      %cst_15 = arith.constant 2.44140625E-4 : f32
      %20 = vector.broadcast %cst_15 : f32 to vector<1x256xf32>
      %21 = arith.mulf %19, %20 : vector<1x256xf32>
      %c0_16 = arith.constant 0 : index
      %c0_17 = arith.constant 0 : index
      %22 = vector.load %arg5[%c0_16, %c0_17] : memref<1x256xf32, #tpu.memory_space<vmem>>, vector<1x256xf32>
      %cst_18 = arith.constant 2.44140625E-4 : f32
      %23 = vector.broadcast %cst_18 : f32 to vector<1x256xf32>
      %24 = arith.mulf %22, %23 : vector<1x256xf32>
      %25 = arith.mulf %21, %21 : vector<1x256xf32>
      %26 = arith.subf %24, %25 : vector<1x256xf32>
      %c0_19 = arith.constant 0 : index
      %c0_20 = arith.constant 0 : index
      %c0_21 = arith.constant 0 : index
      %27 = vector.load %arg3[%c0_19, %c0_20, %c0_21] : memref<1x2x256xf32, #tpu.memory_space<vmem>>, vector<1x1x256xf32>
      %28 = vector.shape_cast %27 : vector<1x1x256xf32> to vector<1x256xf32>
      %29 = vector.shape_cast %21 : vector<1x256xf32> to vector<1x1x256xf32>
      tpu.vector_store %arg3[%c0_19, %c0_20, %c0_21], %29 {strides = array<i32>} : memref<1x2x256xf32, #tpu.memory_space<vmem>>, vector<1x1x256xf32>,
      %cst_22 = arith.constant 9.99999974E-6 : f32
      %30 = vector.broadcast %cst_22 : f32 to vector<1x256xf32>
      %31 = arith.addf %26, %30 : vector<1x256xf32>
      %32 = math.rsqrt %31 : vector<1x256xf32>
      %c0_23 = arith.constant 0 : index
      %c1 = arith.constant 1 : index
      %c0_24 = arith.constant 0 : index
      %33 = vector.load %arg3[%c0_23, %c1, %c0_24] : memref<1x2x256xf32, #tpu.memory_space<vmem>>, vector<1x1x256xf32>
      %34 = vector.shape_cast %33 : vector<1x1x256xf32> to vector<1x256xf32>
      %35 = vector.shape_cast %32 : vector<1x256xf32> to vector<1x1x256xf32>
      tpu.vector_store %arg3[%c0_23, %c1, %c0_24], %35 {strides = array<i32>} : memref<1x2x256xf32, #tpu.memory_space<vmem>>, vector<1x1x256xf32>,
    } else {
    }
    return
  }
  func.func @transform_0(%arg0: i32, %arg1: i32) -> (i32, i32, i32) {
    %c0_i32 = arith.constant 0 : i32
    %c0_i32_0 = arith.constant 0 : i32
    return %arg0, %arg1, %c0_i32 : i32, i32, i32
  }
  func.func @transform_1(%arg0: i32, %arg1: i32) -> (i32, i32, i32) {
    %c0_i32 = arith.constant 0 : i32
    %c0_i32_0 = arith.constant 0 : i32
    %c0_i32_1 = arith.constant 0 : i32
    return %arg0, %c0_i32, %c0_i32_0 : i32, i32, i32
  }
}

</mosaic_0001>

<bundles_post_ra>
// kernel: tpu_custom_call.1
= control target key start
LH: loop header
LB: loop body
LE: loop exit
PB: predicated region body
PF: predicated region fallthrough
CT: control target
= control target key end

     0   :  { %6 = vsyncpa [#allocation5], 0  ;;  %s5772_s0 = inlined_call_operand.hbm [shape: f32[1,4096,256], index: 0, kind: input, shape index: {}]   ;;  %s5773_s1 = inlined_call_operand.hbm [shape: f32[1,2,256], index: 1, kind: output, shape index: {}]  }
   0x1   :  { %8 = vsyncpa [#allocation5 + $0x1], 0 }
   0x2   :  { %9 = vsyncpa [#allocation6], 0  ;;  %s2568_s6 = smov 0   ;;  %s2570_s7 = smov 0  }
   0x3   :  { %s2572_s8 = smov 0   ;;  %s2574_s9 = smov 0  }
   0x4   :  { %s2576_s10 = smov 0   ;;  %s2578_s11 = smov 0  }
   0x5 LB: > { %s2359_s12 = sadd.s32 4294967295, %s2550_s11   ;;  %s24_s13 = sadd.s32 1, %s2546_s10  ;;  %s2550_s11 = sphi %s2578_s11, %s15_s11   ;;  %s2546_s10 = sphi %s2576_s10, %s6186_s10   ;;  %s2542_s9 = sphi %s2574_s9, %s6185_s9   ;;  %s2538_s8 = sphi %s2572_s8, %s6184_s8   ;;  %s2534_s7 = sphi %s2570_s7, %s6183_s7   ;;  %s2530_s6 = sphi %s2568_s6, %s6182_s6  }
   0x6   : > { %p25_p0 = scmp.ge.s32.totalorder %s24_s13, 2  ;;  %s36_s14 = sadd.s32 1, %s2538_s8 }
   0x7   : > { %p43_p1 = scmp.ne.s32.totalorder %s2538_s8, %s2534_s7  ;;  %p44_p2 = scmp.eq.s32.totalorder %s2550_s11, 0 }
   0x8   : > { %s6188_s13 = smov (%p25_p0, %s24_s13), 0  ;;  %p49_p4 = scmp.ne.s32.totalorder %s2534_s7, %s2530_s6 }
   0x9   : > { %p2604_p3 = por %p44_p2, %p43_p1  ;;  %s32_s16 = ssub.s32 %s2546_s10, %s6188_s13 }
   0xa   : > { %p50_p5 = scmp.eq.s32.totalorder %s2359_s12, 0  ;;  %p34_p6 = scmp.eq.s32.totalorder %s32_s16, 0 }
   0xb   : > { %p2386_p8 = scmp.lt.s32.totalorder %s2550_s11, 2  ;;  %s99_s19 = sand.u32 1, %s2538_s8  }
   0xc   : > { %p2613_p7 = por %p50_p5, %p49_p4  ;;  %s2375_s20 = sshll.u32 %s2546_s10, 16 }
   0xd   : > { %s2619_s18 = scalar_select %p34_p6, %s2538_s8, %s36_s14  }
   0xe   : > { %s2362_s21 = sshll.u32 %s99_s19, 12  ;;  %s112_s24 = scalar_lea.hbm %s5772_s0, %s2375_s20 }
   0xf   : > { %s103_s25 = scalar_lea.vmem [#allocation4], %s2362_s21  ;;  %p2628_p9 = pnand %p2386_p8, %p2604_p3 }
  0x10   : > { %s113_s26 = sshll.u32 %s103_s25, 4  ;;  %s100_s28 = scalar_lea.sflag [#allocation5], %s99_s19  ;;  %s114_s26 = int_to_ptr.vmem [resolvable:$true] %s113_s26 }
  0x11   : > { %p2446_p10 = pneg %p2628_p9  ;;  %s2457_s29 = scalar_lea.vmem %s114_s26, 65536 }
  0x12   : > { %p2458_p11 = scmp.ne.s32.totalorder %s114_s26, %s2457_s29  ;;  %s2552_s30 = smov [#allocation4]  }
  0x13   : > { %s2462_s2 = sshll.u32 %s2552_s30, 4  ;;  %s2463_s2 = int_to_ptr.vmem [resolvable:$false] %s2462_s2 }
  0x14   : > { %p2460_p12 = pnand %p2458_p11, %p2446_p10  ;;  %s2464_s3 = scalar_lea.vmem %s2463_s2, 131072 }
  0x15   : > { %p2465_p0 = scmp.lt.s32.totalorder %s114_s26, %s2463_s2  ;;  %p2466_p1 = scmp.lt.s32.totalorder %s2464_s3, %s2457_s29 }
  0x16   : > { %p2461_p13 = pneg %p2460_p12 }
  0x17   : > { %p2467_p2 = por %p2466_p1, %p2465_p0 }
  0x19   : > { %p2468_p3 = pnand %p2467_p2, %p2461_p13 }
  0x1b   : > { %2471 = shalt.err (!%p2468_p3)
}
  0x1c   : > { %s2553_s4 = smov 256   ;;  %s2554_s5 = smov 16  }
  0x1d   : > { %2385 = dma.hbm_to_vmem [thread:$0]  (!%p2628_p9), %s112_s24, 65536, %s114_s26, %s100_s28, %s2553_s4, %s2553_s4, %s2554_s5  }
  0x1e   : > { %p2366_p4 = scmp.ge.s32.totalorder %s2550_s11, 1  ;;  %p121_p5 = scmp.lt.s32.totalorder %s2550_s11, 3 }
  0x20   : > { %p122_p6 = pnand %p2366_p4, %p121_p5 }
  0x22   : > { %125 = sbr.rel (%p122_p6) target bundleno = 692 (0x2b4), region = 24 }
  0x27   : > { %s127_s6 = sand.u32 1, %s2534_s7  }
  0x28   : > { %s2367_s14 = sshll.u32 %s127_s6, 12  ;;  %s128_s15 = scalar_lea.sflag [#allocation5], %s127_s6 }
  0x29   : > { %s2639_s16 = scalar_lea.vmem [#allocation4], %s2367_s14 }
  0x2a   : > { %2521 = dma.done.wait (%p2613_p7), %s128_s15, 65536  }
  0x2b   : > { %2523 = vsyncadd (%p2613_p7), %s128_s15, 4294901760  ;;  %p2368_p8 = scmp.ne.s32.totalorder %s2542_s9, 0 }
  0x2d   : > { %149 = sbr.rel (%p2368_p8) target bundleno = 54 (0x36), region = 32 }
  0x32   : > { %v150_v0 = vlaneseq  ;;  %v2555_v1 = vmov 0.0  }
  0x34   : > { %vm152_vm0 = vcmp.lt.s32.totalorder %v150_v0, 256 }
  0x35   : > { %154 = vst.msk [vmem:[#allocation2] sm:$0x3] %vm152_vm0, %v2555_v1  ;;  %155 = vst.msk [vmem:[#allocation3] sm:$0x3] %vm152_vm0, %v2555_v1 }
  0x36 PF: > { %v2647_v2 = vld [vmem:[%s2639_s16] sm:$0xff]  ;;  %v2650_v3 = vld [vmem:[%s2639_s16 + $0x10] sm:$0xff]  ;;  %v2653_v4 = vld [vmem:[%s2639_s16 + $0x8] sm:$0xff]  ;;  %p2369_p7 = scmp.ne.s32.totalorder %s2542_s9, 1 }
  0x37   : > { %v2656_v5 = vld [vmem:[%s2639_s16 + $0x18] sm:$0xff]  ;;  %v669_v6 = vadd.f32 %v2650_v3, %v2647_v2  ;;  %v2661_v7 = vld [vmem:[%s2639_s16 + $0x20] sm:$0xff]  ;;  %v2666_v9 = vld [vmem:[%s2639_s16 + $0x28] sm:$0xff] }
  0x38   : > { %v930_v8 = vadd.f32 %v2656_v5, %v2653_v4  ;;  %v2670_v11 = vld [vmem:[%s2639_s16 + $0x30] sm:$0xff]  ;;  %v2674_v13 = vld [vmem:[%s2639_s16 + $0x38] sm:$0xff]  ;;  %v2678_v15 = vld [vmem:[%s2639_s16 + $0x40] sm:$0xff] }
  0x39   : > { %v670_v10 = vadd.f32 %v669_v6, %v2661_v7  ;;  %v2682_v17 = vld [vmem:[%s2639_s16 + $0x48] sm:$0xff]  ;;  %v2686_v19 = vld [vmem:[%s2639_s16 + $0x50] sm:$0xff]  ;;  %v2690_v21 = vld [vmem:[%s2639_s16 + $0x58] sm:$0xff] }
  0x3a   : > { %v931_v12 = vadd.f32 %v930_v8, %v2666_v9  ;;  %v2694_v23 = vld [vmem:[%s2639_s16 + $0x60] sm:$0xff]  ;;  %v2698_v25 = vld [vmem:[%s2639_s16 + $0x68] sm:$0xff]  ;;  %v2702_v27 = vld [vmem:[%s2639_s16 + $0x70] sm:$0xff] }
  0x3b   : > { %v671_v14 = vadd.f32 %v670_v10, %v2670_v11  ;;  %v2706_v29 = vld [vmem:[%s2639_s16 + $0x78] sm:$0xff]  ;;  %v2710_v31 = vld [vmem:[%s2639_s16 + $0x80] sm:$0xff]  ;;  %v2714_v33 = vld [vmem:[%s2639_s16 + $0x88] sm:$0xff] }
  0x3c   : > { %v932_v16 = vadd.f32 %v931_v12, %v2674_v13  ;;  %v2718_v35 = vld [vmem:[%s2639_s16 + $0x90] sm:$0xff]  ;;  %v2722_v37 = vld [vmem:[%s2639_s16 + $0x98] sm:$0xff]  ;;  %v2726_v39 = vld [vmem:[%s2639_s16 + $0xa0] sm:$0xff] }
  0x3d   : > { %v672_v18 = vadd.f32 %v671_v14, %v2678_v15  ;;  %v2730_v41 = vld [vmem:[%s2639_s16 + $0xa8] sm:$0xff]  ;;  %v2734_v43 = vld [vmem:[%s2639_s16 + $0xb0] sm:$0xff]  ;;  %v2738_v45 = vld [vmem:[%s2639_s16 + $0xb8] sm:$0xff] }
  0x3e   : > { %v933_v20 = vadd.f32 %v932_v16, %v2682_v17  ;;  %v2742_v47 = vld [vmem:[%s2639_s16 + $0xc0] sm:$0xff]  ;;  %v2746_v49 = vld [vmem:[%s2639_s16 + $0xc8] sm:$0xff]  ;;  %v2750_v51 = vld [vmem:[%s2639_s16 + $0xd0] sm:$0xff] }
  0x3f   : > { %v673_v22 = vadd.f32 %v672_v18, %v2686_v19  ;;  %v2754_v53 = vld [vmem:[%s2639_s16 + $0xd8] sm:$0xff]  ;;  %v2758_v55 = vld [vmem:[%s2639_s16 + $0xe0] sm:$0xff]  ;;  %v2762_v57 = vld [vmem:[%s2639_s16 + $0xe8] sm:$0xff] }
  0x40   : > { %v934_v24 = vadd.f32 %v933_v20, %v2690_v21  ;;  %v2766_v59 = vld [vmem:[%s2639_s16 + $0xf0] sm:$0xff]  ;;  %v2770_v61 = vld [vmem:[%s2639_s16 + $0xf8] sm:$0xff]  ;;  %v2774_v63 = vld [vmem:[%s2639_s16 + $0x100] sm:$0xff] }
  0x41   : > { %v674_v26 = vadd.f32 %v673_v22, %v2694_v23  ;;  %v2778_v1 = vld [vmem:[%s2639_s16 + $0x108] sm:$0xff]  ;;  %v2782_v8 = vld [vmem:[%s2639_s16 + $0x110] sm:$0xff]  ;;  %v2786_v12 = vld [vmem:[%s2639_s16 + $0x118] sm:$0xff] }
  0x42   : > { %v935_v28 = vadd.f32 %v934_v24, %v2698_v25  ;;  %v2790_v16 = vld [vmem:[%s2639_s16 + $0x120] sm:$0xff]  ;;  %v2794_v20 = vld [vmem:[%s2639_s16 + $0x128] sm:$0xff]  ;;  %v2798_v24 = vld [vmem:[%s2639_s16 + $0x130] sm:$0xff] }
  0x43   : > { %v675_v30 = vadd.f32 %v674_v26, %v2702_v27 }
  0x44   : > { %v936_v32 = vadd.f32 %v935_v28, %v2706_v29  ;;  %v2802_v28 = vld [vmem:[%s2639_s16 + $0x138] sm:$0xff] }
  0x45   : > { %v676_v34 = vadd.f32 %v675_v30, %v2710_v31 }
  0x46   : > { %v937_v36 = vadd.f32 %v936_v32, %v2714_v33  ;;  %v2806_v32 = vld [vmem:[%s2639_s16 + $0x140] sm:$0xff] }
  0x47   : > { %v677_v38 = vadd.f32 %v676_v34, %v2718_v35 }
  0x48   : > { %v938_v40 = vadd.f32 %v937_v36, %v2722_v37  ;;  %v2810_v36 = vld [vmem:[%s2639_s16 + $0x148] sm:$0xff] }
  0x49   : > { %v678_v42 = vadd.f32 %v677_v38, %v2726_v39 }
  0x4a   : > { %v939_v44 = vadd.f32 %v938_v40, %v2730_v41  ;;  %v2814_v40 = vld [vmem:[%s2639_s16 + $0x150] sm:$0xff] }
  0x4b   : > { %v679_v46 = vadd.f32 %v678_v42, %v2734_v43 }
  0x4c   : > { %v940_v48 = vadd.f32 %v939_v44, %v2738_v45  ;;  %v2818_v44 = vld [vmem:[%s2639_s16 + $0x158] sm:$0xff] }
  0x4d   : > { %v680_v50 = vadd.f32 %v679_v46, %v2742_v47 }
  0x4e   : > { %v941_v52 = vadd.f32 %v940_v48, %v2746_v49  ;;  %v2822_v48 = vld [vmem:[%s2639_s16 + $0x160] sm:$0xff] }
  0x4f   : > { %v681_v54 = vadd.f32 %v680_v50, %v2750_v51 }
  0x50   : > { %v942_v56 = vadd.f32 %v941_v52, %v2754_v53  ;;  %v2826_v52 = vld [vmem:[%s2639_s16 + $0x168] sm:$0xff] }
  0x51   : > { %v682_v58 = vadd.f32 %v681_v54, %v2758_v55 }
  0x52   : > { %v943_v60 = vadd.f32 %v942_v56, %v2762_v57  ;;  %v2830_v56 = vld [vmem:[%s2639_s16 + $0x170] sm:$0xff] }
  0x53   : > { %v683_v62 = vadd.f32 %v682_v58, %v2766_v59 }
  0x54   : > { %v944_v0 = vadd.f32 %v943_v60, %v2770_v61  ;;  %v2834_v60 = vld [vmem:[%s2639_s16 + $0x178] sm:$0xff] }
  0x55   : > { %v684_v6 = vadd.f32 %v683_v62, %v2774_v63 }
  0x56   : > { %v945_v10 = vadd.f32 %v944_v0, %v2778_v1  ;;  %v2838_v0 = vld [vmem:[%s2639_s16 + $0x180] sm:$0xff] }
  0x57   : > { %v685_v14 = vadd.f32 %v684_v6, %v2782_v8 }
  0x58   : > { %v946_v18 = vadd.f32 %v945_v10, %v2786_v12  ;;  %v2842_v10 = vld [vmem:[%s2639_s16 + $0x188] sm:$0xff] }
  0x59   : > { %v686_v22 = vadd.f32 %v685_v14, %v2790_v16 }
  0x5a   : > { %v947_v26 = vadd.f32 %v946_v18, %v2794_v20  ;;  %v2846_v18 = vld [vmem:[%s2639_s16 + $0x190] sm:$0xff] }
  0x5b   : > { %v687_v30 = vadd.f32 %v686_v22, %v2798_v24  ;;  %5911 = vst [vmem:[#allocation10_spill] sm:$0xff] %v2846_v18 }
  0x5c   : > { %v948_v34 = vadd.f32 %v947_v26, %v2802_v28  ;;  %v2850_v26 = vld [vmem:[%s2639_s16 + $0x198] sm:$0xff] }
  0x5d   : > { %v688_v38 = vadd.f32 %v687_v30, %v2806_v32  ;;  %5912 = vst [vmem:[#allocation11_spill] sm:$0xff] %v2850_v26 }
  0x5e   : > { %v949_v42 = vadd.f32 %v948_v34, %v2810_v36  ;;  %v2854_v34 = vld [vmem:[%s2639_s16 + $0x1a0] sm:$0xff] }
  0x5f   : > { %v689_v46 = vadd.f32 %v688_v38, %v2814_v40  ;;  %5913 = vst [vmem:[#allocation12_spill] sm:$0xff] %v2854_v34 }
  0x60   : > { %v950_v50 = vadd.f32 %v949_v42, %v2818_v44  ;;  %v2858_v42 = vld [vmem:[%s2639_s16 + $0x1a8] sm:$0xff] }
  0x61   : > { %v690_v54 = vadd.f32 %v689_v46, %v2822_v48  ;;  %5914 = vst [vmem:[#allocation13_spill] sm:$0xff] %v2858_v42 }
  0x62   : > { %v951_v58 = vadd.f32 %v950_v50, %v2826_v52  ;;  %v2862_v50 = vld [vmem:[%s2639_s16 + $0x1b0] sm:$0xff] }
  0x63   : > { %v691_v62 = vadd.f32 %v690_v54, %v2830_v56  ;;  %5915 = vst [vmem:[#allocation14_spill] sm:$0xff] %v2862_v50 }
  0x64   : > { %v952_v6 = vadd.f32 %v951_v58, %v2834_v60  ;;  %v2866_v58 = vld [vmem:[%s2639_s16 + $0x1b8] sm:$0xff] }
  0x65   : > { %v692_v14 = vadd.f32 %v691_v62, %v2838_v0  ;;  %5916 = vst [vmem:[#allocation15_spill] sm:$0xff] %v2866_v58 }
  0x66   : > { %v953_v22 = vadd.f32 %v952_v6, %v2842_v10  ;;  %v2870_v6 = vld [vmem:[%s2639_s16 + $0x1c0] sm:$0xff] }
  0x67   : > { %v693_v30 = vadd.f32 %v692_v14, %v2846_v18  ;;  %v2882_v18 = vld [vmem:[%s2639_s16 + $0x1d8] sm:$0xff] }
  0x68   : > { %v954_v38 = vadd.f32 %v953_v22, %v2850_v26  ;;  %v2874_v22 = vld [vmem:[%s2639_s16 + $0x1c8] sm:$0xff]  ;;  %5919 = vst [vmem:[#allocation18_spill] sm:$0xff] %v2882_v18 }
  0x69   : > { %v694_v46 = vadd.f32 %v693_v30, %v2854_v34  ;;  %5917 = vst [vmem:[#allocation16_spill] sm:$0xff] %v2874_v22  ;;  %v2878_v30 = vld [vmem:[%s2639_s16 + $0x1d0] sm:$0xff] }
  0x6a   : > { %v955_v54 = vadd.f32 %v954_v38, %v2858_v42  ;;  %5918 = vst [vmem:[#allocation17_spill] sm:$0xff] %v2878_v30  ;;  %v2886_v42 = vld [vmem:[%s2639_s16 + $0x1e0] sm:$0xff] }
  0x6b   : > { %v695_v62 = vadd.f32 %v694_v46, %v2862_v50  ;;  %5920 = vst [vmem:[#allocation19_spill] sm:$0xff] %v2886_v42  ;;  %v2894_v50 = vld [vmem:[%s2639_s16 + $0x1f0] sm:$0xff] }
  0x6c   : > { %v956_v14 = vadd.f32 %v955_v54, %v2866_v58  ;;  %v2890_v54 = vld [vmem:[%s2639_s16 + $0x1e8] sm:$0xff]  ;;  %5922 = vst [vmem:[#allocation21_spill] sm:$0xff] %v2894_v50 }
  0x6d   : > { %v696_v26 = vadd.f32 %v695_v62, %v2870_v6  ;;  %5921 = vst [vmem:[#allocation20_spill] sm:$0xff] %v2890_v54 }
  0x6e   : > { %v957_v34 = vadd.f32 %v956_v14, %v2874_v22  ;;  %v2898_v14 = vld [vmem:[%s2639_s16 + $0x1f8] sm:$0xff] }
  0x6f   : > { %v697_v38 = vadd.f32 %v696_v26, %v2878_v30  ;;  %5923 = vst [vmem:[#allocation22_spill] sm:$0xff] %v2898_v14  ;;  %v1216_v26 = vmul.f32 %v2647_v2, %v2647_v2  ;;  %v1220_v2 = vmul.f32 %v2661_v7, %v2661_v7  ;;  %v2938_v30 = vld [vmem:[%s2639_s16 + $0x228] sm:$0xff] }
  0x70   : > { %v958_v46 = vadd.f32 %v957_v34, %v2882_v18  ;;  %v1218_v34 = vmul.f32 %v2650_v3, %v2650_v3  ;;  %v2906_v18 = vld [vmem:[%s2639_s16 + $0x200] sm:$0xff]  ;;  %v2920_v3 = vld [vmem:[%s2639_s16 + $0x210] sm:$0xff] }
  0x71   : > { %v698_v58 = vadd.f32 %v697_v38, %v2886_v42  ;;  %5924 = vst [vmem:[#allocation23_spill] sm:$0xff] %v2906_v18  ;;  %v1217_v42 = vmul.f32 %v2653_v4, %v2653_v4  ;;  %5926 = vst [vmem:[#allocation25_spill] sm:$0xff] %v2920_v3  ;;  %v2926_v4 = vld [vmem:[%s2639_s16 + $0x218] sm:$0xff] }
  0x72   : > { %v959_v62 = vadd.f32 %v958_v46, %v2890_v54  ;;  %v1219_v46 = vmul.f32 %v2656_v5, %v2656_v5  ;;  %v2914_v54 = vld [vmem:[%s2639_s16 + $0x208] sm:$0xff] }
  0x73   : > { %v699_v22 = vadd.f32 %v698_v58, %v2894_v50  ;;  %5925 = vst [vmem:[#allocation24_spill] sm:$0xff] %v2914_v54 }
  0x74   : > { %v960_v38 = vadd.f32 %v959_v62, %v2898_v14  ;;  %v1221_v62 = vmul.f32 %v2666_v9, %v2666_v9  ;;  %v1222_v14 = vmul.f32 %v2670_v11, %v2670_v11  ;;  %v2944_v11 = vld [vmem:[%s2639_s16 + $0x230] sm:$0xff] }
  0x75   : > { %v700_v58 = vadd.f32 %v699_v22, %v2906_v18  ;;  %v1728_v22 = vadd.f32 %v1218_v34, %v1216_v26  ;;  %v2932_v18 = vld [vmem:[%s2639_s16 + $0x220] sm:$0xff] }
  0x76   : > { %v961_v50 = vadd.f32 %v960_v38, %v2914_v54  ;;  %v1223_v38 = vmul.f32 %v2674_v13, %v2674_v13  ;;  %v1989_v54 = vadd.f32 %v1219_v46, %v1217_v42  ;;  %v2950_v13 = vld [vmem:[%s2639_s16 + $0x238] sm:$0xff]  ;;  %v1226_v46 = vmul.f32 %v2686_v19, %v2686_v19  ;;  %v2968_v19 = vld [vmem:[%s2639_s16 + $0x250] sm:$0xff] }
  0x77   : > { %v701_v5 = vadd.f32 %v700_v58, %v2920_v3  ;;  %v1224_v58 = vmul.f32 %v2678_v15, %v2678_v15  ;;  %v1729_v3 = vadd.f32 %v1728_v22, %v1220_v2  ;;  %v2956_v15 = vld [vmem:[%s2639_s16 + $0x240] sm:$0xff]  ;;  %v1227_v22 = vmul.f32 %v2690_v21, %v2690_v21  ;;  %v2974_v21 = vld [vmem:[%s2639_s16 + $0x258] sm:$0xff] }
  0x78   : > { %v962_v7 = vadd.f32 %v961_v50, %v2926_v4  ;;  %v1225_v50 = vmul.f32 %v2682_v17, %v2682_v17  ;;  %v1990_v34 = vadd.f32 %v1989_v54, %v1221_v62  ;;  %v2962_v17 = vld [vmem:[%s2639_s16 + $0x248] sm:$0xff]  ;;  %v1228_v62 = vmul.f32 %v2694_v23, %v2694_v23  ;;  %v2980_v23 = vld [vmem:[%s2639_s16 + $0x260] sm:$0xff] }
  0x79   : > { %v702_v9 = vadd.f32 %v701_v5, %v2932_v18  ;;  %v1730_v5 = vadd.f32 %v1729_v3, %v1222_v14  ;;  %v1229_v3 = vmul.f32 %v2698_v25, %v2698_v25  ;;  %v2986_v25 = vld [vmem:[%s2639_s16 + $0x268] sm:$0xff] }
  0x7a   : > { %v963_v26 = vadd.f32 %v962_v7, %v2938_v30  ;;  %v1991_v7 = vadd.f32 %v1990_v34, %v1223_v38  ;;  %v1230_v34 = vmul.f32 %v2702_v27, %v2702_v27  ;;  %v2992_v27 = vld [vmem:[%s2639_s16 + $0x270] sm:$0xff] }
  0x7b   : > { %v703_v42 = vadd.f32 %v702_v9, %v2944_v11  ;;  %v1731_v9 = vadd.f32 %v1730_v5, %v1224_v58  ;;  %v1231_v5 = vmul.f32 %v2706_v29, %v2706_v29  ;;  %v2998_v29 = vld [vmem:[%s2639_s16 + $0x278] sm:$0xff] }
  0x7c   : > { %v964_v2 = vadd.f32 %v963_v26, %v2950_v13  ;;  %v1992_v26 = vadd.f32 %v1991_v7, %v1225_v50  ;;  %v1232_v7 = vmul.f32 %v2710_v31, %v2710_v31  ;;  %v3004_v31 = vld [vmem:[%s2639_s16 + $0x280] sm:$0xff] }
  0x7d   : > { %v704_v54 = vadd.f32 %v703_v42, %v2956_v15  ;;  %v1732_v42 = vadd.f32 %v1731_v9, %v1226_v46  ;;  %v1233_v9 = vmul.f32 %v2714_v33, %v2714_v33  ;;  %v3010_v33 = vld [vmem:[%s2639_s16 + $0x288] sm:$0xff] }
  0x7e   : > { %v965_v14 = vadd.f32 %v964_v2, %v2962_v17  ;;  %v1993_v2 = vadd.f32 %v1992_v26, %v1227_v22  ;;  %v1234_v26 = vmul.f32 %v2718_v35, %v2718_v35  ;;  %v3016_v35 = vld [vmem:[%s2639_s16 + $0x290] sm:$0xff] }
  0x7f   : > { %v705_v38 = vadd.f32 %v704_v54, %v2968_v19  ;;  %v1733_v54 = vadd.f32 %v1732_v42, %v1228_v62  ;;  %v1235_v42 = vmul.f32 %v2722_v37, %v2722_v37  ;;  %v3022_v37 = vld [vmem:[%s2639_s16 + $0x298] sm:$0xff] }
  0x80   : > { %v966_v58 = vadd.f32 %v965_v14, %v2974_v21  ;;  %v1994_v14 = vadd.f32 %v1993_v2, %v1229_v3  ;;  %v1236_v2 = vmul.f32 %v2726_v39, %v2726_v39  ;;  %v3028_v39 = vld [vmem:[%s2639_s16 + $0x2a0] sm:$0xff] }
  0x81   : > { %v706_v50 = vadd.f32 %v705_v38, %v2980_v23  ;;  %v1734_v38 = vadd.f32 %v1733_v54, %v1230_v34  ;;  %v1237_v54 = vmul.f32 %v2730_v41, %v2730_v41  ;;  %v3034_v41 = vld [vmem:[%s2639_s16 + $0x2a8] sm:$0xff] }
  0x82   : > { %v967_v46 = vadd.f32 %v966_v58, %v2986_v25  ;;  %v1995_v58 = vadd.f32 %v1994_v14, %v1231_v5  ;;  %v1238_v14 = vmul.f32 %v2734_v43, %v2734_v43  ;;  %v3040_v43 = vld [vmem:[%s2639_s16 + $0x2b0] sm:$0xff] }
  0x83   : > { %v707_v22 = vadd.f32 %v706_v50, %v2992_v27  ;;  %v1735_v50 = vadd.f32 %v1734_v38, %v1232_v7  ;;  %v1239_v38 = vmul.f32 %v2738_v45, %v2738_v45  ;;  %v3046_v45 = vld [vmem:[%s2639_s16 + $0x2b8] sm:$0xff] }
  0x84   : > { %v968_v62 = vadd.f32 %v967_v46, %v2998_v29  ;;  %v1996_v46 = vadd.f32 %v1995_v58, %v1233_v9  ;;  %v1240_v58 = vmul.f32 %v2742_v47, %v2742_v47  ;;  %v3052_v47 = vld [vmem:[%s2639_s16 + $0x2c0] sm:$0xff] }
  0x85   : > { %v708_v3 = vadd.f32 %v707_v22, %v3004_v31  ;;  %v1736_v22 = vadd.f32 %v1735_v50, %v1234_v26  ;;  %v1241_v50 = vmul.f32 %v2746_v49, %v2746_v49  ;;  %v3058_v49 = vld [vmem:[%s2639_s16 + $0x2c8] sm:$0xff] }
  0x86   : > { %v969_v34 = vadd.f32 %v968_v62, %v3010_v33  ;;  %v1997_v62 = vadd.f32 %v1996_v46, %v1235_v42  ;;  %v1242_v46 = vmul.f32 %v2750_v51, %v2750_v51  ;;  %v3064_v51 = vld [vmem:[%s2639_s16 + $0x2d0] sm:$0xff] }
  0x87   : > { %v709_v5 = vadd.f32 %v708_v3, %v3016_v35  ;;  %v1737_v3 = vadd.f32 %v1736_v22, %v1236_v2  ;;  %v1243_v22 = vmul.f32 %v2754_v53, %v2754_v53  ;;  %v3070_v53 = vld [vmem:[%s2639_s16 + $0x2d8] sm:$0xff] }
  0x88   : > { %v970_v7 = vadd.f32 %v969_v34, %v3022_v37  ;;  %v1998_v34 = vadd.f32 %v1997_v62, %v1237_v54  ;;  %v1244_v62 = vmul.f32 %v2758_v55, %v2758_v55  ;;  %v3076_v55 = vld [vmem:[%s2639_s16 + $0x2e0] sm:$0xff] }
  0x89   : > { %v710_v9 = vadd.f32 %v709_v5, %v3028_v39  ;;  %v1738_v5 = vadd.f32 %v1737_v3, %v1238_v14  ;;  %v1245_v3 = vmul.f32 %v2762_v57, %v2762_v57  ;;  %v3082_v57 = vld [vmem:[%s2639_s16 + $0x2e8] sm:$0xff] }
  0x8a   : > { %v971_v26 = vadd.f32 %v970_v7, %v3034_v41  ;;  %v1999_v7 = vadd.f32 %v1998_v34, %v1239_v38  ;;  %v1246_v34 = vmul.f32 %v2766_v59, %v2766_v59  ;;  %v3088_v59 = vld [vmem:[%s2639_s16 + $0x2f0] sm:$0xff] }
  0x8b   : > { %v711_v42 = vadd.f32 %v710_v9, %v3040_v43  ;;  %v1739_v9 = vadd.f32 %v1738_v5, %v1240_v58  ;;  %v1247_v5 = vmul.f32 %v2770_v61, %v2770_v61  ;;  %v3094_v61 = vld [vmem:[%s2639_s16 + $0x2f8] sm:$0xff] }
  0x8c   : > { %v972_v2 = vadd.f32 %v971_v26, %v3046_v45  ;;  %v2000_v26 = vadd.f32 %v1999_v7, %v1241_v50  ;;  %v1248_v7 = vmul.f32 %v2774_v63, %v2774_v63  ;;  %v3100_v63 = vld [vmem:[%s2639_s16 + $0x300] sm:$0xff] }
  0x8d   : > { %v712_v54 = vadd.f32 %v711_v42, %v3052_v47  ;;  %v1740_v42 = vadd.f32 %v1739_v9, %v1242_v46  ;;  %v1249_v9 = vmul.f32 %v2778_v1, %v2778_v1  ;;  %v3106_v1 = vld [vmem:[%s2639_s16 + $0x308] sm:$0xff] }
  0x8e   : > { %v973_v14 = vadd.f32 %v972_v2, %v3058_v49  ;;  %v2001_v2 = vadd.f32 %v2000_v26, %v1243_v22  ;;  %v1250_v26 = vmul.f32 %v2782_v8, %v2782_v8  ;;  %v3112_v8 = vld [vmem:[%s2639_s16 + $0x310] sm:$0xff] }
  0x8f   : > { %v713_v38 = vadd.f32 %v712_v54, %v3064_v51  ;;  %v1741_v54 = vadd.f32 %v1740_v42, %v1244_v62  ;;  %v1251_v42 = vmul.f32 %v2786_v12, %v2786_v12  ;;  %v3118_v12 = vld [vmem:[%s2639_s16 + $0x318] sm:$0xff] }
  0x90   : > { %v974_v58 = vadd.f32 %v973_v14, %v3070_v53  ;;  %v2002_v14 = vadd.f32 %v2001_v2, %v1245_v3  ;;  %v1252_v2 = vmul.f32 %v2790_v16, %v2790_v16  ;;  %v3124_v16 = vld [vmem:[%s2639_s16 + $0x320] sm:$0xff] }
  0x91   : > { %v714_v50 = vadd.f32 %v713_v38, %v3076_v55  ;;  %v1742_v38 = vadd.f32 %v1741_v54, %v1246_v34  ;;  %v1253_v54 = vmul.f32 %v2794_v20, %v2794_v20  ;;  %v3130_v20 = vld [vmem:[%s2639_s16 + $0x328] sm:$0xff] }
  0x92   : > { %v975_v46 = vadd.f32 %v974_v58, %v3082_v57  ;;  %v2003_v58 = vadd.f32 %v2002_v14, %v1247_v5  ;;  %v1254_v14 = vmul.f32 %v2798_v24, %v2798_v24  ;;  %v3136_v24 = vld [vmem:[%s2639_s16 + $0x330] sm:$0xff] }
  0x93   : > { %v715_v22 = vadd.f32 %v714_v50, %v3088_v59  ;;  %v1743_v50 = vadd.f32 %v1742_v38, %v1248_v7  ;;  %v1255_v38 = vmul.f32 %v2802_v28, %v2802_v28  ;;  %v3142_v28 = vld [vmem:[%s2639_s16 + $0x338] sm:$0xff] }
  0x94   : > { %v976_v62 = vadd.f32 %v975_v46, %v3094_v61  ;;  %v2004_v46 = vadd.f32 %v2003_v58, %v1249_v9  ;;  %v1256_v58 = vmul.f32 %v2806_v32, %v2806_v32  ;;  %v3148_v32 = vld [vmem:[%s2639_s16 + $0x340] sm:$0xff] }
  0x95   : > { %v716_v3 = vadd.f32 %v715_v22, %v3100_v63  ;;  %v1744_v22 = vadd.f32 %v1743_v50, %v1250_v26  ;;  %v1257_v50 = vmul.f32 %v2810_v36, %v2810_v36  ;;  %v3154_v36 = vld [vmem:[%s2639_s16 + $0x348] sm:$0xff] }
  0x96   : > { %v977_v34 = vadd.f32 %v976_v62, %v3106_v1  ;;  %v2005_v62 = vadd.f32 %v2004_v46, %v1251_v42  ;;  %v1258_v46 = vmul.f32 %v2814_v40, %v2814_v40  ;;  %v3160_v40 = vld [vmem:[%s2639_s16 + $0x350] sm:$0xff] }
  0x97   : > { %v717_v5 = vadd.f32 %v716_v3, %v3112_v8  ;;  %v1745_v3 = vadd.f32 %v1744_v22, %v1252_v2  ;;  %v1259_v22 = vmul.f32 %v2818_v44, %v2818_v44  ;;  %v3166_v44 = vld [vmem:[%s2639_s16 + $0x358] sm:$0xff] }
  0x98   : > { %v978_v7 = vadd.f32 %v977_v34, %v3118_v12  ;;  %v2006_v34 = vadd.f32 %v2005_v62, %v1253_v54  ;;  %v1260_v62 = vmul.f32 %v2822_v48, %v2822_v48  ;;  %v3172_v48 = vld [vmem:[%s2639_s16 + $0x360] sm:$0xff] }
  0x99   : > { %v718_v9 = vadd.f32 %v717_v5, %v3124_v16  ;;  %v1746_v5 = vadd.f32 %v1745_v3, %v1254_v14  ;;  %v1261_v3 = vmul.f32 %v2826_v52, %v2826_v52  ;;  %5927 = vst [vmem:[#allocation26_spill] sm:$0xff] %v3172_v48  ;;  %v3178_v52 = vld [vmem:[%s2639_s16 + $0x368] sm:$0xff] }
  0x9a   : > { %v979_v26 = vadd.f32 %v978_v7, %v3130_v20  ;;  %v2007_v7 = vadd.f32 %v2006_v34, %v1255_v38  ;;  %v1262_v34 = vmul.f32 %v2830_v56, %v2830_v56  ;;  %5928 = vst [vmem:[#allocation27_spill] sm:$0xff] %v3178_v52  ;;  %v3184_v56 = vld [vmem:[%s2639_s16 + $0x370] sm:$0xff] }
  0x9b   : > { %v719_v42 = vadd.f32 %v718_v9, %v3136_v24  ;;  %v1747_v9 = vadd.f32 %v1746_v5, %v1256_v58  ;;  %v1263_v5 = vmul.f32 %v2834_v60, %v2834_v60  ;;  %5929 = vst [vmem:[#allocation28_spill] sm:$0xff] %v3184_v56  ;;  %v3190_v60 = vld [vmem:[%s2639_s16 + $0x378] sm:$0xff] }
  0x9c   : > { %v980_v2 = vadd.f32 %v979_v26, %v3142_v28  ;;  %v2008_v26 = vadd.f32 %v2007_v7, %v1257_v50  ;;  %v1264_v7 = vmul.f32 %v2838_v0, %v2838_v0  ;;  %5930 = vst [vmem:[#allocation29_spill] sm:$0xff] %v3190_v60  ;;  %v3196_v0 = vld [vmem:[%s2639_s16 + $0x380] sm:$0xff] }
  0x9d   : > { %v720_v54 = vadd.f32 %v719_v42, %v3148_v32  ;;  %v1748_v42 = vadd.f32 %v1747_v9, %v1258_v46  ;;  %v1265_v9 = vmul.f32 %v2842_v10, %v2842_v10  ;;  %v3202_v10 = vld [vmem:[%s2639_s16 + $0x388] sm:$0xff] }
  0x9e   : > { %v981_v14 = vadd.f32 %v980_v2, %v3154_v36  ;;  %v2009_v2 = vadd.f32 %v2008_v26, %v1259_v22  ;;  %v5931_v26 = vld [vmem:[#allocation10_spill] sm:$0xff] }
  0x9f   : > { %v721_v38 = vadd.f32 %v720_v54, %v3160_v40  ;;  %v1749_v54 = vadd.f32 %v1748_v42, %v1260_v62  ;;  %5932 = vst [vmem:[#allocation10_spill] sm:$0xff] %v3196_v0  ;;  %v5933_v42 = vld [vmem:[#allocation11_spill] sm:$0xff] }
  0xa0   : > { %v982_v58 = vadd.f32 %v981_v14, %v3166_v44  ;;  %v2010_v14 = vadd.f32 %v2009_v2, %v1261_v3  ;;  %5934 = vst [vmem:[#allocation11_spill] sm:$0xff] %v3202_v10  ;;  %v5935_v2 = vld [vmem:[#allocation12_spill] sm:$0xff] }
  0xa1   : > { %v722_v50 = vadd.f32 %v721_v38, %v3172_v48  ;;  %v1266_v38 = vmul.f32 %v5931_v26, %v5931_v26  ;;  %v1750_v48 = vadd.f32 %v1749_v54, %v1262_v34  ;;  %v3208_v26 = vld [vmem:[%s2639_s16 + $0x390] sm:$0xff]  ;;  %v5936_v54 = vld [vmem:[#allocation13_spill] sm:$0xff] }
  0xa2   : > { %v983_v46 = vadd.f32 %v982_v58, %v3178_v52  ;;  %v1267_v58 = vmul.f32 %v5933_v42, %v5933_v42  ;;  %v2011_v52 = vadd.f32 %v2010_v14, %v1263_v5  ;;  %v3214_v42 = vld [vmem:[%s2639_s16 + $0x398] sm:$0xff]  ;;  %v5938_v14 = vld [vmem:[#allocation14_spill] sm:$0xff] }
  0xa3   : > { %v723_v22 = vadd.f32 %v722_v50, %v3184_v56  ;;  %v1268_v50 = vmul.f32 %v5935_v2, %v5935_v2  ;;  %v1751_v56 = vadd.f32 %v1750_v48, %v1264_v7  ;;  %5937 = vst [vmem:[#allocation12_spill] sm:$0xff] %v3214_v42  ;;  %v3220_v2 = vld [vmem:[%s2639_s16 + $0x3a0] sm:$0xff]  ;;  %v5940_v7 = vld [vmem:[#allocation15_spill] sm:$0xff] }
  0xa4   : > { %v984_v62 = vadd.f32 %v983_v46, %v3190_v60  ;;  %v1269_v46 = vmul.f32 %v5936_v54, %v5936_v54  ;;  %v2012_v60 = vadd.f32 %v2011_v52, %v1265_v9  ;;  %5939 = vst [vmem:[#allocation13_spill] sm:$0xff] %v3220_v2  ;;  %v3226_v54 = vld [vmem:[%s2639_s16 + $0x3a8] sm:$0xff]  ;;  %v1272_v9 = vmul.f32 %v2870_v6, %v2870_v6  ;;  %v3244_v6 = vld [vmem:[%s2639_s16 + $0x3c0] sm:$0xff] }
  0xa5   : > { %v724_v3 = vadd.f32 %v723_v22, %v3196_v0  ;;  %v1270_v22 = vmul.f32 %v5938_v14, %v5938_v14  ;;  %v1752_v0 = vadd.f32 %v1751_v56, %v1266_v38  ;;  %5941 = vst [vmem:[#allocation14_spill] sm:$0xff] %v3226_v54  ;;  %v3232_v14 = vld [vmem:[%s2639_s16 + $0x3b0] sm:$0xff] }
  0xa6   : > { %v985_v34 = vadd.f32 %v984_v62, %v3202_v10  ;;  %v1271_v62 = vmul.f32 %v5940_v7, %v5940_v7  ;;  %v2013_v10 = vadd.f32 %v2012_v60, %v1267_v58  ;;  %5942 = vst [vmem:[#allocation15_spill] sm:$0xff] %v3232_v14  ;;  %v5943_v38 = vld [vmem:[#allocation16_spill] sm:$0xff]  ;;  %v5945_v58 = vld [vmem:[#allocation17_spill] sm:$0xff] }
  0xa7   : > { %v725_v5 = vadd.f32 %v724_v3, %v3208_v26  ;;  %v1753_v3 = vadd.f32 %v1752_v0, %v1268_v50  ;;  %v3238_v7 = vld [vmem:[%s2639_s16 + $0x3b8] sm:$0xff]  ;;  %5946 = vst [vmem:[#allocation17_spill] sm:$0xff] %v3244_v6  ;;  %v5947_v50 = vld [vmem:[#allocation18_spill] sm:$0xff] }
  0xa8   : > { %v986_v48 = vadd.f32 %v985_v34, %v3214_v42  ;;  %v1273_v34 = vmul.f32 %v5943_v38, %v5943_v38  ;;  %v2014_v42 = vadd.f32 %v2013_v10, %v1269_v46  ;;  %5944 = vst [vmem:[#allocation16_spill] sm:$0xff] %v3238_v7  ;;  %v3250_v38 = vld [vmem:[%s2639_s16 + $0x3c8] sm:$0xff] }
  0xa9   : > { %v726_v52 = vadd.f32 %v725_v5, %v3220_v2  ;;  %v1274_v5 = vmul.f32 %v5945_v58, %v5945_v58  ;;  %v1754_v2 = vadd.f32 %v1753_v3, %v1270_v22  ;;  %5948 = vst [vmem:[#allocation18_spill] sm:$0xff] %v3250_v38  ;;  %v5949_v46 = vld [vmem:[#allocation19_spill] sm:$0xff]  ;;  %v5951_v3 = vld [vmem:[#allocation20_spill] sm:$0xff] }
  0xaa   : > { %v987_v56 = vadd.f32 %v986_v48, %v3226_v54  ;;  %v1275_v48 = vmul.f32 %v5947_v50, %v5947_v50  ;;  %v2015_v54 = vadd.f32 %v2014_v42, %v1271_v62  ;;  %v3256_v58 = vld [vmem:[%s2639_s16 + $0x3d0] sm:$0xff]  ;;  %v3262_v50 = vld [vmem:[%s2639_s16 + $0x3d8] sm:$0xff] }
  0xab   : > { %v727_v60 = vadd.f32 %v726_v52, %v3232_v14  ;;  %v1276_v52 = vmul.f32 %v5949_v46, %v5949_v46  ;;  %v1755_v14 = vadd.f32 %v1754_v2, %v1272_v9  ;;  %5950 = vst [vmem:[#allocation19_spill] sm:$0xff] %v3256_v58  ;;  %5952 = vst [vmem:[#allocation20_spill] sm:$0xff] %v3262_v50  ;;  %v5953_v62 = vld [vmem:[#allocation21_spill] sm:$0xff]  ;;  %v5955_v9 = vld [vmem:[#allocation22_spill] sm:$0xff] }
  0xac   : > { %v988_v0 = vadd.f32 %v987_v56, %v3238_v7  ;;  %v1277_v56 = vmul.f32 %v5951_v3, %v5951_v3  ;;  %v2016_v7 = vadd.f32 %v2015_v54, %v1273_v34  ;;  %v3268_v46 = vld [vmem:[%s2639_s16 + $0x3e0] sm:$0xff]  ;;  %v3274_v3 = vld [vmem:[%s2639_s16 + $0x3e8] sm:$0xff] }
  0xad   : > { %v728_v10 = vadd.f32 %v727_v60, %v3244_v6  ;;  %v1278_v60 = vmul.f32 %v5953_v62, %v5953_v62  ;;  %v1756_v6 = vadd.f32 %v1755_v14, %v1274_v5  ;;  %5954 = vst [vmem:[#allocation21_spill] sm:$0xff] %v3268_v46  ;;  %v5956_v34 = vld [vmem:[#allocation23_spill] sm:$0xff]  ;;  %v5957_v5 = vld [vmem:[#allocation24_spill] sm:$0xff] }
  0xae   : > { %v989_v22 = vadd.f32 %v988_v0, %v3250_v38  ;;  %v1279_v0 = vmul.f32 %v5955_v9, %v5955_v9  ;;  %v2017_v38 = vadd.f32 %v2016_v7, %v1275_v48  ;;  %v3280_v62 = vld [vmem:[%s2639_s16 + $0x3f0] sm:$0xff]  ;;  %v3286_v9 = vld [vmem:[%s2639_s16 + $0x3f8] sm:$0xff] }
  0xaf   : > { %v729_v42 = vadd.f32 %v728_v10, %v3256_v58  ;;  %v1280_v10 = vmul.f32 %v5956_v34, %v5956_v34  ;;  %v1757_v58 = vadd.f32 %v1756_v6, %v1276_v52  ;;  %v5958_v48 = vld [vmem:[#allocation25_spill] sm:$0xff]  ;;  %v1283_v52 = vmul.f32 %v2926_v4, %v2926_v4 }
  0xb0   : > { %v990_v2 = vadd.f32 %v989_v22, %v3262_v50  ;;  %v1281_v22 = vmul.f32 %v5957_v5, %v5957_v5  ;;  %v2018_v50 = vadd.f32 %v2017_v38, %v1277_v56  ;;  %v3292_v34 = vld [vmem:[%s2639_s16 + $0x400] sm:$0xff]  ;;  %v3298_v5 = vld [vmem:[%s2639_s16 + $0x408] sm:$0xff]  ;;  %v1284_v56 = vmul.f32 %v2932_v18, %v2932_v18  ;;  %v3310_v4 = vld [vmem:[%s2639_s16 + $0x418] sm:$0xff] }
  0xb1   : > { %v730_v54 = vadd.f32 %v729_v42, %v3268_v46  ;;  %v1282_v42 = vmul.f32 %v5958_v48, %v5958_v48  ;;  %v1758_v46 = vadd.f32 %v1757_v58, %v1278_v60  ;;  %v3304_v48 = vld [vmem:[%s2639_s16 + $0x410] sm:$0xff]  ;;  %v1285_v60 = vmul.f32 %v2938_v30, %v2938_v30  ;;  %v3316_v18 = vld [vmem:[%s2639_s16 + $0x420] sm:$0xff]  ;;  %v3322_v30 = vld [vmem:[%s2639_s16 + $0x428] sm:$0xff] }
  0xb2   : > { %v991_v14 = vadd.f32 %v990_v2, %v3274_v3  ;;  %v2019_v2 = vadd.f32 %v2018_v50, %v1279_v0  ;;  %v1286_v0 = vmul.f32 %v2944_v11, %v2944_v11  ;;  %v3328_v11 = vld [vmem:[%s2639_s16 + $0x430] sm:$0xff] }
  0xb3   : > { %v731_v7 = vadd.f32 %v730_v54, %v3280_v62  ;;  %v1759_v54 = vadd.f32 %v1758_v46, %v1280_v10  ;;  %v1287_v10 = vmul.f32 %v2950_v13, %v2950_v13  ;;  %v3334_v13 = vld [vmem:[%s2639_s16 + $0x438] sm:$0xff] }
  0xb4   : > { %v992_v6 = vadd.f32 %v991_v14, %v3286_v9  ;;  %v2020_v14 = vadd.f32 %v2019_v2, %v1281_v22  ;;  %v1288_v2 = vmul.f32 %v2956_v15, %v2956_v15  ;;  %v3340_v15 = vld [vmem:[%s2639_s16 + $0x440] sm:$0xff] }
  0xb5   : > { %v732_v38 = vadd.f32 %v731_v7, %v3292_v34  ;;  %v1760_v7 = vadd.f32 %v1759_v54, %v1282_v42  ;;  %v1289_v54 = vmul.f32 %v2962_v17, %v2962_v17  ;;  %v3346_v17 = vld [vmem:[%s2639_s16 + $0x448] sm:$0xff] }
  0xb6   : > { %v993_v58 = vadd.f32 %v992_v6, %v3298_v5  ;;  %v2021_v6 = vadd.f32 %v2020_v14, %v1283_v52  ;;  %v1290_v14 = vmul.f32 %v2968_v19, %v2968_v19  ;;  %v3352_v19 = vld [vmem:[%s2639_s16 + $0x450] sm:$0xff] }
  0xb7   : > { %v733_v50 = vadd.f32 %v732_v38, %v3304_v48  ;;  %v1761_v38 = vadd.f32 %v1760_v7, %v1284_v56  ;;  %v1291_v7 = vmul.f32 %v2974_v21, %v2974_v21  ;;  %v3358_v21 = vld [vmem:[%s2639_s16 + $0x458] sm:$0xff] }
  0xb8   : > { %v994_v46 = vadd.f32 %v993_v58, %v3310_v4  ;;  %v2022_v58 = vadd.f32 %v2021_v6, %v1285_v60  ;;  %v1292_v6 = vmul.f32 %v2980_v23, %v2980_v23  ;;  %v3364_v23 = vld [vmem:[%s2639_s16 + $0x460] sm:$0xff] }
  0xb9   : > { %v734_v22 = vadd.f32 %v733_v50, %v3316_v18  ;;  %v1762_v50 = vadd.f32 %v1761_v38, %v1286_v0  ;;  %v1293_v38 = vmul.f32 %v2986_v25, %v2986_v25  ;;  %v3370_v25 = vld [vmem:[%s2639_s16 + $0x468] sm:$0xff] }
  0xba   : > { %v995_v42 = vadd.f32 %v994_v46, %v3322_v30  ;;  %v2023_v46 = vadd.f32 %v2022_v58, %v1287_v10  ;;  %v1294_v58 = vmul.f32 %v2992_v27, %v2992_v27  ;;  %v3376_v27 = vld [vmem:[%s2639_s16 + $0x470] sm:$0xff] }
  0xbb   : > { %v735_v52 = vadd.f32 %v734_v22, %v3328_v11  ;;  %v1763_v22 = vadd.f32 %v1762_v50, %v1288_v2  ;;  %v1295_v50 = vmul.f32 %v2998_v29, %v2998_v29  ;;  %v3382_v29 = vld [vmem:[%s2639_s16 + $0x478] sm:$0xff] }
  0xbc   : > { %v996_v56 = vadd.f32 %v995_v42, %v3334_v13  ;;  %v2024_v42 = vadd.f32 %v2023_v46, %v1289_v54  ;;  %v1296_v46 = vmul.f32 %v3004_v31, %v3004_v31  ;;  %v3388_v31 = vld [vmem:[%s2639_s16 + $0x480] sm:$0xff] }
  0xbd   : > { %v736_v60 = vadd.f32 %v735_v52, %v3340_v15  ;;  %v1764_v52 = vadd.f32 %v1763_v22, %v1290_v14  ;;  %v1297_v22 = vmul.f32 %v3010_v33, %v3010_v33  ;;  %v3394_v33 = vld [vmem:[%s2639_s16 + $0x488] sm:$0xff] }
  0xbe   : > { %v997_v0 = vadd.f32 %v996_v56, %v3346_v17  ;;  %v2025_v56 = vadd.f32 %v2024_v42, %v1291_v7  ;;  %v1298_v42 = vmul.f32 %v3016_v35, %v3016_v35  ;;  %v3400_v35 = vld [vmem:[%s2639_s16 + $0x490] sm:$0xff] }
  0xbf   : > { %v737_v10 = vadd.f32 %v736_v60, %v3352_v19  ;;  %v1765_v60 = vadd.f32 %v1764_v52, %v1292_v6  ;;  %v1299_v52 = vmul.f32 %v3022_v37, %v3022_v37  ;;  %v3406_v37 = vld [vmem:[%s2639_s16 + $0x498] sm:$0xff] }
  0xc0   : > { %v998_v2 = vadd.f32 %v997_v0, %v3358_v21  ;;  %v2026_v0 = vadd.f32 %v2025_v56, %v1293_v38  ;;  %v1300_v56 = vmul.f32 %v3028_v39, %v3028_v39  ;;  %v3412_v39 = vld [vmem:[%s2639_s16 + $0x4a0] sm:$0xff] }
  0xc1   : > { %v738_v54 = vadd.f32 %v737_v10, %v3364_v23  ;;  %v1766_v10 = vadd.f32 %v1765_v60, %v1294_v58  ;;  %v1301_v60 = vmul.f32 %v3034_v41, %v3034_v41  ;;  %v3418_v41 = vld [vmem:[%s2639_s16 + $0x4a8] sm:$0xff] }
  0xc2   : > { %v999_v14 = vadd.f32 %v998_v2, %v3370_v25  ;;  %v2027_v2 = vadd.f32 %v2026_v0, %v1295_v50  ;;  %v1302_v0 = vmul.f32 %v3040_v43, %v3040_v43  ;;  %v3424_v43 = vld [vmem:[%s2639_s16 + $0x4b0] sm:$0xff] }
  0xc3   : > { %v739_v7 = vadd.f32 %v738_v54, %v3376_v27  ;;  %v1767_v54 = vadd.f32 %v1766_v10, %v1296_v46  ;;  %v1303_v10 = vmul.f32 %v3046_v45, %v3046_v45  ;;  %v3430_v45 = vld [vmem:[%s2639_s16 + $0x4b8] sm:$0xff] }
  0xc4   : > { %v1000_v6 = vadd.f32 %v999_v14, %v3382_v29  ;;  %v2028_v14 = vadd.f32 %v2027_v2, %v1297_v22  ;;  %v1304_v2 = vmul.f32 %v3052_v47, %v3052_v47  ;;  %v3436_v47 = vld [vmem:[%s2639_s16 + $0x4c0] sm:$0xff] }
  0xc5   : > { %v740_v38 = vadd.f32 %v739_v7, %v3388_v31  ;;  %v1768_v7 = vadd.f32 %v1767_v54, %v1298_v42  ;;  %v1305_v54 = vmul.f32 %v3058_v49, %v3058_v49  ;;  %v3442_v49 = vld [vmem:[%s2639_s16 + $0x4c8] sm:$0xff] }
  0xc6   : > { %v1001_v58 = vadd.f32 %v1000_v6, %v3394_v33  ;;  %v2029_v6 = vadd.f32 %v2028_v14, %v1299_v52  ;;  %v1306_v14 = vmul.f32 %v3064_v51, %v3064_v51  ;;  %v3448_v51 = vld [vmem:[%s2639_s16 + $0x4d0] sm:$0xff] }
  0xc7   : > { %v741_v50 = vadd.f32 %v740_v38, %v3400_v35  ;;  %v1769_v38 = vadd.f32 %v1768_v7, %v1300_v56  ;;  %v1307_v7 = vmul.f32 %v3070_v53, %v3070_v53  ;;  %v3454_v53 = vld [vmem:[%s2639_s16 + $0x4d8] sm:$0xff] }
  0xc8   : > { %v1002_v46 = vadd.f32 %v1001_v58, %v3406_v37  ;;  %v2030_v58 = vadd.f32 %v2029_v6, %v1301_v60  ;;  %v1308_v6 = vmul.f32 %v3076_v55, %v3076_v55  ;;  %v3460_v55 = vld [vmem:[%s2639_s16 + $0x4e0] sm:$0xff] }
  0xc9   : > { %v742_v22 = vadd.f32 %v741_v50, %v3412_v39  ;;  %v1770_v50 = vadd.f32 %v1769_v38, %v1302_v0  ;;  %v1309_v38 = vmul.f32 %v3082_v57, %v3082_v57  ;;  %v3466_v57 = vld [vmem:[%s2639_s16 + $0x4e8] sm:$0xff] }
  0xca   : > { %v1003_v42 = vadd.f32 %v1002_v46, %v3418_v41  ;;  %v2031_v46 = vadd.f32 %v2030_v58, %v1303_v10  ;;  %v1310_v58 = vmul.f32 %v3088_v59, %v3088_v59  ;;  %v3472_v59 = vld [vmem:[%s2639_s16 + $0x4f0] sm:$0xff] }
  0xcb   : > { %v743_v52 = vadd.f32 %v742_v22, %v3424_v43  ;;  %v1771_v22 = vadd.f32 %v1770_v50, %v1304_v2  ;;  %v1311_v50 = vmul.f32 %v3094_v61, %v3094_v61  ;;  %v3478_v61 = vld [vmem:[%s2639_s16 + $0x4f8] sm:$0xff] }
  0xcc   : > { %v1004_v56 = vadd.f32 %v1003_v42, %v3430_v45  ;;  %v2032_v42 = vadd.f32 %v2031_v46, %v1305_v54  ;;  %v1312_v46 = vmul.f32 %v3100_v63, %v3100_v63  ;;  %v3484_v63 = vld [vmem:[%s2639_s16 + $0x500] sm:$0xff] }
  0xcd   : > { %v744_v60 = vadd.f32 %v743_v52, %v3436_v47  ;;  %v1772_v52 = vadd.f32 %v1771_v22, %v1306_v14  ;;  %v1313_v22 = vmul.f32 %v3106_v1, %v3106_v1  ;;  %v3490_v1 = vld [vmem:[%s2639_s16 + $0x508] sm:$0xff] }
  0xce   : > { %v1005_v0 = vadd.f32 %v1004_v56, %v3442_v49  ;;  %v2033_v56 = vadd.f32 %v2032_v42, %v1307_v7  ;;  %v1314_v42 = vmul.f32 %v3112_v8, %v3112_v8  ;;  %v3496_v8 = vld [vmem:[%s2639_s16 + $0x510] sm:$0xff] }
  0xcf   : > { %v745_v10 = vadd.f32 %v744_v60, %v3448_v51  ;;  %v1773_v60 = vadd.f32 %v1772_v52, %v1308_v6  ;;  %v1315_v52 = vmul.f32 %v3118_v12, %v3118_v12  ;;  %v3502_v12 = vld [vmem:[%s2639_s16 + $0x518] sm:$0xff] }
  0xd0   : > { %v1006_v2 = vadd.f32 %v1005_v0, %v3454_v53  ;;  %v2034_v0 = vadd.f32 %v2033_v56, %v1309_v38  ;;  %v1316_v56 = vmul.f32 %v3124_v16, %v3124_v16  ;;  %v3508_v16 = vld [vmem:[%s2639_s16 + $0x520] sm:$0xff] }
  0xd1   : > { %v746_v54 = vadd.f32 %v745_v10, %v3460_v55  ;;  %v1774_v10 = vadd.f32 %v1773_v60, %v1310_v58  ;;  %v1317_v60 = vmul.f32 %v3130_v20, %v3130_v20  ;;  %v3514_v20 = vld [vmem:[%s2639_s16 + $0x528] sm:$0xff] }
  0xd2   : > { %v1007_v14 = vadd.f32 %v1006_v2, %v3466_v57  ;;  %v2035_v2 = vadd.f32 %v2034_v0, %v1311_v50  ;;  %v1318_v0 = vmul.f32 %v3136_v24, %v3136_v24  ;;  %v3520_v24 = vld [vmem:[%s2639_s16 + $0x530] sm:$0xff] }
  0xd3   : > { %v747_v7 = vadd.f32 %v746_v54, %v3472_v59  ;;  %v1775_v54 = vadd.f32 %v1774_v10, %v1312_v46  ;;  %v1319_v10 = vmul.f32 %v3142_v28, %v3142_v28  ;;  %5959 = vst [vmem:[#allocation22_spill] sm:$0xff] %v3520_v24  ;;  %v3526_v28 = vld [vmem:[%s2639_s16 + $0x538] sm:$0xff] }
  0xd4   : > { %v1008_v6 = vadd.f32 %v1007_v14, %v3478_v61  ;;  %v2036_v14 = vadd.f32 %v2035_v2, %v1313_v22  ;;  %v1320_v2 = vmul.f32 %v3148_v32, %v3148_v32  ;;  %5960 = vst [vmem:[#allocation23_spill] sm:$0xff] %v3526_v28  ;;  %v3532_v32 = vld [vmem:[%s2639_s16 + $0x540] sm:$0xff] }
  0xd5   : > { %v748_v38 = vadd.f32 %v747_v7, %v3484_v63  ;;  %v1776_v7 = vadd.f32 %v1775_v54, %v1314_v42  ;;  %v1321_v54 = vmul.f32 %v3154_v36, %v3154_v36  ;;  %5961 = vst [vmem:[#allocation24_spill] sm:$0xff] %v3532_v32  ;;  %v3538_v36 = vld [vmem:[%s2639_s16 + $0x548] sm:$0xff] }
  0xd6   : > { %v1009_v58 = vadd.f32 %v1008_v6, %v3490_v1  ;;  %v2037_v6 = vadd.f32 %v2036_v14, %v1315_v52  ;;  %v1322_v14 = vmul.f32 %v3160_v40, %v3160_v40  ;;  %5962 = vst [vmem:[#allocation25_spill] sm:$0xff] %v3538_v36  ;;  %v3544_v40 = vld [vmem:[%s2639_s16 + $0x550] sm:$0xff] }
  0xd7   : > { %v749_v50 = vadd.f32 %v748_v38, %v3496_v8  ;;  %v1777_v38 = vadd.f32 %v1776_v7, %v1316_v56  ;;  %v1323_v7 = vmul.f32 %v3166_v44, %v3166_v44  ;;  %v3550_v44 = vld [vmem:[%s2639_s16 + $0x558] sm:$0xff] }
  0xd8   : > { %v1010_v46 = vadd.f32 %v1009_v58, %v3502_v12  ;;  %v2038_v58 = vadd.f32 %v2037_v6, %v1317_v60  ;;  %v5963_v6 = vld [vmem:[#allocation26_spill] sm:$0xff] }
  0xd9   : > { %v750_v22 = vadd.f32 %v749_v50, %v3508_v16  ;;  %v1778_v50 = vadd.f32 %v1777_v38, %v1318_v0  ;;  %5964 = vst [vmem:[#allocation26_spill] sm:$0xff] %v3544_v40  ;;  %v5965_v38 = vld [vmem:[#allocation27_spill] sm:$0xff] }
  0xda   : > { %v1011_v42 = vadd.f32 %v1010_v46, %v3514_v20  ;;  %v2039_v46 = vadd.f32 %v2038_v58, %v1319_v10  ;;  %5966 = vst [vmem:[#allocation27_spill] sm:$0xff] %v3550_v44  ;;  %v5967_v58 = vld [vmem:[#allocation28_spill] sm:$0xff] }
  0xdb   : > { %v751_v52 = vadd.f32 %v750_v22, %v3520_v24  ;;  %v1324_v22 = vmul.f32 %v5963_v6, %v5963_v6  ;;  %v1779_v24 = vadd.f32 %v1778_v50, %v1320_v2  ;;  %v3556_v6 = vld [vmem:[%s2639_s16 + $0x560] sm:$0xff] }
  0xdc   : > { %v1012_v56 = vadd.f32 %v1011_v42, %v3526_v28  ;;  %v1325_v42 = vmul.f32 %v5965_v38, %v5965_v38  ;;  %v2040_v28 = vadd.f32 %v2039_v46, %v1321_v54  ;;  %v5968_v50 = vld [vmem:[#allocation29_spill] sm:$0xff]  ;;  %v3562_v38 = vld [vmem:[%s2639_s16 + $0x568] sm:$0xff] }
  0xdd   : > { %v752_v60 = vadd.f32 %v751_v52, %v3532_v32  ;;  %v1326_v52 = vmul.f32 %v5967_v58, %v5967_v58  ;;  %v1780_v32 = vadd.f32 %v1779_v24, %v1322_v14  ;;  %5969 = vst [vmem:[#allocation28_spill] sm:$0xff] %v3562_v38  ;;  %v5970_v46 = vld [vmem:[#allocation10_spill] sm:$0xff]  ;;  %v3568_v58 = vld [vmem:[%s2639_s16 + $0x570] sm:$0xff] }
  0xde   : > { %v1013_v0 = vadd.f32 %v1012_v56, %v3538_v36  ;;  %v1327_v56 = vmul.f32 %v5968_v50, %v5968_v50  ;;  %v2041_v36 = vadd.f32 %v2040_v28, %v1323_v7  ;;  %5971 = vst [vmem:[#allocation29_spill] sm:$0xff] %v3568_v58  ;;  %v5972_v14 = vld [vmem:[#allocation11_spill] sm:$0xff]  ;;  %v3574_v50 = vld [vmem:[%s2639_s16 + $0x578] sm:$0xff]  ;;  %v1330_v7 = vmul.f32 %v3208_v26, %v3208_v26 }
  0xdf   : > { %v753_v10 = vadd.f32 %v752_v60, %v3544_v40  ;;  %v1328_v60 = vmul.f32 %v5970_v46, %v5970_v46  ;;  %v1781_v40 = vadd.f32 %v1780_v32, %v1324_v22  ;;  %5973 = vst [vmem:[#allocation10_spill] sm:$0xff] %v3574_v50  ;;  %v3580_v46 = vld [vmem:[%s2639_s16 + $0x580] sm:$0xff]  ;;  %v5975_v22 = vld [vmem:[#allocation12_spill] sm:$0xff] }
  0xe0   : > { %v1014_v2 = vadd.f32 %v1013_v0, %v3550_v44  ;;  %v1329_v0 = vmul.f32 %v5972_v14, %v5972_v14  ;;  %v2042_v44 = vadd.f32 %v2041_v36, %v1325_v42  ;;  %5974 = vst [vmem:[#allocation11_spill] sm:$0xff] %v3580_v46  ;;  %v3586_v14 = vld [vmem:[%s2639_s16 + $0x588] sm:$0xff]  ;;  %v5977_v42 = vld [vmem:[#allocation13_spill] sm:$0xff]  ;;  %v3592_v26 = vld [vmem:[%s2639_s16 + $0x590] sm:$0xff] }
  0xe1   : > { %v754_v54 = vadd.f32 %v753_v10, %v3556_v6  ;;  %v1782_v10 = vadd.f32 %v1781_v40, %v1326_v52  ;;  %5976 = vst [vmem:[#allocation12_spill] sm:$0xff] %v3586_v14  ;;  %5978 = vst [vmem:[#allocation13_spill] sm:$0xff] %v3592_v26  ;;  %v5979_v52 = vld [vmem:[#allocation14_spill] sm:$0xff] }
  0xe2   : > { %v1015_v24 = vadd.f32 %v1014_v2, %v3562_v38  ;;  %v1331_v2 = vmul.f32 %v5975_v22, %v5975_v22  ;;  %v2043_v38 = vadd.f32 %v2042_v44, %v1327_v56  ;;  %v3598_v22 = vld [vmem:[%s2639_s16 + $0x598] sm:$0xff]  ;;  %v5981_v56 = vld [vmem:[#allocation15_spill] sm:$0xff] }
  0xe3   : > { %v755_v28 = vadd.f32 %v754_v54, %v3568_v58  ;;  %v1332_v54 = vmul.f32 %v5977_v42, %v5977_v42  ;;  %v1783_v58 = vadd.f32 %v1782_v10, %v1328_v60  ;;  %5980 = vst [vmem:[#allocation14_spill] sm:$0xff] %v3598_v22  ;;  %v3604_v42 = vld [vmem:[%s2639_s16 + $0x5a0] sm:$0xff]  ;;  %v5983_v10 = vld [vmem:[#allocation16_spill] sm:$0xff] }
  0xe4   : > { %v1016_v32 = vadd.f32 %v1015_v24, %v3574_v50  ;;  %v1333_v24 = vmul.f32 %v5979_v52, %v5979_v52  ;;  %v2044_v50 = vadd.f32 %v2043_v38, %v1329_v0  ;;  %5982 = vst [vmem:[#allocation15_spill] sm:$0xff] %v3604_v42  ;;  %v3610_v52 = vld [vmem:[%s2639_s16 + $0x5a8] sm:$0xff]  ;;  %v5985_v0 = vld [vmem:[#allocation17_spill] sm:$0xff] }
  0xe5   : > { %v756_v36 = vadd.f32 %v755_v28, %v3580_v46  ;;  %v1334_v28 = vmul.f32 %v5981_v56, %v5981_v56  ;;  %v1784_v46 = vadd.f32 %v1783_v58, %v1330_v7  ;;  %5984 = vst [vmem:[#allocation16_spill] sm:$0xff] %v3610_v52  ;;  %v3616_v56 = vld [vmem:[%s2639_s16 + $0x5b0] sm:$0xff]  ;;  %v5987_v7 = vld [vmem:[#allocation18_spill] sm:$0xff] }
  0xe6   : > { %v1017_v40 = vadd.f32 %v1016_v32, %v3586_v14  ;;  %v1335_v32 = vmul.f32 %v5983_v10, %v5983_v10  ;;  %v2045_v14 = vadd.f32 %v2044_v50, %v1331_v2  ;;  %5986 = vst [vmem:[#allocation17_spill] sm:$0xff] %v3616_v56  ;;  %v3622_v10 = vld [vmem:[%s2639_s16 + $0x5b8] sm:$0xff]  ;;  %v5988_v2 = vld [vmem:[#allocation19_spill] sm:$0xff] }
  0xe7   : > { %v757_v44 = vadd.f32 %v756_v36, %v3592_v26  ;;  %v1336_v36 = vmul.f32 %v5985_v0, %v5985_v0  ;;  %v1785_v26 = vadd.f32 %v1784_v46, %v1332_v54  ;;  %v3628_v0 = vld [vmem:[%s2639_s16 + $0x5c0] sm:$0xff]  ;;  %v5989_v54 = vld [vmem:[#allocation20_spill] sm:$0xff] }
  0xe8   : > { %v1018_v60 = vadd.f32 %v1017_v40, %v3598_v22  ;;  %v1337_v40 = vmul.f32 %v5987_v7, %v5987_v7  ;;  %v2046_v22 = vadd.f32 %v2045_v14, %v1333_v24  ;;  %v3634_v7 = vld [vmem:[%s2639_s16 + $0x5c8] sm:$0xff]  ;;  %v5990_v24 = vld [vmem:[#allocation21_spill] sm:$0xff] }
  0xe9   : > { %v758_v38 = vadd.f32 %v757_v44, %v3604_v42  ;;  %v1338_v44 = vmul.f32 %v5988_v2, %v5988_v2  ;;  %v1786_v42 = vadd.f32 %v1785_v26, %v1334_v28  ;;  %v3640_v2 = vld [vmem:[%s2639_s16 + $0x5d0] sm:$0xff]  ;;  %v1341_v28 = vmul.f32 %v3274_v3, %v3274_v3  ;;  %v3658_v3 = vld [vmem:[%s2639_s16 + $0x5e8] sm:$0xff] }
  0xea   : > { %v1019_v58 = vadd.f32 %v1018_v60, %v3610_v52  ;;  %v1339_v60 = vmul.f32 %v5989_v54, %v5989_v54  ;;  %v2047_v52 = vadd.f32 %v2046_v22, %v1335_v32  ;;  %v3646_v54 = vld [vmem:[%s2639_s16 + $0x5d8] sm:$0xff]  ;;  %v1342_v32 = vmul.f32 %v3280_v62, %v3280_v62  ;;  %v3664_v62 = vld [vmem:[%s2639_s16 + $0x5f0] sm:$0xff] }
  0xeb   : > { %v759_v50 = vadd.f32 %v758_v38, %v3616_v56  ;;  %v1340_v38 = vmul.f32 %v5990_v24, %v5990_v24  ;;  %v1787_v56 = vadd.f32 %v1786_v42, %v1336_v36  ;;  %v3652_v24 = vld [vmem:[%s2639_s16 + $0x5e0] sm:$0xff]  ;;  %v1343_v36 = vmul.f32 %v3286_v9, %v3286_v9  ;;  %v3670_v9 = vld [vmem:[%s2639_s16 + $0x5f8] sm:$0xff] }
  0xec   : > { %v1020_v46 = vadd.f32 %v1019_v58, %v3622_v10  ;;  %v2048_v58 = vadd.f32 %v2047_v52, %v1337_v40  ;;  %v1344_v40 = vmul.f32 %v3292_v34, %v3292_v34  ;;  %v3676_v34 = vld [vmem:[%s2639_s16 + $0x600] sm:$0xff] }
  0xed   : > { %v760_v14 = vadd.f32 %v759_v50, %v3628_v0  ;;  %v1788_v50 = vadd.f32 %v1787_v56, %v1338_v44  ;;  %v1345_v44 = vmul.f32 %v3298_v5, %v3298_v5  ;;  %v3682_v5 = vld [vmem:[%s2639_s16 + $0x608] sm:$0xff] }
  0xee   : > { %v1021_v26 = vadd.f32 %v1020_v46, %v3634_v7  ;;  %v2049_v46 = vadd.f32 %v2048_v58, %v1339_v60  ;;  %v1346_v58 = vmul.f32 %v3304_v48, %v3304_v48  ;;  %v3688_v48 = vld [vmem:[%s2639_s16 + $0x610] sm:$0xff] }
  0xef   : > { %v761_v22 = vadd.f32 %v760_v14, %v3640_v2  ;;  %v1789_v14 = vadd.f32 %v1788_v50, %v1340_v38  ;;  %v1347_v50 = vmul.f32 %v3310_v4, %v3310_v4  ;;  %v3694_v4 = vld [vmem:[%s2639_s16 + $0x618] sm:$0xff] }
  0xf0   : > { %v1022_v42 = vadd.f32 %v1021_v26, %v3646_v54  ;;  %v2050_v26 = vadd.f32 %v2049_v46, %v1341_v28  ;;  %v1348_v46 = vmul.f32 %v3316_v18, %v3316_v18  ;;  %v3700_v18 = vld [vmem:[%s2639_s16 + $0x620] sm:$0xff] }
  0xf1   : > { %v762_v52 = vadd.f32 %v761_v22, %v3652_v24  ;;  %v1790_v22 = vadd.f32 %v1789_v14, %v1342_v32  ;;  %v1349_v14 = vmul.f32 %v3322_v30, %v3322_v30  ;;  %v3706_v30 = vld [vmem:[%s2639_s16 + $0x628] sm:$0xff] }
  0xf2   : > { %v1023_v56 = vadd.f32 %v1022_v42, %v3658_v3  ;;  %v2051_v42 = vadd.f32 %v2050_v26, %v1343_v36  ;;  %v1350_v26 = vmul.f32 %v3328_v11, %v3328_v11  ;;  %v3712_v11 = vld [vmem:[%s2639_s16 + $0x630] sm:$0xff] }
  0xf3   : > { %v763_v60 = vadd.f32 %v762_v52, %v3664_v62  ;;  %v1791_v52 = vadd.f32 %v1790_v22, %v1344_v40  ;;  %v1351_v22 = vmul.f32 %v3334_v13, %v3334_v13  ;;  %v3718_v13 = vld [vmem:[%s2639_s16 + $0x638] sm:$0xff] }
  0xf4   : > { %v1024_v38 = vadd.f32 %v1023_v56, %v3670_v9  ;;  %v2052_v56 = vadd.f32 %v2051_v42, %v1345_v44  ;;  %v1352_v42 = vmul.f32 %v3340_v15, %v3340_v15  ;;  %v3724_v15 = vld [vmem:[%s2639_s16 + $0x640] sm:$0xff] }
  0xf5   : > { %v764_v28 = vadd.f32 %v763_v60, %v3676_v34  ;;  %v1792_v60 = vadd.f32 %v1791_v52, %v1346_v58  ;;  %v1353_v52 = vmul.f32 %v3346_v17, %v3346_v17  ;;  %v3730_v17 = vld [vmem:[%s2639_s16 + $0x648] sm:$0xff] }
  0xf6   : > { %v1025_v32 = vadd.f32 %v1024_v38, %v3682_v5  ;;  %v2053_v38 = vadd.f32 %v2052_v56, %v1347_v50  ;;  %v1354_v56 = vmul.f32 %v3352_v19, %v3352_v19  ;;  %v3736_v19 = vld [vmem:[%s2639_s16 + $0x650] sm:$0xff] }
  0xf7   : > { %v765_v36 = vadd.f32 %v764_v28, %v3688_v48  ;;  %v1793_v28 = vadd.f32 %v1792_v60, %v1348_v46  ;;  %v1355_v60 = vmul.f32 %v3358_v21, %v3358_v21  ;;  %v3742_v21 = vld [vmem:[%s2639_s16 + $0x658] sm:$0xff] }
  0xf8   : > { %v1026_v40 = vadd.f32 %v1025_v32, %v3694_v4  ;;  %v2054_v32 = vadd.f32 %v2053_v38, %v1349_v14  ;;  %v1356_v38 = vmul.f32 %v3364_v23, %v3364_v23  ;;  %v3748_v23 = vld [vmem:[%s2639_s16 + $0x660] sm:$0xff] }
  0xf9   : > { %v766_v44 = vadd.f32 %v765_v36, %v3700_v18  ;;  %v1794_v36 = vadd.f32 %v1793_v28, %v1350_v26  ;;  %v1357_v28 = vmul.f32 %v3370_v25, %v3370_v25  ;;  %v3754_v25 = vld [vmem:[%s2639_s16 + $0x668] sm:$0xff] }
  0xfa   : > { %v1027_v58 = vadd.f32 %v1026_v40, %v3706_v30  ;;  %v2055_v40 = vadd.f32 %v2054_v32, %v1351_v22  ;;  %v1358_v32 = vmul.f32 %v3376_v27, %v3376_v27  ;;  %v3760_v27 = vld [vmem:[%s2639_s16 + $0x670] sm:$0xff] }
  0xfb   : > { %v767_v50 = vadd.f32 %v766_v44, %v3712_v11  ;;  %v1795_v44 = vadd.f32 %v1794_v36, %v1352_v42  ;;  %v1359_v36 = vmul.f32 %v3382_v29, %v3382_v29  ;;  %v3766_v29 = vld [vmem:[%s2639_s16 + $0x678] sm:$0xff] }
  0xfc   : > { %v1028_v46 = vadd.f32 %v1027_v58, %v3718_v13  ;;  %v2056_v58 = vadd.f32 %v2055_v40, %v1353_v52  ;;  %v1360_v40 = vmul.f32 %v3388_v31, %v3388_v31  ;;  %v3772_v31 = vld [vmem:[%s2639_s16 + $0x680] sm:$0xff] }
  0xfd   : > { %v768_v14 = vadd.f32 %v767_v50, %v3724_v15  ;;  %v1796_v50 = vadd.f32 %v1795_v44, %v1354_v56  ;;  %v1361_v44 = vmul.f32 %v3394_v33, %v3394_v33  ;;  %v3778_v33 = vld [vmem:[%s2639_s16 + $0x688] sm:$0xff] }
  0xfe   : > { %v1029_v26 = vadd.f32 %v1028_v46, %v3730_v17  ;;  %v2057_v46 = vadd.f32 %v2056_v58, %v1355_v60  ;;  %v1362_v58 = vmul.f32 %v3400_v35, %v3400_v35  ;;  %v3784_v35 = vld [vmem:[%s2639_s16 + $0x690] sm:$0xff] }
  0xff   : > { %v769_v22 = vadd.f32 %v768_v14, %v3736_v19  ;;  %v1797_v14 = vadd.f32 %v1796_v50, %v1356_v38  ;;  %v1363_v50 = vmul.f32 %v3406_v37, %v3406_v37  ;;  %v3790_v37 = vld [vmem:[%s2639_s16 + $0x698] sm:$0xff] }
 0x100   : > { %v1030_v42 = vadd.f32 %v1029_v26, %v3742_v21  ;;  %v2058_v26 = vadd.f32 %v2057_v46, %v1357_v28  ;;  %v1364_v46 = vmul.f32 %v3412_v39, %v3412_v39  ;;  %v3796_v39 = vld [vmem:[%s2639_s16 + $0x6a0] sm:$0xff] }
 0x101   : > { %v770_v52 = vadd.f32 %v769_v22, %v3748_v23  ;;  %v1798_v22 = vadd.f32 %v1797_v14, %v1358_v32  ;;  %v1365_v14 = vmul.f32 %v3418_v41, %v3418_v41  ;;  %v3802_v41 = vld [vmem:[%s2639_s16 + $0x6a8] sm:$0xff] }
 0x102   : > { %v1031_v56 = vadd.f32 %v1030_v42, %v3754_v25  ;;  %v2059_v42 = vadd.f32 %v2058_v26, %v1359_v36  ;;  %v1366_v26 = vmul.f32 %v3424_v43, %v3424_v43  ;;  %v3808_v43 = vld [vmem:[%s2639_s16 + $0x6b0] sm:$0xff] }
 0x103   : > { %v771_v60 = vadd.f32 %v770_v52, %v3760_v27  ;;  %v1799_v52 = vadd.f32 %v1798_v22, %v1360_v40  ;;  %v1367_v22 = vmul.f32 %v3430_v45, %v3430_v45  ;;  %v3814_v45 = vld [vmem:[%s2639_s16 + $0x6b8] sm:$0xff] }
 0x104   : > { %v1032_v38 = vadd.f32 %v1031_v56, %v3766_v29  ;;  %v2060_v56 = vadd.f32 %v2059_v42, %v1361_v44  ;;  %v1368_v42 = vmul.f32 %v3436_v47, %v3436_v47  ;;  %v3820_v47 = vld [vmem:[%s2639_s16 + $0x6c0] sm:$0xff] }
 0x105   : > { %v772_v28 = vadd.f32 %v771_v60, %v3772_v31  ;;  %v1800_v60 = vadd.f32 %v1799_v52, %v1362_v58  ;;  %v1369_v52 = vmul.f32 %v3442_v49, %v3442_v49  ;;  %v3826_v49 = vld [vmem:[%s2639_s16 + $0x6c8] sm:$0xff] }
 0x106   : > { %v1033_v32 = vadd.f32 %v1032_v38, %v3778_v33  ;;  %v2061_v38 = vadd.f32 %v2060_v56, %v1363_v50  ;;  %v1370_v56 = vmul.f32 %v3448_v51, %v3448_v51  ;;  %v3832_v51 = vld [vmem:[%s2639_s16 + $0x6d0] sm:$0xff] }
 0x107   : > { %v773_v36 = vadd.f32 %v772_v28, %v3784_v35  ;;  %v1801_v28 = vadd.f32 %v1800_v60, %v1364_v46  ;;  %v1371_v60 = vmul.f32 %v3454_v53, %v3454_v53  ;;  %v3838_v53 = vld [vmem:[%s2639_s16 + $0x6d8] sm:$0xff] }
 0x108   : > { %v1034_v40 = vadd.f32 %v1033_v32, %v3790_v37  ;;  %v2062_v32 = vadd.f32 %v2061_v38, %v1365_v14  ;;  %v1372_v38 = vmul.f32 %v3460_v55, %v3460_v55  ;;  %v3844_v55 = vld [vmem:[%s2639_s16 + $0x6e0] sm:$0xff] }
 0x109   : > { %v774_v44 = vadd.f32 %v773_v36, %v3796_v39  ;;  %v1802_v36 = vadd.f32 %v1801_v28, %v1366_v26  ;;  %v1373_v28 = vmul.f32 %v3466_v57, %v3466_v57  ;;  %v3850_v57 = vld [vmem:[%s2639_s16 + $0x6e8] sm:$0xff] }
 0x10a   : > { %v1035_v58 = vadd.f32 %v1034_v40, %v3802_v41  ;;  %v2063_v40 = vadd.f32 %v2062_v32, %v1367_v22  ;;  %v1374_v32 = vmul.f32 %v3472_v59, %v3472_v59  ;;  %v3856_v59 = vld [vmem:[%s2639_s16 + $0x6f0] sm:$0xff] }
 0x10b   : > { %v775_v50 = vadd.f32 %v774_v44, %v3808_v43  ;;  %v1803_v44 = vadd.f32 %v1802_v36, %v1368_v42  ;;  %v1375_v36 = vmul.f32 %v3478_v61, %v3478_v61  ;;  %v3862_v61 = vld [vmem:[%s2639_s16 + $0x6f8] sm:$0xff] }
 0x10c   : > { %v1036_v46 = vadd.f32 %v1035_v58, %v3814_v45  ;;  %v2064_v58 = vadd.f32 %v2063_v40, %v1369_v52  ;;  %v1376_v40 = vmul.f32 %v3484_v63, %v3484_v63  ;;  %v3868_v63 = vld [vmem:[%s2639_s16 + $0x700] sm:$0xff] }
 0x10d   : > { %v776_v14 = vadd.f32 %v775_v50, %v3820_v47  ;;  %v1804_v50 = vadd.f32 %v1803_v44, %v1370_v56  ;;  %v1377_v44 = vmul.f32 %v3490_v1, %v3490_v1  ;;  %5991 = vst [vmem:[#allocation18_spill] sm:$0xff] %v3868_v63  ;;  %v3874_v1 = vld [vmem:[%s2639_s16 + $0x708] sm:$0xff] }
 0x10e   : > { %v1037_v26 = vadd.f32 %v1036_v46, %v3826_v49  ;;  %v2065_v46 = vadd.f32 %v2064_v58, %v1371_v60  ;;  %v1378_v58 = vmul.f32 %v3496_v8, %v3496_v8  ;;  %5992 = vst [vmem:[#allocation19_spill] sm:$0xff] %v3874_v1  ;;  %v3880_v8 = vld [vmem:[%s2639_s16 + $0x710] sm:$0xff] }
 0x10f   : > { %v777_v22 = vadd.f32 %v776_v14, %v3832_v51  ;;  %v1805_v14 = vadd.f32 %v1804_v50, %v1372_v38  ;;  %v1379_v50 = vmul.f32 %v3502_v12, %v3502_v12  ;;  %5993 = vst [vmem:[#allocation20_spill] sm:$0xff] %v3880_v8  ;;  %v3886_v12 = vld [vmem:[%s2639_s16 + $0x718] sm:$0xff] }
 0x110   : > { %v1038_v42 = vadd.f32 %v1037_v26, %v3838_v53  ;;  %v2066_v26 = vadd.f32 %v2065_v46, %v1373_v28  ;;  %v1380_v46 = vmul.f32 %v3508_v16, %v3508_v16  ;;  %5994 = vst [vmem:[#allocation21_spill] sm:$0xff] %v3886_v12  ;;  %v3892_v16 = vld [vmem:[%s2639_s16 + $0x720] sm:$0xff] }
 0x111   : > { %v778_v52 = vadd.f32 %v777_v22, %v3844_v55  ;;  %v1806_v22 = vadd.f32 %v1805_v14, %v1374_v32  ;;  %v1381_v14 = vmul.f32 %v3514_v20, %v3514_v20  ;;  %v3898_v20 = vld [vmem:[%s2639_s16 + $0x728] sm:$0xff] }
 0x112   : > { %v1039_v56 = vadd.f32 %v1038_v42, %v3850_v57  ;;  %v2067_v42 = vadd.f32 %v2066_v26, %v1375_v36  ;;  %v5995_v26 = vld [vmem:[#allocation22_spill] sm:$0xff] }
 0x113   : > { %v779_v60 = vadd.f32 %v778_v52, %v3856_v59  ;;  %v1807_v52 = vadd.f32 %v1806_v22, %v1376_v40  ;;  %5996 = vst [vmem:[#allocation22_spill] sm:$0xff] %v3892_v16  ;;  %v5997_v22 = vld [vmem:[#allocation23_spill] sm:$0xff] }
 0x114   : > { %v1040_v38 = vadd.f32 %v1039_v56, %v3862_v61  ;;  %v2068_v56 = vadd.f32 %v2067_v42, %v1377_v44  ;;  %5998 = vst [vmem:[#allocation23_spill] sm:$0xff] %v3898_v20  ;;  %v5999_v42 = vld [vmem:[#allocation24_spill] sm:$0xff] }
 0x115   : > { %v780_v28 = vadd.f32 %v779_v60, %v3868_v63  ;;  %v1382_v60 = vmul.f32 %v5995_v26, %v5995_v26  ;;  %v1808_v63 = vadd.f32 %v1807_v52, %v1378_v58  ;;  %v3904_v26 = vld [vmem:[%s2639_s16 + $0x730] sm:$0xff]  ;;  %v6000_v52 = vld [vmem:[#allocation25_spill] sm:$0xff] }
 0x116   : > { %v1041_v32 = vadd.f32 %v1040_v38, %v3874_v1  ;;  %v1383_v38 = vmul.f32 %v5997_v22, %v5997_v22  ;;  %v2069_v1 = vadd.f32 %v2068_v56, %v1379_v50  ;;  %v3910_v22 = vld [vmem:[%s2639_s16 + $0x738] sm:$0xff]  ;;  %v6002_v56 = vld [vmem:[#allocation26_spill] sm:$0xff] }
 0x117   : > { %v781_v36 = vadd.f32 %v780_v28, %v3880_v8  ;;  %v1384_v28 = vmul.f32 %v5999_v42, %v5999_v42  ;;  %v1809_v8 = vadd.f32 %v1808_v63, %v1380_v46  ;;  %6001 = vst [vmem:[#allocation24_spill] sm:$0xff] %v3910_v22  ;;  %v3916_v42 = vld [vmem:[%s2639_s16 + $0x740] sm:$0xff]  ;;  %v6004_v46 = vld [vmem:[#allocation27_spill] sm:$0xff] }
 0x118   : > { %v1042_v40 = vadd.f32 %v1041_v32, %v3886_v12  ;;  %v1385_v32 = vmul.f32 %v6000_v52, %v6000_v52  ;;  %v2070_v12 = vadd.f32 %v2069_v1, %v1381_v14  ;;  %6003 = vst [vmem:[#allocation25_spill] sm:$0xff] %v3916_v42  ;;  %v3922_v52 = vld [vmem:[%s2639_s16 + $0x748] sm:$0xff]  ;;  %v1388_v14 = vmul.f32 %v3556_v6, %v3556_v6  ;;  %v3940_v6 = vld [vmem:[%s2639_s16 + $0x760] sm:$0xff] }
 0x119   : > { %v782_v44 = vadd.f32 %v781_v36, %v3892_v16  ;;  %v1386_v36 = vmul.f32 %v6002_v56, %v6002_v56  ;;  %v1810_v16 = vadd.f32 %v1809_v8, %v1382_v60  ;;  %6005 = vst [vmem:[#allocation26_spill] sm:$0xff] %v3922_v52  ;;  %v3928_v56 = vld [vmem:[%s2639_s16 + $0x750] sm:$0xff] }
 0x11a   : > { %v1043_v58 = vadd.f32 %v1042_v40, %v3898_v20  ;;  %v1387_v40 = vmul.f32 %v6004_v46, %v6004_v46  ;;  %v2071_v20 = vadd.f32 %v2070_v12, %v1383_v38  ;;  %6006 = vst [vmem:[#allocation27_spill] sm:$0xff] %v3928_v56  ;;  %v6007_v60 = vld [vmem:[#allocation28_spill] sm:$0xff]  ;;  %v6009_v38 = vld [vmem:[#allocation29_spill] sm:$0xff] }
 0x11b   : > { %v783_v50 = vadd.f32 %v782_v44, %v3904_v26  ;;  %v1811_v44 = vadd.f32 %v1810_v16, %v1384_v28  ;;  %v3934_v46 = vld [vmem:[%s2639_s16 + $0x758] sm:$0xff]  ;;  %6010 = vst [vmem:[#allocation29_spill] sm:$0xff] %v3940_v6  ;;  %v6011_v28 = vld [vmem:[#allocation10_spill] sm:$0xff] }
 0x11c   : > { %v1044_v63 = vadd.f32 %v1043_v58, %v3910_v22  ;;  %v1389_v58 = vmul.f32 %v6007_v60, %v6007_v60  ;;  %v2072_v22 = vadd.f32 %v2071_v20, %v1385_v32  ;;  %6008 = vst [vmem:[#allocation28_spill] sm:$0xff] %v3934_v46  ;;  %v3946_v60 = vld [vmem:[%s2639_s16 + $0x768] sm:$0xff] }
 0x11d   : > { %v784_v1 = vadd.f32 %v783_v50, %v3916_v42  ;;  %v1390_v50 = vmul.f32 %v6009_v38, %v6009_v38  ;;  %v1812_v42 = vadd.f32 %v1811_v44, %v1386_v36  ;;  %6012 = vst [vmem:[#allocation10_spill] sm:$0xff] %v3946_v60  ;;  %v6013_v32 = vld [vmem:[#allocation11_spill] sm:$0xff]  ;;  %v6015_v44 = vld [vmem:[#allocation12_spill] sm:$0xff] }
 0x11e   : > { %v1045_v8 = vadd.f32 %v1044_v63, %v3922_v52  ;;  %v1391_v63 = vmul.f32 %v6011_v28, %v6011_v28  ;;  %v2073_v52 = vadd.f32 %v2072_v22, %v1387_v40  ;;  %v3952_v38 = vld [vmem:[%s2639_s16 + $0x770] sm:$0xff]  ;;  %v3958_v28 = vld [vmem:[%s2639_s16 + $0x778] sm:$0xff] }
 0x11f   : > { %v785_v12 = vadd.f32 %v784_v1, %v3928_v56  ;;  %v1392_v1 = vmul.f32 %v6013_v32, %v6013_v32  ;;  %v1813_v56 = vadd.f32 %v1812_v42, %v1388_v14  ;;  %6014 = vst [vmem:[#allocation11_spill] sm:$0xff] %v3952_v38  ;;  %6016 = vst [vmem:[#allocation12_spill] sm:$0xff] %v3958_v28  ;;  %v6017_v40 = vld [vmem:[#allocation13_spill] sm:$0xff]  ;;  %v6019_v14 = vld [vmem:[#allocation14_spill] sm:$0xff] }
 0x120   : > { %v1046_v16 = vadd.f32 %v1045_v8, %v3934_v46  ;;  %v1393_v8 = vmul.f32 %v6015_v44, %v6015_v44  ;;  %v2074_v46 = vadd.f32 %v2073_v52, %v1389_v58  ;;  %v3964_v32 = vld [vmem:[%s2639_s16 + $0x780] sm:$0xff]  ;;  %v3970_v44 = vld [vmem:[%s2639_s16 + $0x788] sm:$0xff] }
 0x121   : > { %v786_v20 = vadd.f32 %v785_v12, %v3940_v6  ;;  %v1394_v12 = vmul.f32 %v6017_v40, %v6017_v40  ;;  %v1814_v6 = vadd.f32 %v1813_v56, %v1390_v50  ;;  %6018 = vst [vmem:[#allocation13_spill] sm:$0xff] %v3964_v32  ;;  %v6020_v58 = vld [vmem:[#allocation15_spill] sm:$0xff]  ;;  %v6021_v50 = vld [vmem:[#allocation16_spill] sm:$0xff] }
 0x122   : > { %v1047_v36 = vadd.f32 %v1046_v16, %v3946_v60  ;;  %v1395_v16 = vmul.f32 %v6019_v14, %v6019_v14  ;;  %v2075_v60 = vadd.f32 %v2074_v46, %v1391_v63  ;;  %v3976_v40 = vld [vmem:[%s2639_s16 + $0x790] sm:$0xff]  ;;  %v3982_v14 = vld [vmem:[%s2639_s16 + $0x798] sm:$0xff] }
 0x123   : > { %v787_v22 = vadd.f32 %v786_v20, %v3952_v38  ;;  %v1396_v20 = vmul.f32 %v6020_v58, %v6020_v58  ;;  %v1815_v38 = vadd.f32 %v1814_v6, %v1392_v1  ;;  %v6022_v63 = vld [vmem:[#allocation17_spill] sm:$0xff]  ;;  %v1399_v1 = vmul.f32 %v3622_v10, %v3622_v10 }
 0x124   : > { %v1048_v42 = vadd.f32 %v1047_v36, %v3958_v28  ;;  %v1397_v36 = vmul.f32 %v6021_v50, %v6021_v50  ;;  %v2076_v28 = vadd.f32 %v2075_v60, %v1393_v8  ;;  %v3988_v58 = vld [vmem:[%s2639_s16 + $0x7a0] sm:$0xff]  ;;  %v3994_v50 = vld [vmem:[%s2639_s16 + $0x7a8] sm:$0xff]  ;;  %v1400_v8 = vmul.f32 %v3628_v0, %v3628_v0  ;;  %v4006_v10 = vld [vmem:[%s2639_s16 + $0x7b8] sm:$0xff] }
 0x125   : > { %v788_v52 = vadd.f32 %v787_v22, %v3964_v32  ;;  %v1398_v22 = vmul.f32 %v6022_v63, %v6022_v63  ;;  %v1816_v32 = vadd.f32 %v1815_v38, %v1394_v12  ;;  %v4000_v63 = vld [vmem:[%s2639_s16 + $0x7b0] sm:$0xff]  ;;  %v1401_v12 = vmul.f32 %v3634_v7, %v3634_v7  ;;  %v4012_v0 = vld [vmem:[%s2639_s16 + $0x7c0] sm:$0xff]  ;;  %v4018_v7 = vld [vmem:[%s2639_s16 + $0x7c8] sm:$0xff] }
 0x126   : > { %v1049_v56 = vadd.f32 %v1048_v42, %v3970_v44  ;;  %v2077_v42 = vadd.f32 %v2076_v28, %v1395_v16  ;;  %v1402_v16 = vmul.f32 %v3640_v2, %v3640_v2  ;;  %v4024_v2 = vld [vmem:[%s2639_s16 + $0x7d0] sm:$0xff] }
 0x127   : > { %v789_v46 = vadd.f32 %v788_v52, %v3976_v40  ;;  %v1817_v52 = vadd.f32 %v1816_v32, %v1396_v20  ;;  %v1403_v20 = vmul.f32 %v3646_v54, %v3646_v54  ;;  %v4030_v54 = vld [vmem:[%s2639_s16 + $0x7d8] sm:$0xff] }
 0x128   : > { %v1050_v6 = vadd.f32 %v1049_v56, %v3982_v14  ;;  %v2078_v56 = vadd.f32 %v2077_v42, %v1397_v36  ;;  %v1404_v42 = vmul.f32 %v3652_v24, %v3652_v24  ;;  %v4036_v24 = vld [vmem:[%s2639_s16 + $0x7e0] sm:$0xff] }
 0x129   : > { %v790_v60 = vadd.f32 %v789_v46, %v3988_v58  ;;  %v1818_v46 = vadd.f32 %v1817_v52, %v1398_v22  ;;  %v1405_v52 = vmul.f32 %v3658_v3, %v3658_v3  ;;  %v4042_v3 = vld [vmem:[%s2639_s16 + $0x7e8] sm:$0xff] }
 0x12a   : > { %v1051_v38 = vadd.f32 %v1050_v6, %v3994_v50  ;;  %v2079_v6 = vadd.f32 %v2078_v56, %v1399_v1  ;;  %v1406_v56 = vmul.f32 %v3664_v62, %v3664_v62  ;;  %v4048_v62 = vld [vmem:[%s2639_s16 + $0x7f0] sm:$0xff] }
 0x12b   : > { %v791_v28 = vadd.f32 %v790_v60, %v4000_v63  ;;  %v1819_v60 = vadd.f32 %v1818_v46, %v1400_v8  ;;  %v1407_v46 = vmul.f32 %v3670_v9, %v3670_v9  ;;  %v4054_v9 = vld [vmem:[%s2639_s16 + $0x7f8] sm:$0xff] }
 0x12c   : > { %v1052_v32 = vadd.f32 %v1051_v38, %v4006_v10  ;;  %v2080_v38 = vadd.f32 %v2079_v6, %v1401_v12  ;;  %v1408_v6 = vmul.f32 %v3676_v34, %v3676_v34  ;;  %v4060_v34 = vld [vmem:[%s2639_s16 + $0x800] sm:$0xff] }
 0x12d   : > { %v792_v36 = vadd.f32 %v791_v28, %v4012_v0  ;;  %v1820_v28 = vadd.f32 %v1819_v60, %v1402_v16  ;;  %v1409_v60 = vmul.f32 %v3682_v5, %v3682_v5  ;;  %v4066_v5 = vld [vmem:[%s2639_s16 + $0x808] sm:$0xff] }
 0x12e   : > { %v1053_v22 = vadd.f32 %v1052_v32, %v4018_v7  ;;  %v2081_v32 = vadd.f32 %v2080_v38, %v1403_v20  ;;  %v1410_v38 = vmul.f32 %v3688_v48, %v3688_v48  ;;  %v4072_v48 = vld [vmem:[%s2639_s16 + $0x810] sm:$0xff] }
 0x12f   : > { %v793_v1 = vadd.f32 %v792_v36, %v4024_v2  ;;  %v1821_v36 = vadd.f32 %v1820_v28, %v1404_v42  ;;  %v1411_v28 = vmul.f32 %v3694_v4, %v3694_v4  ;;  %v4078_v4 = vld [vmem:[%s2639_s16 + $0x818] sm:$0xff] }
 0x130   : > { %v1054_v8 = vadd.f32 %v1053_v22, %v4030_v54  ;;  %v2082_v22 = vadd.f32 %v2081_v32, %v1405_v52  ;;  %v1412_v32 = vmul.f32 %v3700_v18, %v3700_v18  ;;  %v4084_v18 = vld [vmem:[%s2639_s16 + $0x820] sm:$0xff] }
 0x131   : > { %v794_v12 = vadd.f32 %v793_v1, %v4036_v24  ;;  %v1822_v1 = vadd.f32 %v1821_v36, %v1406_v56  ;;  %v1413_v36 = vmul.f32 %v3706_v30, %v3706_v30  ;;  %v4090_v30 = vld [vmem:[%s2639_s16 + $0x828] sm:$0xff] }
 0x132   : > { %v1055_v16 = vadd.f32 %v1054_v8, %v4042_v3  ;;  %v2083_v8 = vadd.f32 %v2082_v22, %v1407_v46  ;;  %v1414_v22 = vmul.f32 %v3712_v11, %v3712_v11  ;;  %v4096_v11 = vld [vmem:[%s2639_s16 + $0x830] sm:$0xff] }
 0x133   : > { %v795_v20 = vadd.f32 %v794_v12, %v4048_v62  ;;  %v1823_v12 = vadd.f32 %v1822_v1, %v1408_v6  ;;  %v1415_v1 = vmul.f32 %v3718_v13, %v3718_v13  ;;  %v4102_v13 = vld [vmem:[%s2639_s16 + $0x838] sm:$0xff] }
 0x134   : > { %v1056_v42 = vadd.f32 %v1055_v16, %v4054_v9  ;;  %v2084_v16 = vadd.f32 %v2083_v8, %v1409_v60  ;;  %v1416_v8 = vmul.f32 %v3724_v15, %v3724_v15  ;;  %v4108_v15 = vld [vmem:[%s2639_s16 + $0x840] sm:$0xff] }
 0x135   : > { %v796_v52 = vadd.f32 %v795_v20, %v4060_v34  ;;  %v1824_v20 = vadd.f32 %v1823_v12, %v1410_v38  ;;  %v1417_v12 = vmul.f32 %v3730_v17, %v3730_v17  ;;  %v4114_v17 = vld [vmem:[%s2639_s16 + $0x848] sm:$0xff] }
 0x136   : > { %v1057_v56 = vadd.f32 %v1056_v42, %v4066_v5  ;;  %v2085_v42 = vadd.f32 %v2084_v16, %v1411_v28  ;;  %v1418_v16 = vmul.f32 %v3736_v19, %v3736_v19  ;;  %v4120_v19 = vld [vmem:[%s2639_s16 + $0x850] sm:$0xff] }
 0x137   : > { %v797_v46 = vadd.f32 %v796_v52, %v4072_v48  ;;  %v1825_v52 = vadd.f32 %v1824_v20, %v1412_v32  ;;  %v1419_v20 = vmul.f32 %v3742_v21, %v3742_v21  ;;  %v4126_v21 = vld [vmem:[%s2639_s16 + $0x858] sm:$0xff] }
 0x138   : > { %v1058_v6 = vadd.f32 %v1057_v56, %v4078_v4  ;;  %v2086_v56 = vadd.f32 %v2085_v42, %v1413_v36  ;;  %v1420_v42 = vmul.f32 %v3748_v23, %v3748_v23  ;;  %v4132_v23 = vld [vmem:[%s2639_s16 + $0x860] sm:$0xff] }
 0x139   : > { %v798_v60 = vadd.f32 %v797_v46, %v4084_v18  ;;  %v1826_v46 = vadd.f32 %v1825_v52, %v1414_v22  ;;  %v1421_v52 = vmul.f32 %v3754_v25, %v3754_v25  ;;  %v4138_v25 = vld [vmem:[%s2639_s16 + $0x868] sm:$0xff] }
 0x13a   : > { %v1059_v38 = vadd.f32 %v1058_v6, %v4090_v30  ;;  %v2087_v6 = vadd.f32 %v2086_v56, %v1415_v1  ;;  %v1422_v56 = vmul.f32 %v3760_v27, %v3760_v27  ;;  %v4144_v27 = vld [vmem:[%s2639_s16 + $0x870] sm:$0xff] }
 0x13b   : > { %v799_v28 = vadd.f32 %v798_v60, %v4096_v11  ;;  %v1827_v60 = vadd.f32 %v1826_v46, %v1416_v8  ;;  %v1423_v46 = vmul.f32 %v3766_v29, %v3766_v29  ;;  %v4150_v29 = vld [vmem:[%s2639_s16 + $0x878] sm:$0xff] }
 0x13c   : > { %v1060_v32 = vadd.f32 %v1059_v38, %v4102_v13  ;;  %v2088_v38 = vadd.f32 %v2087_v6, %v1417_v12  ;;  %v1424_v6 = vmul.f32 %v3772_v31, %v3772_v31  ;;  %v4156_v31 = vld [vmem:[%s2639_s16 + $0x880] sm:$0xff] }
 0x13d   : > { %v800_v36 = vadd.f32 %v799_v28, %v4108_v15  ;;  %v1828_v28 = vadd.f32 %v1827_v60, %v1418_v16  ;;  %v1425_v60 = vmul.f32 %v3778_v33, %v3778_v33  ;;  %v4162_v33 = vld [vmem:[%s2639_s16 + $0x888] sm:$0xff] }
 0x13e   : > { %v1061_v22 = vadd.f32 %v1060_v32, %v4114_v17  ;;  %v2089_v32 = vadd.f32 %v2088_v38, %v1419_v20  ;;  %v1426_v38 = vmul.f32 %v3784_v35, %v3784_v35  ;;  %v4168_v35 = vld [vmem:[%s2639_s16 + $0x890] sm:$0xff] }
 0x13f   : > { %v801_v1 = vadd.f32 %v800_v36, %v4120_v19  ;;  %v1829_v36 = vadd.f32 %v1828_v28, %v1420_v42  ;;  %v1427_v28 = vmul.f32 %v3790_v37, %v3790_v37  ;;  %v4174_v37 = vld [vmem:[%s2639_s16 + $0x898] sm:$0xff] }
 0x140   : > { %v1062_v8 = vadd.f32 %v1061_v22, %v4126_v21  ;;  %v2090_v22 = vadd.f32 %v2089_v32, %v1421_v52  ;;  %v1428_v32 = vmul.f32 %v3796_v39, %v3796_v39  ;;  %v4180_v39 = vld [vmem:[%s2639_s16 + $0x8a0] sm:$0xff] }
 0x141   : > { %v802_v12 = vadd.f32 %v801_v1, %v4132_v23  ;;  %v1830_v1 = vadd.f32 %v1829_v36, %v1422_v56  ;;  %v1429_v36 = vmul.f32 %v3802_v41, %v3802_v41  ;;  %v4186_v41 = vld [vmem:[%s2639_s16 + $0x8a8] sm:$0xff] }
 0x142   : > { %v1063_v16 = vadd.f32 %v1062_v8, %v4138_v25  ;;  %v2091_v8 = vadd.f32 %v2090_v22, %v1423_v46  ;;  %v1430_v22 = vmul.f32 %v3808_v43, %v3808_v43  ;;  %v4192_v43 = vld [vmem:[%s2639_s16 + $0x8b0] sm:$0xff] }
 0x143   : > { %v803_v20 = vadd.f32 %v802_v12, %v4144_v27  ;;  %v1831_v12 = vadd.f32 %v1830_v1, %v1424_v6  ;;  %v1431_v1 = vmul.f32 %v3814_v45, %v3814_v45  ;;  %v4198_v45 = vld [vmem:[%s2639_s16 + $0x8b8] sm:$0xff] }
 0x144   : > { %v1064_v42 = vadd.f32 %v1063_v16, %v4150_v29  ;;  %v2092_v16 = vadd.f32 %v2091_v8, %v1425_v60  ;;  %v1432_v8 = vmul.f32 %v3820_v47, %v3820_v47  ;;  %v4204_v47 = vld [vmem:[%s2639_s16 + $0x8c0] sm:$0xff] }
 0x145   : > { %v804_v52 = vadd.f32 %v803_v20, %v4156_v31  ;;  %v1832_v20 = vadd.f32 %v1831_v12, %v1426_v38  ;;  %v1433_v12 = vmul.f32 %v3826_v49, %v3826_v49  ;;  %v4210_v49 = vld [vmem:[%s2639_s16 + $0x8c8] sm:$0xff] }
 0x146   : > { %v1065_v56 = vadd.f32 %v1064_v42, %v4162_v33  ;;  %v2093_v42 = vadd.f32 %v2092_v16, %v1427_v28  ;;  %v1434_v16 = vmul.f32 %v3832_v51, %v3832_v51  ;;  %v4216_v51 = vld [vmem:[%s2639_s16 + $0x8d0] sm:$0xff] }
 0x147   : > { %v805_v46 = vadd.f32 %v804_v52, %v4168_v35  ;;  %v1833_v52 = vadd.f32 %v1832_v20, %v1428_v32  ;;  %v1435_v20 = vmul.f32 %v3838_v53, %v3838_v53  ;;  %6023 = vst [vmem:[#allocation14_spill] sm:$0xff] %v4216_v51  ;;  %v4222_v53 = vld [vmem:[%s2639_s16 + $0x8d8] sm:$0xff] }
 0x148   : > { %v1066_v6 = vadd.f32 %v1065_v56, %v4174_v37  ;;  %v2094_v56 = vadd.f32 %v2093_v42, %v1429_v36  ;;  %v1436_v42 = vmul.f32 %v3844_v55, %v3844_v55  ;;  %6024 = vst [vmem:[#allocation15_spill] sm:$0xff] %v4222_v53  ;;  %v4228_v55 = vld [vmem:[%s2639_s16 + $0x8e0] sm:$0xff] }
 0x149   : > { %v806_v60 = vadd.f32 %v805_v46, %v4180_v39  ;;  %v1834_v46 = vadd.f32 %v1833_v52, %v1430_v22  ;;  %v1437_v52 = vmul.f32 %v3850_v57, %v3850_v57  ;;  %6025 = vst [vmem:[#allocation16_spill] sm:$0xff] %v4228_v55  ;;  %v4234_v57 = vld [vmem:[%s2639_s16 + $0x8e8] sm:$0xff] }
 0x14a   : > { %v1067_v38 = vadd.f32 %v1066_v6, %v4186_v41  ;;  %v2095_v6 = vadd.f32 %v2094_v56, %v1431_v1  ;;  %v1438_v56 = vmul.f32 %v3856_v59, %v3856_v59  ;;  %6026 = vst [vmem:[#allocation17_spill] sm:$0xff] %v4234_v57  ;;  %v4240_v59 = vld [vmem:[%s2639_s16 + $0x8f0] sm:$0xff] }
 0x14b   : > { %v807_v28 = vadd.f32 %v806_v60, %v4192_v43  ;;  %v1835_v60 = vadd.f32 %v1834_v46, %v1432_v8  ;;  %v1439_v46 = vmul.f32 %v3862_v61, %v3862_v61  ;;  %v4246_v61 = vld [vmem:[%s2639_s16 + $0x8f8] sm:$0xff] }
 0x14c   : > { %v1068_v32 = vadd.f32 %v1067_v38, %v4198_v45  ;;  %v2096_v38 = vadd.f32 %v2095_v6, %v1433_v12  ;;  %v6027_v6 = vld [vmem:[#allocation18_spill] sm:$0xff] }
 0x14d   : > { %v808_v36 = vadd.f32 %v807_v28, %v4204_v47  ;;  %v1836_v28 = vadd.f32 %v1835_v60, %v1434_v16  ;;  %6028 = vst [vmem:[#allocation18_spill] sm:$0xff] %v4240_v59  ;;  %v6029_v60 = vld [vmem:[#allocation19_spill] sm:$0xff] }
 0x14e   : > { %v1069_v22 = vadd.f32 %v1068_v32, %v4210_v49  ;;  %v2097_v32 = vadd.f32 %v2096_v38, %v1435_v20  ;;  %6030 = vst [vmem:[#allocation19_spill] sm:$0xff] %v4246_v61  ;;  %v6031_v38 = vld [vmem:[#allocation20_spill] sm:$0xff] }
 0x14f   : > { %v809_v1 = vadd.f32 %v808_v36, %v4216_v51  ;;  %v1440_v36 = vmul.f32 %v6027_v6, %v6027_v6  ;;  %v1837_v51 = vadd.f32 %v1836_v28, %v1436_v42  ;;  %v4252_v6 = vld [vmem:[%s2639_s16 + $0x900] sm:$0xff] }
 0x150   : > { %v1070_v8 = vadd.f32 %v1069_v22, %v4222_v53  ;;  %v1441_v22 = vmul.f32 %v6029_v60, %v6029_v60  ;;  %v2098_v53 = vadd.f32 %v2097_v32, %v1437_v52  ;;  %v6032_v28 = vld [vmem:[#allocation21_spill] sm:$0xff]  ;;  %v4258_v60 = vld [vmem:[%s2639_s16 + $0x908] sm:$0xff] }
 0x151   : > { %v810_v12 = vadd.f32 %v809_v1, %v4228_v55  ;;  %v1442_v1 = vmul.f32 %v6031_v38, %v6031_v38  ;;  %v1838_v55 = vadd.f32 %v1837_v51, %v1438_v56  ;;  %6033 = vst [vmem:[#allocation20_spill] sm:$0xff] %v4258_v60  ;;  %v6034_v32 = vld [vmem:[#allocation22_spill] sm:$0xff]  ;;  %v4264_v38 = vld [vmem:[%s2639_s16 + $0x910] sm:$0xff] }
 0x152   : > { %v1071_v16 = vadd.f32 %v1070_v8, %v4234_v57  ;;  %v1443_v8 = vmul.f32 %v6032_v28, %v6032_v28  ;;  %v2099_v57 = vadd.f32 %v2098_v53, %v1439_v46  ;;  %6035 = vst [vmem:[#allocation21_spill] sm:$0xff] %v4264_v38  ;;  %v6036_v56 = vld [vmem:[#allocation23_spill] sm:$0xff]  ;;  %v4270_v28 = vld [vmem:[%s2639_s16 + $0x918] sm:$0xff]  ;;  %v1446_v46 = vmul.f32 %v3904_v26, %v3904_v26 }
 0x153   : > { %v811_v20 = vadd.f32 %v810_v12, %v4240_v59  ;;  %v1444_v12 = vmul.f32 %v6034_v32, %v6034_v32  ;;  %v1839_v59 = vadd.f32 %v1838_v55, %v1440_v36  ;;  %6037 = vst [vmem:[#allocation22_spill] sm:$0xff] %v4270_v28  ;;  %v4276_v32 = vld [vmem:[%s2639_s16 + $0x920] sm:$0xff]  ;;  %v6039_v36 = vld [vmem:[#allocation24_spill] sm:$0xff] }
 0x154   : > { %v1072_v42 = vadd.f32 %v1071_v16, %v4246_v61  ;;  %v1445_v16 = vmul.f32 %v6036_v56, %v6036_v56  ;;  %v2100_v61 = vadd.f32 %v2099_v57, %v1441_v22  ;;  %6038 = vst [vmem:[#allocation23_spill] sm:$0xff] %v4276_v32  ;;  %v4282_v56 = vld [vmem:[%s2639_s16 + $0x928] sm:$0xff]  ;;  %v6041_v22 = vld [vmem:[#allocation25_spill] sm:$0xff]  ;;  %v4288_v26 = vld [vmem:[%s2639_s16 + $0x930] sm:$0xff] }
 0x155   : > { %v812_v52 = vadd.f32 %v811_v20, %v4252_v6  ;;  %v1840_v20 = vadd.f32 %v1839_v59, %v1442_v1  ;;  %6040 = vst [vmem:[#allocation24_spill] sm:$0xff] %v4282_v56  ;;  %6042 = vst [vmem:[#allocation25_spill] sm:$0xff] %v4288_v26  ;;  %v6043_v1 = vld [vmem:[#allocation26_spill] sm:$0xff] }
 0x156   : > { %v1073_v51 = vadd.f32 %v1072_v42, %v4258_v60  ;;  %v1447_v42 = vmul.f32 %v6039_v36, %v6039_v36  ;;  %v2101_v60 = vadd.f32 %v2100_v61, %v1443_v8  ;;  %v4294_v36 = vld [vmem:[%s2639_s16 + $0x938] sm:$0xff]  ;;  %v6045_v8 = vld [vmem:[#allocation27_spill] sm:$0xff] }
 0x157   : > { %v813_v53 = vadd.f32 %v812_v52, %v4264_v38  ;;  %v1448_v52 = vmul.f32 %v6041_v22, %v6041_v22  ;;  %v1841_v38 = vadd.f32 %v1840_v20, %v1444_v12  ;;  %6044 = vst [vmem:[#allocation26_spill] sm:$0xff] %v4294_v36  ;;  %v4300_v22 = vld [vmem:[%s2639_s16 + $0x940] sm:$0xff]  ;;  %v6047_v20 = vld [vmem:[#allocation28_spill] sm:$0xff] }
 0x158   : > { %v1074_v55 = vadd.f32 %v1073_v51, %v4270_v28  ;;  %v1449_v51 = vmul.f32 %v6043_v1, %v6043_v1  ;;  %v2102_v28 = vadd.f32 %v2101_v60, %v1445_v16  ;;  %6046 = vst [vmem:[#allocation27_spill] sm:$0xff] %v4300_v22  ;;  %v4306_v1 = vld [vmem:[%s2639_s16 + $0x948] sm:$0xff]  ;;  %v6049_v16 = vld [vmem:[#allocation29_spill] sm:$0xff] }
 0x159   : > { %v814_v57 = vadd.f32 %v813_v53, %v4276_v32  ;;  %v1450_v53 = vmul.f32 %v6045_v8, %v6045_v8  ;;  %v1842_v32 = vadd.f32 %v1841_v38, %v1446_v46  ;;  %6048 = vst [vmem:[#allocation28_spill] sm:$0xff] %v4306_v1  ;;  %v4312_v8 = vld [vmem:[%s2639_s16 + $0x950] sm:$0xff]  ;;  %v6051_v46 = vld [vmem:[#allocation10_spill] sm:$0xff] }
 0x15a   : > { %v1075_v59 = vadd.f32 %v1074_v55, %v4282_v56  ;;  %v1451_v55 = vmul.f32 %v6047_v20, %v6047_v20  ;;  %v2103_v56 = vadd.f32 %v2102_v28, %v1447_v42  ;;  %6050 = vst [vmem:[#allocation29_spill] sm:$0xff] %v4312_v8  ;;  %v4318_v20 = vld [vmem:[%s2639_s16 + $0x958] sm:$0xff]  ;;  %v6052_v42 = vld [vmem:[#allocation11_spill] sm:$0xff] }
 0x15b   : > { %v815_v61 = vadd.f32 %v814_v57, %v4288_v26  ;;  %v1452_v57 = vmul.f32 %v6049_v16, %v6049_v16  ;;  %v1843_v26 = vadd.f32 %v1842_v32, %v1448_v52  ;;  %v4324_v16 = vld [vmem:[%s2639_s16 + $0x960] sm:$0xff]  ;;  %v6053_v52 = vld [vmem:[#allocation12_spill] sm:$0xff] }
 0x15c   : > { %v1076_v12 = vadd.f32 %v1075_v59, %v4294_v36  ;;  %v1453_v59 = vmul.f32 %v6051_v46, %v6051_v46  ;;  %v2104_v36 = vadd.f32 %v2103_v56, %v1449_v51  ;;  %v4330_v46 = vld [vmem:[%s2639_s16 + $0x968] sm:$0xff]  ;;  %v6054_v51 = vld [vmem:[#allocation13_spill] sm:$0xff] }
 0x15d   : > { %v816_v60 = vadd.f32 %v815_v61, %v4300_v22  ;;  %v1454_v61 = vmul.f32 %v6052_v42, %v6052_v42  ;;  %v1844_v22 = vadd.f32 %v1843_v26, %v1450_v53  ;;  %v4336_v42 = vld [vmem:[%s2639_s16 + $0x970] sm:$0xff]  ;;  %v1457_v53 = vmul.f32 %v3970_v44, %v3970_v44  ;;  %v4354_v44 = vld [vmem:[%s2639_s16 + $0x988] sm:$0xff] }
 0x15e   : > { %v1077_v38 = vadd.f32 %v1076_v12, %v4306_v1  ;;  %v1455_v12 = vmul.f32 %v6053_v52, %v6053_v52  ;;  %v2105_v1 = vadd.f32 %v2104_v36, %v1451_v55  ;;  %v4342_v52 = vld [vmem:[%s2639_s16 + $0x978] sm:$0xff]  ;;  %v1458_v55 = vmul.f32 %v3976_v40, %v3976_v40  ;;  %v4360_v40 = vld [vmem:[%s2639_s16 + $0x990] sm:$0xff] }
 0x15f   : > { %v817_v28 = vadd.f32 %v816_v60, %v4312_v8  ;;  %v1456_v60 = vmul.f32 %v6054_v51, %v6054_v51  ;;  %v1845_v8 = vadd.f32 %v1844_v22, %v1452_v57  ;;  %v4348_v51 = vld [vmem:[%s2639_s16 + $0x980] sm:$0xff]  ;;  %v1459_v57 = vmul.f32 %v3982_v14, %v3982_v14  ;;  %v4366_v14 = vld [vmem:[%s2639_s16 + $0x998] sm:$0xff] }
 0x160   : > { %v1078_v32 = vadd.f32 %v1077_v38, %v4318_v20  ;;  %v2106_v38 = vadd.f32 %v2105_v1, %v1453_v59  ;;  %v1460_v59 = vmul.f32 %v3988_v58, %v3988_v58  ;;  %v4372_v58 = vld [vmem:[%s2639_s16 + $0x9a0] sm:$0xff] }
 0x161   : > { %v818_v56 = vadd.f32 %v817_v28, %v4324_v16  ;;  %v1846_v28 = vadd.f32 %v1845_v8, %v1454_v61  ;;  %v1461_v61 = vmul.f32 %v3994_v50, %v3994_v50  ;;  %v4378_v50 = vld [vmem:[%s2639_s16 + $0x9a8] sm:$0xff] }
 0x162   : > { %v1079_v26 = vadd.f32 %v1078_v32, %v4330_v46  ;;  %v2107_v32 = vadd.f32 %v2106_v38, %v1455_v12  ;;  %v1462_v38 = vmul.f32 %v4000_v63, %v4000_v63  ;;  %v4384_v63 = vld [vmem:[%s2639_s16 + $0x9b0] sm:$0xff] }
 0x163   : > { %v819_v36 = vadd.f32 %v818_v56, %v4336_v42  ;;  %v1847_v56 = vadd.f32 %v1846_v28, %v1456_v60  ;;  %v1463_v28 = vmul.f32 %v4006_v10, %v4006_v10  ;;  %v4390_v10 = vld [vmem:[%s2639_s16 + $0x9b8] sm:$0xff] }
 0x164   : > { %v1080_v22 = vadd.f32 %v1079_v26, %v4342_v52  ;;  %v2108_v26 = vadd.f32 %v2107_v32, %v1457_v53  ;;  %v1464_v32 = vmul.f32 %v4012_v0, %v4012_v0  ;;  %v4396_v0 = vld [vmem:[%s2639_s16 + $0x9c0] sm:$0xff] }
 0x165   : > { %v820_v1 = vadd.f32 %v819_v36, %v4348_v51  ;;  %v1848_v36 = vadd.f32 %v1847_v56, %v1458_v55  ;;  %v1465_v56 = vmul.f32 %v4018_v7, %v4018_v7  ;;  %v4402_v7 = vld [vmem:[%s2639_s16 + $0x9c8] sm:$0xff] }
 0x166   : > { %v1081_v8 = vadd.f32 %v1080_v22, %v4354_v44  ;;  %v2109_v22 = vadd.f32 %v2108_v26, %v1459_v57  ;;  %v1466_v26 = vmul.f32 %v4024_v2, %v4024_v2  ;;  %v4408_v2 = vld [vmem:[%s2639_s16 + $0x9d0] sm:$0xff] }
 0x167   : > { %v821_v12 = vadd.f32 %v820_v1, %v4360_v40  ;;  %v1849_v1 = vadd.f32 %v1848_v36, %v1460_v59  ;;  %v1467_v36 = vmul.f32 %v4030_v54, %v4030_v54  ;;  %v4414_v54 = vld [vmem:[%s2639_s16 + $0x9d8] sm:$0xff] }
 0x168   : > { %v1082_v60 = vadd.f32 %v1081_v8, %v4366_v14  ;;  %v2110_v8 = vadd.f32 %v2109_v22, %v1461_v61  ;;  %v1468_v22 = vmul.f32 %v4036_v24, %v4036_v24  ;;  %v4420_v24 = vld [vmem:[%s2639_s16 + $0x9e0] sm:$0xff] }
 0x169   : > { %v822_v53 = vadd.f32 %v821_v12, %v4372_v58  ;;  %v1850_v12 = vadd.f32 %v1849_v1, %v1462_v38  ;;  %v1469_v1 = vmul.f32 %v4042_v3, %v4042_v3  ;;  %v4426_v3 = vld [vmem:[%s2639_s16 + $0x9e8] sm:$0xff] }
 0x16a   : > { %v1083_v55 = vadd.f32 %v1082_v60, %v4378_v50  ;;  %v2111_v60 = vadd.f32 %v2110_v8, %v1463_v28  ;;  %v1470_v8 = vmul.f32 %v4048_v62, %v4048_v62  ;;  %v4432_v62 = vld [vmem:[%s2639_s16 + $0x9f0] sm:$0xff] }
 0x16b   : > { %v823_v57 = vadd.f32 %v822_v53, %v4384_v63  ;;  %v1851_v53 = vadd.f32 %v1850_v12, %v1464_v32  ;;  %v1471_v12 = vmul.f32 %v4054_v9, %v4054_v9  ;;  %v4438_v9 = vld [vmem:[%s2639_s16 + $0x9f8] sm:$0xff] }
 0x16c   : > { %v1084_v59 = vadd.f32 %v1083_v55, %v4390_v10  ;;  %v2112_v55 = vadd.f32 %v2111_v60, %v1465_v56  ;;  %v1472_v60 = vmul.f32 %v4060_v34, %v4060_v34  ;;  %v4444_v34 = vld [vmem:[%s2639_s16 + $0xa00] sm:$0xff] }
 0x16d   : > { %v824_v61 = vadd.f32 %v823_v57, %v4396_v0  ;;  %v1852_v57 = vadd.f32 %v1851_v53, %v1466_v26  ;;  %v1473_v53 = vmul.f32 %v4066_v5, %v4066_v5  ;;  %v4450_v5 = vld [vmem:[%s2639_s16 + $0xa08] sm:$0xff] }
 0x16e   : > { %v1085_v38 = vadd.f32 %v1084_v59, %v4402_v7  ;;  %v2113_v59 = vadd.f32 %v2112_v55, %v1467_v36  ;;  %v1474_v55 = vmul.f32 %v4072_v48, %v4072_v48  ;;  %v4456_v48 = vld [vmem:[%s2639_s16 + $0xa10] sm:$0xff] }
 0x16f   : > { %v825_v28 = vadd.f32 %v824_v61, %v4408_v2  ;;  %v1853_v61 = vadd.f32 %v1852_v57, %v1468_v22  ;;  %v1475_v57 = vmul.f32 %v4078_v4, %v4078_v4  ;;  %v4462_v4 = vld [vmem:[%s2639_s16 + $0xa18] sm:$0xff] }
 0x170   : > { %v1086_v32 = vadd.f32 %v1085_v38, %v4414_v54  ;;  %v2114_v38 = vadd.f32 %v2113_v59, %v1469_v1  ;;  %v1476_v59 = vmul.f32 %v4084_v18, %v4084_v18  ;;  %v4468_v18 = vld [vmem:[%s2639_s16 + $0xa20] sm:$0xff] }
 0x171   : > { %v826_v56 = vadd.f32 %v825_v28, %v4420_v24  ;;  %v1854_v28 = vadd.f32 %v1853_v61, %v1470_v8  ;;  %v1477_v61 = vmul.f32 %v4090_v30, %v4090_v30  ;;  %v4474_v30 = vld [vmem:[%s2639_s16 + $0xa28] sm:$0xff] }
 0x172   : > { %v1087_v26 = vadd.f32 %v1086_v32, %v4426_v3  ;;  %v2115_v32 = vadd.f32 %v2114_v38, %v1471_v12  ;;  %v1478_v38 = vmul.f32 %v4096_v11, %v4096_v11  ;;  %v4480_v11 = vld [vmem:[%s2639_s16 + $0xa30] sm:$0xff] }
 0x173   : > { %v827_v36 = vadd.f32 %v826_v56, %v4432_v62  ;;  %v1855_v56 = vadd.f32 %v1854_v28, %v1472_v60  ;;  %v1479_v28 = vmul.f32 %v4102_v13, %v4102_v13  ;;  %v4486_v13 = vld [vmem:[%s2639_s16 + $0xa38] sm:$0xff] }
 0x174   : > { %v1088_v22 = vadd.f32 %v1087_v26, %v4438_v9  ;;  %v2116_v26 = vadd.f32 %v2115_v32, %v1473_v53  ;;  %v1480_v32 = vmul.f32 %v4108_v15, %v4108_v15  ;;  %v4492_v15 = vld [vmem:[%s2639_s16 + $0xa40] sm:$0xff] }
 0x175   : > { %v828_v1 = vadd.f32 %v827_v36, %v4444_v34  ;;  %v1856_v36 = vadd.f32 %v1855_v56, %v1474_v55  ;;  %v1481_v56 = vmul.f32 %v4114_v17, %v4114_v17  ;;  %v4498_v17 = vld [vmem:[%s2639_s16 + $0xa48] sm:$0xff] }
 0x176   : > { %v1089_v8 = vadd.f32 %v1088_v22, %v4450_v5  ;;  %v2117_v22 = vadd.f32 %v2116_v26, %v1475_v57  ;;  %v1482_v26 = vmul.f32 %v4120_v19, %v4120_v19  ;;  %v4504_v19 = vld [vmem:[%s2639_s16 + $0xa50] sm:$0xff] }
 0x177   : > { %v829_v12 = vadd.f32 %v828_v1, %v4456_v48  ;;  %v1857_v1 = vadd.f32 %v1856_v36, %v1476_v59  ;;  %v1483_v36 = vmul.f32 %v4126_v21, %v4126_v21  ;;  %v4510_v21 = vld [vmem:[%s2639_s16 + $0xa58] sm:$0xff] }
 0x178   : > { %v1090_v60 = vadd.f32 %v1089_v8, %v4462_v4  ;;  %v2118_v8 = vadd.f32 %v2117_v22, %v1477_v61  ;;  %v1484_v22 = vmul.f32 %v4132_v23, %v4132_v23  ;;  %v4516_v23 = vld [vmem:[%s2639_s16 + $0xa60] sm:$0xff] }
 0x179   : > { %v830_v53 = vadd.f32 %v829_v12, %v4468_v18  ;;  %v1858_v12 = vadd.f32 %v1857_v1, %v1478_v38  ;;  %v1485_v1 = vmul.f32 %v4138_v25, %v4138_v25  ;;  %v4522_v25 = vld [vmem:[%s2639_s16 + $0xa68] sm:$0xff] }
 0x17a   : > { %v1091_v55 = vadd.f32 %v1090_v60, %v4474_v30  ;;  %v2119_v60 = vadd.f32 %v2118_v8, %v1479_v28  ;;  %v1486_v8 = vmul.f32 %v4144_v27, %v4144_v27  ;;  %v4528_v27 = vld [vmem:[%s2639_s16 + $0xa70] sm:$0xff] }
 0x17b   : > { %v831_v57 = vadd.f32 %v830_v53, %v4480_v11  ;;  %v1859_v53 = vadd.f32 %v1858_v12, %v1480_v32  ;;  %v1487_v12 = vmul.f32 %v4150_v29, %v4150_v29  ;;  %v4534_v29 = vld [vmem:[%s2639_s16 + $0xa78] sm:$0xff] }
 0x17c   : > { %v1092_v59 = vadd.f32 %v1091_v55, %v4486_v13  ;;  %v2120_v55 = vadd.f32 %v2119_v60, %v1481_v56  ;;  %v1488_v60 = vmul.f32 %v4156_v31, %v4156_v31  ;;  %v4540_v31 = vld [vmem:[%s2639_s16 + $0xa80] sm:$0xff] }
 0x17d   : > { %v832_v61 = vadd.f32 %v831_v57, %v4492_v15  ;;  %v1860_v57 = vadd.f32 %v1859_v53, %v1482_v26  ;;  %v1489_v53 = vmul.f32 %v4162_v33, %v4162_v33  ;;  %v4546_v33 = vld [vmem:[%s2639_s16 + $0xa88] sm:$0xff] }
 0x17e   : > { %v1093_v38 = vadd.f32 %v1092_v59, %v4498_v17  ;;  %v2121_v59 = vadd.f32 %v2120_v55, %v1483_v36  ;;  %v1490_v55 = vmul.f32 %v4168_v35, %v4168_v35  ;;  %v4552_v35 = vld [vmem:[%s2639_s16 + $0xa90] sm:$0xff] }
 0x17f   : > { %v833_v28 = vadd.f32 %v832_v61, %v4504_v19  ;;  %v1861_v61 = vadd.f32 %v1860_v57, %v1484_v22  ;;  %v1491_v57 = vmul.f32 %v4174_v37, %v4174_v37  ;;  %v4558_v37 = vld [vmem:[%s2639_s16 + $0xa98] sm:$0xff] }
 0x180   : > { %v1094_v32 = vadd.f32 %v1093_v38, %v4510_v21  ;;  %v2122_v38 = vadd.f32 %v2121_v59, %v1485_v1  ;;  %v1492_v59 = vmul.f32 %v4180_v39, %v4180_v39  ;;  %v4564_v39 = vld [vmem:[%s2639_s16 + $0xaa0] sm:$0xff] }
 0x181   : > { %v834_v56 = vadd.f32 %v833_v28, %v4516_v23  ;;  %v1862_v28 = vadd.f32 %v1861_v61, %v1486_v8  ;;  %v1493_v61 = vmul.f32 %v4186_v41, %v4186_v41  ;;  %6055 = vst [vmem:[#allocation10_spill] sm:$0xff] %v4564_v39  ;;  %v4570_v41 = vld [vmem:[%s2639_s16 + $0xaa8] sm:$0xff] }
 0x182   : > { %v1095_v26 = vadd.f32 %v1094_v32, %v4522_v25  ;;  %v2123_v32 = vadd.f32 %v2122_v38, %v1487_v12  ;;  %v1494_v38 = vmul.f32 %v4192_v43, %v4192_v43  ;;  %6056 = vst [vmem:[#allocation11_spill] sm:$0xff] %v4570_v41  ;;  %v4576_v43 = vld [vmem:[%s2639_s16 + $0xab0] sm:$0xff] }
 0x183   : > { %v835_v36 = vadd.f32 %v834_v56, %v4528_v27  ;;  %v1863_v56 = vadd.f32 %v1862_v28, %v1488_v60  ;;  %v1495_v28 = vmul.f32 %v4198_v45, %v4198_v45  ;;  %6057 = vst [vmem:[#allocation12_spill] sm:$0xff] %v4576_v43  ;;  %v4582_v45 = vld [vmem:[%s2639_s16 + $0xab8] sm:$0xff] }
 0x184   : > { %v1096_v22 = vadd.f32 %v1095_v26, %v4534_v29  ;;  %v2124_v26 = vadd.f32 %v2123_v32, %v1489_v53  ;;  %v1496_v32 = vmul.f32 %v4204_v47, %v4204_v47  ;;  %6058 = vst [vmem:[#allocation13_spill] sm:$0xff] %v4582_v45  ;;  %v4588_v47 = vld [vmem:[%s2639_s16 + $0xac0] sm:$0xff] }
 0x185   : > { %v836_v1 = vadd.f32 %v835_v36, %v4540_v31  ;;  %v1864_v36 = vadd.f32 %v1863_v56, %v1490_v55  ;;  %v1497_v56 = vmul.f32 %v4210_v49, %v4210_v49  ;;  %v4594_v49 = vld [vmem:[%s2639_s16 + $0xac8] sm:$0xff] }
 0x186   : > { %v1097_v8 = vadd.f32 %v1096_v22, %v4546_v33  ;;  %v2125_v22 = vadd.f32 %v2124_v26, %v1491_v57  ;;  %v6059_v26 = vld [vmem:[#allocation14_spill] sm:$0xff] }
 0x187   : > { %v837_v12 = vadd.f32 %v836_v1, %v4552_v35  ;;  %v1865_v1 = vadd.f32 %v1864_v36, %v1492_v59  ;;  %6060 = vst [vmem:[#allocation14_spill] sm:$0xff] %v4588_v47  ;;  %v6061_v36 = vld [vmem:[#allocation15_spill] sm:$0xff] }
 0x188   : > { %v1098_v60 = vadd.f32 %v1097_v8, %v4558_v37  ;;  %v2126_v8 = vadd.f32 %v2125_v22, %v1493_v61  ;;  %6062 = vst [vmem:[#allocation15_spill] sm:$0xff] %v4594_v49  ;;  %v6063_v22 = vld [vmem:[#allocation16_spill] sm:$0xff] }
 0x189   : > { %v838_v53 = vadd.f32 %v837_v12, %v4564_v39  ;;  %v1498_v12 = vmul.f32 %v6059_v26, %v6059_v26  ;;  %v1866_v39 = vadd.f32 %v1865_v1, %v1494_v38  ;;  %v4600_v26 = vld [vmem:[%s2639_s16 + $0xad0] sm:$0xff]  ;;  %v6064_v1 = vld [vmem:[#allocation17_spill] sm:$0xff] }
 0x18a   : > { %v1099_v55 = vadd.f32 %v1098_v60, %v4570_v41  ;;  %v1499_v60 = vmul.f32 %v6061_v36, %v6061_v36  ;;  %v2127_v41 = vadd.f32 %v2126_v8, %v1495_v28  ;;  %v4606_v36 = vld [vmem:[%s2639_s16 + $0xad8] sm:$0xff]  ;;  %v6066_v8 = vld [vmem:[#allocation18_spill] sm:$0xff] }
 0x18b   : > { %v839_v57 = vadd.f32 %v838_v53, %v4576_v43  ;;  %v1500_v53 = vmul.f32 %v6063_v22, %v6063_v22  ;;  %v1867_v43 = vadd.f32 %v1866_v39, %v1496_v32  ;;  %6065 = vst [vmem:[#allocation16_spill] sm:$0xff] %v4606_v36  ;;  %v4612_v22 = vld [vmem:[%s2639_s16 + $0xae0] sm:$0xff]  ;;  %v6068_v32 = vld [vmem:[#allocation19_spill] sm:$0xff] }
 0x18c   : > { %v1100_v59 = vadd.f32 %v1099_v55, %v4582_v45  ;;  %v1501_v55 = vmul.f32 %v6064_v1, %v6064_v1  ;;  %v2128_v45 = vadd.f32 %v2127_v41, %v1497_v56  ;;  %6067 = vst [vmem:[#allocation17_spill] sm:$0xff] %v4612_v22  ;;  %v4618_v1 = vld [vmem:[%s2639_s16 + $0xae8] sm:$0xff]  ;;  %v1504_v56 = vmul.f32 %v4252_v6, %v4252_v6  ;;  %v4636_v6 = vld [vmem:[%s2639_s16 + $0xb00] sm:$0xff] }
 0x18d   : > { %v840_v61 = vadd.f32 %v839_v57, %v4588_v47  ;;  %v1502_v57 = vmul.f32 %v6066_v8, %v6066_v8  ;;  %v1868_v47 = vadd.f32 %v1867_v43, %v1498_v12  ;;  %6069 = vst [vmem:[#allocation18_spill] sm:$0xff] %v4618_v1  ;;  %v4624_v8 = vld [vmem:[%s2639_s16 + $0xaf0] sm:$0xff] }
 0x18e   : > { %v1101_v38 = vadd.f32 %v1100_v59, %v4594_v49  ;;  %v1503_v59 = vmul.f32 %v6068_v32, %v6068_v32  ;;  %v2129_v49 = vadd.f32 %v2128_v45, %v1499_v60  ;;  %6070 = vst [vmem:[#allocation19_spill] sm:$0xff] %v4624_v8  ;;  %v6071_v12 = vld [vmem:[#allocation20_spill] sm:$0xff]  ;;  %v6073_v60 = vld [vmem:[#allocation21_spill] sm:$0xff] }
 0x18f   : > { %v841_v28 = vadd.f32 %v840_v61, %v4600_v26  ;;  %v1869_v61 = vadd.f32 %v1868_v47, %v1500_v53  ;;  %v4630_v32 = vld [vmem:[%s2639_s16 + $0xaf8] sm:$0xff]  ;;  %6074 = vst [vmem:[#allocation21_spill] sm:$0xff] %v4636_v6  ;;  %v6075_v53 = vld [vmem:[#allocation22_spill] sm:$0xff] }
 0x190   : > { %v1102_v39 = vadd.f32 %v1101_v38, %v4606_v36  ;;  %v1505_v38 = vmul.f32 %v6071_v12, %v6071_v12  ;;  %v2130_v36 = vadd.f32 %v2129_v49, %v1501_v55  ;;  %6072 = vst [vmem:[#allocation20_spill] sm:$0xff] %v4630_v32  ;;  %v4642_v12 = vld [vmem:[%s2639_s16 + $0xb08] sm:$0xff] }
 0x191   : > { %v842_v41 = vadd.f32 %v841_v28, %v4612_v22  ;;  %v1506_v28 = vmul.f32 %v6073_v60, %v6073_v60  ;;  %v1870_v22 = vadd.f32 %v1869_v61, %v1502_v57  ;;  %6076 = vst [vmem:[#allocation22_spill] sm:$0xff] %v4642_v12  ;;  %v6077_v55 = vld [vmem:[#allocation23_spill] sm:$0xff]  ;;  %v6079_v61 = vld [vmem:[#allocation24_spill] sm:$0xff] }
 0x192   : > { %v1103_v43 = vadd.f32 %v1102_v39, %v4618_v1  ;;  %v1507_v39 = vmul.f32 %v6075_v53, %v6075_v53  ;;  %v2131_v1 = vadd.f32 %v2130_v36, %v1503_v59  ;;  %v4648_v60 = vld [vmem:[%s2639_s16 + $0xb10] sm:$0xff]  ;;  %v4654_v53 = vld [vmem:[%s2639_s16 + $0xb18] sm:$0xff] }
 0x193   : > { %v843_v45 = vadd.f32 %v842_v41, %v4624_v8  ;;  %v1508_v41 = vmul.f32 %v6077_v55, %v6077_v55  ;;  %v1871_v8 = vadd.f32 %v1870_v22, %v1504_v56  ;;  %6078 = vst [vmem:[#allocation23_spill] sm:$0xff] %v4648_v60  ;;  %6080 = vst [vmem:[#allocation24_spill] sm:$0xff] %v4654_v53  ;;  %v6081_v59 = vld [vmem:[#allocation25_spill] sm:$0xff]  ;;  %v6083_v56 = vld [vmem:[#allocation26_spill] sm:$0xff] }
 0x194   : > { %v1104_v47 = vadd.f32 %v1103_v43, %v4630_v32  ;;  %v1509_v43 = vmul.f32 %v6079_v61, %v6079_v61  ;;  %v2132_v32 = vadd.f32 %v2131_v1, %v1505_v38  ;;  %v4660_v55 = vld [vmem:[%s2639_s16 + $0xb20] sm:$0xff]  ;;  %v4666_v61 = vld [vmem:[%s2639_s16 + $0xb28] sm:$0xff] }
 0x195   : > { %v844_v49 = vadd.f32 %v843_v45, %v4636_v6  ;;  %v1510_v45 = vmul.f32 %v6081_v59, %v6081_v59  ;;  %v1872_v6 = vadd.f32 %v1871_v8, %v1506_v28  ;;  %6082 = vst [vmem:[#allocation25_spill] sm:$0xff] %v4660_v55  ;;  %v6084_v38 = vld [vmem:[#allocation27_spill] sm:$0xff]  ;;  %v6085_v28 = vld [vmem:[#allocation28_spill] sm:$0xff] }
 0x196   : > { %v1105_v57 = vadd.f32 %v1104_v47, %v4642_v12  ;;  %v1511_v47 = vmul.f32 %v6083_v56, %v6083_v56  ;;  %v2133_v12 = vadd.f32 %v2132_v32, %v1507_v39  ;;  %v4672_v59 = vld [vmem:[%s2639_s16 + $0xb30] sm:$0xff]  ;;  %v4678_v56 = vld [vmem:[%s2639_s16 + $0xb38] sm:$0xff] }
 0x197   : > { %v845_v36 = vadd.f32 %v844_v49, %v4648_v60  ;;  %v1512_v49 = vmul.f32 %v6084_v38, %v6084_v38  ;;  %v1873_v60 = vadd.f32 %v1872_v6, %v1508_v41  ;;  %v6086_v39 = vld [vmem:[#allocation29_spill] sm:$0xff]  ;;  %v1515_v41 = vmul.f32 %v4318_v20, %v4318_v20 }
 0x198   : > { %v1106_v22 = vadd.f32 %v1105_v57, %v4654_v53  ;;  %v1513_v57 = vmul.f32 %v6085_v28, %v6085_v28  ;;  %v2134_v53 = vadd.f32 %v2133_v12, %v1509_v43  ;;  %v4684_v38 = vld [vmem:[%s2639_s16 + $0xb40] sm:$0xff]  ;;  %v4690_v28 = vld [vmem:[%s2639_s16 + $0xb48] sm:$0xff]  ;;  %v1516_v43 = vmul.f32 %v4324_v16, %v4324_v16  ;;  %v4702_v20 = vld [vmem:[%s2639_s16 + $0xb58] sm:$0xff] }
 0x199   : > { %v846_v1 = vadd.f32 %v845_v36, %v4660_v55  ;;  %v1514_v36 = vmul.f32 %v6086_v39, %v6086_v39  ;;  %v1874_v55 = vadd.f32 %v1873_v60, %v1510_v45  ;;  %v4696_v39 = vld [vmem:[%s2639_s16 + $0xb50] sm:$0xff]  ;;  %v1517_v45 = vmul.f32 %v4330_v46, %v4330_v46  ;;  %v4708_v16 = vld [vmem:[%s2639_s16 + $0xb60] sm:$0xff]  ;;  %v4714_v46 = vld [vmem:[%s2639_s16 + $0xb68] sm:$0xff] }
 0x19a   : > { %v1107_v8 = vadd.f32 %v1106_v22, %v4666_v61  ;;  %v2135_v22 = vadd.f32 %v2134_v53, %v1511_v47  ;;  %v1518_v47 = vmul.f32 %v4336_v42, %v4336_v42  ;;  %v4720_v42 = vld [vmem:[%s2639_s16 + $0xb70] sm:$0xff] }
 0x19b   : > { %v847_v32 = vadd.f32 %v846_v1, %v4672_v59  ;;  %v1875_v1 = vadd.f32 %v1874_v55, %v1512_v49  ;;  %v1519_v49 = vmul.f32 %v4342_v52, %v4342_v52  ;;  %v4726_v52 = vld [vmem:[%s2639_s16 + $0xb78] sm:$0xff] }
 0x19c   : > { %v1108_v6 = vadd.f32 %v1107_v8, %v4678_v56  ;;  %v2136_v8 = vadd.f32 %v2135_v22, %v1513_v57  ;;  %v1520_v22 = vmul.f32 %v4348_v51, %v4348_v51  ;;  %v4732_v51 = vld [vmem:[%s2639_s16 + $0xb80] sm:$0xff] }
 0x19d   : > { %v848_v12 = vadd.f32 %v847_v32, %v4684_v38  ;;  %v1876_v32 = vadd.f32 %v1875_v1, %v1514_v36  ;;  %v1521_v1 = vmul.f32 %v4354_v44, %v4354_v44  ;;  %v4738_v44 = vld [vmem:[%s2639_s16 + $0xb88] sm:$0xff] }
 0x19e   : > { %v1109_v60 = vadd.f32 %v1108_v6, %v4690_v28  ;;  %v2137_v6 = vadd.f32 %v2136_v8, %v1515_v41  ;;  %v1522_v8 = vmul.f32 %v4360_v40, %v4360_v40  ;;  %v4744_v40 = vld [vmem:[%s2639_s16 + $0xb90] sm:$0xff] }
 0x19f   : > { %v849_v53 = vadd.f32 %v848_v12, %v4696_v39  ;;  %v1877_v12 = vadd.f32 %v1876_v32, %v1516_v43  ;;  %v1523_v32 = vmul.f32 %v4366_v14, %v4366_v14  ;;  %v4750_v14 = vld [vmem:[%s2639_s16 + $0xb98] sm:$0xff] }
 0x1a0   : > { %v1110_v55 = vadd.f32 %v1109_v60, %v4702_v20  ;;  %v2138_v60 = vadd.f32 %v2137_v6, %v1517_v45  ;;  %v1524_v6 = vmul.f32 %v4372_v58, %v4372_v58  ;;  %v4756_v58 = vld [vmem:[%s2639_s16 + $0xba0] sm:$0xff] }
 0x1a1   : > { %v850_v57 = vadd.f32 %v849_v53, %v4708_v16  ;;  %v1878_v53 = vadd.f32 %v1877_v12, %v1518_v47  ;;  %v1525_v12 = vmul.f32 %v4378_v50, %v4378_v50  ;;  %v4762_v50 = vld [vmem:[%s2639_s16 + $0xba8] sm:$0xff] }
 0x1a2   : > { %v1111_v36 = vadd.f32 %v1110_v55, %v4714_v46  ;;  %v2139_v55 = vadd.f32 %v2138_v60, %v1519_v49  ;;  %v1526_v60 = vmul.f32 %v4384_v63, %v4384_v63  ;;  %v4768_v63 = vld [vmem:[%s2639_s16 + $0xbb0] sm:$0xff] }
 0x1a3   : > { %v851_v41 = vadd.f32 %v850_v57, %v4720_v42  ;;  %v1879_v57 = vadd.f32 %v1878_v53, %v1520_v22  ;;  %v1527_v53 = vmul.f32 %v4390_v10, %v4390_v10  ;;  %v4774_v10 = vld [vmem:[%s2639_s16 + $0xbb8] sm:$0xff] }
 0x1a4   : > { %v1112_v43 = vadd.f32 %v1111_v36, %v4726_v52  ;;  %v2140_v36 = vadd.f32 %v2139_v55, %v1521_v1  ;;  %v1528_v55 = vmul.f32 %v4396_v0, %v4396_v0  ;;  %v4780_v0 = vld [vmem:[%s2639_s16 + $0xbc0] sm:$0xff] }
 0x1a5   : > { %v852_v45 = vadd.f32 %v851_v41, %v4732_v51  ;;  %v1880_v41 = vadd.f32 %v1879_v57, %v1522_v8  ;;  %v1529_v57 = vmul.f32 %v4402_v7, %v4402_v7  ;;  %v4786_v7 = vld [vmem:[%s2639_s16 + $0xbc8] sm:$0xff] }
 0x1a6   : > { %v1113_v47 = vadd.f32 %v1112_v43, %v4738_v44  ;;  %v2141_v43 = vadd.f32 %v2140_v36, %v1523_v32  ;;  %v1530_v36 = vmul.f32 %v4408_v2, %v4408_v2  ;;  %v4792_v2 = vld [vmem:[%s2639_s16 + $0xbd0] sm:$0xff] }
 0x1a7   : > { %v853_v49 = vadd.f32 %v852_v45, %v4744_v40  ;;  %v1881_v45 = vadd.f32 %v1880_v41, %v1524_v6  ;;  %v1531_v41 = vmul.f32 %v4414_v54, %v4414_v54  ;;  %v4798_v54 = vld [vmem:[%s2639_s16 + $0xbd8] sm:$0xff] }
 0x1a8   : > { %v1114_v22 = vadd.f32 %v1113_v47, %v4750_v14  ;;  %v2142_v47 = vadd.f32 %v2141_v43, %v1525_v12  ;;  %v1532_v43 = vmul.f32 %v4420_v24, %v4420_v24  ;;  %v4804_v24 = vld [vmem:[%s2639_s16 + $0xbe0] sm:$0xff] }
 0x1a9   : > { %v854_v1 = vadd.f32 %v853_v49, %v4756_v58  ;;  %v1882_v49 = vadd.f32 %v1881_v45, %v1526_v60  ;;  %v1533_v45 = vmul.f32 %v4426_v3, %v4426_v3  ;;  %v4810_v3 = vld [vmem:[%s2639_s16 + $0xbe8] sm:$0xff] }
 0x1aa   : > { %v1115_v8 = vadd.f32 %v1114_v22, %v4762_v50  ;;  %v2143_v22 = vadd.f32 %v2142_v47, %v1527_v53  ;;  %v1534_v47 = vmul.f32 %v4432_v62, %v4432_v62  ;;  %v4816_v62 = vld [vmem:[%s2639_s16 + $0xbf0] sm:$0xff] }
 0x1ab   : > { %v855_v32 = vadd.f32 %v854_v1, %v4768_v63  ;;  %v1883_v1 = vadd.f32 %v1882_v49, %v1528_v55  ;;  %v1535_v49 = vmul.f32 %v4438_v9, %v4438_v9  ;;  %v4822_v9 = vld [vmem:[%s2639_s16 + $0xbf8] sm:$0xff] }
 0x1ac   : > { %v1116_v6 = vadd.f32 %v1115_v8, %v4774_v10  ;;  %v2144_v8 = vadd.f32 %v2143_v22, %v1529_v57  ;;  %v1536_v22 = vmul.f32 %v4444_v34, %v4444_v34  ;;  %v4828_v34 = vld [vmem:[%s2639_s16 + $0xc00] sm:$0xff] }
 0x1ad   : > { %v856_v12 = vadd.f32 %v855_v32, %v4780_v0  ;;  %v1884_v32 = vadd.f32 %v1883_v1, %v1530_v36  ;;  %v1537_v1 = vmul.f32 %v4450_v5, %v4450_v5  ;;  %v4834_v5 = vld [vmem:[%s2639_s16 + $0xc08] sm:$0xff] }
 0x1ae   : > { %v1117_v60 = vadd.f32 %v1116_v6, %v4786_v7  ;;  %v2145_v6 = vadd.f32 %v2144_v8, %v1531_v41  ;;  %v1538_v8 = vmul.f32 %v4456_v48, %v4456_v48  ;;  %v4840_v48 = vld [vmem:[%s2639_s16 + $0xc10] sm:$0xff] }
 0x1af   : > { %v857_v53 = vadd.f32 %v856_v12, %v4792_v2  ;;  %v1885_v12 = vadd.f32 %v1884_v32, %v1532_v43  ;;  %v1539_v32 = vmul.f32 %v4462_v4, %v4462_v4  ;;  %v4846_v4 = vld [vmem:[%s2639_s16 + $0xc18] sm:$0xff] }
 0x1b0   : > { %v1118_v55 = vadd.f32 %v1117_v60, %v4798_v54  ;;  %v2146_v60 = vadd.f32 %v2145_v6, %v1533_v45  ;;  %v1540_v6 = vmul.f32 %v4468_v18, %v4468_v18  ;;  %v4852_v18 = vld [vmem:[%s2639_s16 + $0xc20] sm:$0xff] }
 0x1b1   : > { %v858_v57 = vadd.f32 %v857_v53, %v4804_v24  ;;  %v1886_v53 = vadd.f32 %v1885_v12, %v1534_v47  ;;  %v1541_v12 = vmul.f32 %v4474_v30, %v4474_v30  ;;  %v4858_v30 = vld [vmem:[%s2639_s16 + $0xc28] sm:$0xff] }
 0x1b2   : > { %v1119_v36 = vadd.f32 %v1118_v55, %v4810_v3  ;;  %v2147_v55 = vadd.f32 %v2146_v60, %v1535_v49  ;;  %v1542_v60 = vmul.f32 %v4480_v11, %v4480_v11  ;;  %v4864_v11 = vld [vmem:[%s2639_s16 + $0xc30] sm:$0xff] }
 0x1b3   : > { %v859_v41 = vadd.f32 %v858_v57, %v4816_v62  ;;  %v1887_v57 = vadd.f32 %v1886_v53, %v1536_v22  ;;  %v1543_v53 = vmul.f32 %v4486_v13, %v4486_v13  ;;  %v4870_v13 = vld [vmem:[%s2639_s16 + $0xc38] sm:$0xff] }
 0x1b4   : > { %v1120_v43 = vadd.f32 %v1119_v36, %v4822_v9  ;;  %v2148_v36 = vadd.f32 %v2147_v55, %v1537_v1  ;;  %v1544_v55 = vmul.f32 %v4492_v15, %v4492_v15  ;;  %v4876_v15 = vld [vmem:[%s2639_s16 + $0xc40] sm:$0xff] }
 0x1b5   : > { %v860_v45 = vadd.f32 %v859_v41, %v4828_v34  ;;  %v1888_v41 = vadd.f32 %v1887_v57, %v1538_v8  ;;  %v1545_v57 = vmul.f32 %v4498_v17, %v4498_v17  ;;  %v4882_v17 = vld [vmem:[%s2639_s16 + $0xc48] sm:$0xff] }
 0x1b6   : > { %v1121_v47 = vadd.f32 %v1120_v43, %v4834_v5  ;;  %v2149_v43 = vadd.f32 %v2148_v36, %v1539_v32  ;;  %v1546_v36 = vmul.f32 %v4504_v19, %v4504_v19  ;;  %v4888_v19 = vld [vmem:[%s2639_s16 + $0xc50] sm:$0xff] }
 0x1b7   : > { %v861_v49 = vadd.f32 %v860_v45, %v4840_v48  ;;  %v1889_v45 = vadd.f32 %v1888_v41, %v1540_v6  ;;  %v1547_v41 = vmul.f32 %v4510_v21, %v4510_v21  ;;  %v4894_v21 = vld [vmem:[%s2639_s16 + $0xc58] sm:$0xff] }
 0x1b8   : > { %v1122_v22 = vadd.f32 %v1121_v47, %v4846_v4  ;;  %v2150_v47 = vadd.f32 %v2149_v43, %v1541_v12  ;;  %v1548_v43 = vmul.f32 %v4516_v23, %v4516_v23  ;;  %v4900_v23 = vld [vmem:[%s2639_s16 + $0xc60] sm:$0xff] }
 0x1b9   : > { %v862_v1 = vadd.f32 %v861_v49, %v4852_v18  ;;  %v1890_v49 = vadd.f32 %v1889_v45, %v1542_v60  ;;  %v1549_v45 = vmul.f32 %v4522_v25, %v4522_v25  ;;  %v4906_v25 = vld [vmem:[%s2639_s16 + $0xc68] sm:$0xff] }
 0x1ba   : > { %v1123_v8 = vadd.f32 %v1122_v22, %v4858_v30  ;;  %v2151_v22 = vadd.f32 %v2150_v47, %v1543_v53  ;;  %v1550_v47 = vmul.f32 %v4528_v27, %v4528_v27  ;;  %v4912_v27 = vld [vmem:[%s2639_s16 + $0xc70] sm:$0xff] }
 0x1bb   : > { %v863_v32 = vadd.f32 %v862_v1, %v4864_v11  ;;  %v1891_v1 = vadd.f32 %v1890_v49, %v1544_v55  ;;  %v1551_v49 = vmul.f32 %v4534_v29, %v4534_v29  ;;  %6087 = vst [vmem:[#allocation26_spill] sm:$0xff] %v4912_v27  ;;  %v4918_v29 = vld [vmem:[%s2639_s16 + $0xc78] sm:$0xff] }
 0x1bc   : > { %v1124_v6 = vadd.f32 %v1123_v8, %v4870_v13  ;;  %v2152_v8 = vadd.f32 %v2151_v22, %v1545_v57  ;;  %v1552_v22 = vmul.f32 %v4540_v31, %v4540_v31  ;;  %6088 = vst [vmem:[#allocation27_spill] sm:$0xff] %v4918_v29  ;;  %v4924_v31 = vld [vmem:[%s2639_s16 + $0xc80] sm:$0xff] }
 0x1bd   : > { %v864_v12 = vadd.f32 %v863_v32, %v4876_v15  ;;  %v1892_v32 = vadd.f32 %v1891_v1, %v1546_v36  ;;  %v1553_v1 = vmul.f32 %v4546_v33, %v4546_v33  ;;  %6089 = vst [vmem:[#allocation28_spill] sm:$0xff] %v4924_v31  ;;  %v4930_v33 = vld [vmem:[%s2639_s16 + $0xc88] sm:$0xff] }
 0x1be   : > { %v1125_v60 = vadd.f32 %v1124_v6, %v4882_v17  ;;  %v2153_v6 = vadd.f32 %v2152_v8, %v1547_v41  ;;  %v1554_v8 = vmul.f32 %v4552_v35, %v4552_v35  ;;  %6090 = vst [vmem:[#allocation29_spill] sm:$0xff] %v4930_v33  ;;  %v4936_v35 = vld [vmem:[%s2639_s16 + $0xc90] sm:$0xff] }
 0x1bf   : > { %v865_v53 = vadd.f32 %v864_v12, %v4888_v19  ;;  %v1893_v12 = vadd.f32 %v1892_v32, %v1548_v43  ;;  %v1555_v32 = vmul.f32 %v4558_v37, %v4558_v37  ;;  %v4942_v37 = vld [vmem:[%s2639_s16 + $0xc98] sm:$0xff] }
 0x1c0   : > { %v1126_v55 = vadd.f32 %v1125_v60, %v4894_v21  ;;  %v2154_v60 = vadd.f32 %v2153_v6, %v1549_v45  ;;  %v6091_v6 = vld [vmem:[#allocation10_spill] sm:$0xff] }
 0x1c1   : > { %v866_v57 = vadd.f32 %v865_v53, %v4900_v23  ;;  %v1894_v53 = vadd.f32 %v1893_v12, %v1550_v47  ;;  %6092 = vst [vmem:[#allocation10_spill] sm:$0xff] %v4936_v35  ;;  %v6093_v12 = vld [vmem:[#allocation11_spill] sm:$0xff] }
 0x1c2   : > { %v1127_v36 = vadd.f32 %v1126_v55, %v4906_v25  ;;  %v2155_v55 = vadd.f32 %v2154_v60, %v1551_v49  ;;  %6094 = vst [vmem:[#allocation11_spill] sm:$0xff] %v4942_v37  ;;  %v6095_v60 = vld [vmem:[#allocation12_spill] sm:$0xff] }
 0x1c3   : > { %v867_v41 = vadd.f32 %v866_v57, %v4912_v27  ;;  %v1556_v57 = vmul.f32 %v6091_v6, %v6091_v6  ;;  %v1895_v27 = vadd.f32 %v1894_v53, %v1552_v22  ;;  %v4948_v6 = vld [vmem:[%s2639_s16 + $0xca0] sm:$0xff] }
 0x1c4   : > { %v1128_v43 = vadd.f32 %v1127_v36, %v4918_v29  ;;  %v1557_v36 = vmul.f32 %v6093_v12, %v6093_v12  ;;  %v2156_v29 = vadd.f32 %v2155_v55, %v1553_v1  ;;  %v6096_v53 = vld [vmem:[#allocation13_spill] sm:$0xff]  ;;  %v4954_v12 = vld [vmem:[%s2639_s16 + $0xca8] sm:$0xff] }
 0x1c5   : > { %v868_v45 = vadd.f32 %v867_v41, %v4924_v31  ;;  %v1558_v41 = vmul.f32 %v6095_v60, %v6095_v60  ;;  %v1896_v31 = vadd.f32 %v1895_v27, %v1554_v8  ;;  %6097 = vst [vmem:[#allocation12_spill] sm:$0xff] %v4954_v12  ;;  %v6098_v55 = vld [vmem:[#allocation14_spill] sm:$0xff]  ;;  %v4960_v60 = vld [vmem:[%s2639_s16 + $0xcb0] sm:$0xff] }
 0x1c6   : > { %v1129_v47 = vadd.f32 %v1128_v43, %v4930_v33  ;;  %v1559_v43 = vmul.f32 %v6096_v53, %v6096_v53  ;;  %v2157_v33 = vadd.f32 %v2156_v29, %v1555_v32  ;;  %6099 = vst [vmem:[#allocation13_spill] sm:$0xff] %v4960_v60  ;;  %v6100_v8 = vld [vmem:[#allocation15_spill] sm:$0xff]  ;;  %v4966_v53 = vld [vmem:[%s2639_s16 + $0xcb8] sm:$0xff]  ;;  %v1562_v32 = vmul.f32 %v4600_v26, %v4600_v26 }
 0x1c7   : > { %v869_v49 = vadd.f32 %v868_v45, %v4936_v35  ;;  %v1560_v45 = vmul.f32 %v6098_v55, %v6098_v55  ;;  %v1897_v35 = vadd.f32 %v1896_v31, %v1556_v57  ;;  %6101 = vst [vmem:[#allocation14_spill] sm:$0xff] %v4966_v53  ;;  %v4972_v55 = vld [vmem:[%s2639_s16 + $0xcc0] sm:$0xff]  ;;  %v6103_v57 = vld [vmem:[#allocation16_spill] sm:$0xff] }
 0x1c8   : > { %v1130_v22 = vadd.f32 %v1129_v47, %v4942_v37  ;;  %v1561_v47 = vmul.f32 %v6100_v8, %v6100_v8  ;;  %v2158_v37 = vadd.f32 %v2157_v33, %v1557_v36  ;;  %6102 = vst [vmem:[#allocation15_spill] sm:$0xff] %v4972_v55  ;;  %v4978_v8 = vld [vmem:[%s2639_s16 + $0xcc8] sm:$0xff]  ;;  %v6105_v36 = vld [vmem:[#allocation17_spill] sm:$0xff]  ;;  %v4984_v26 = vld [vmem:[%s2639_s16 + $0xcd0] sm:$0xff] }
 0x1c9   : > { %v870_v1 = vadd.f32 %v869_v49, %v4948_v6  ;;  %v1898_v49 = vadd.f32 %v1897_v35, %v1558_v41  ;;  %6104 = vst [vmem:[#allocation16_spill] sm:$0xff] %v4978_v8  ;;  %6106 = vst [vmem:[#allocation17_spill] sm:$0xff] %v4984_v26  ;;  %v6107_v41 = vld [vmem:[#allocation18_spill] sm:$0xff] }
 0x1ca   : > { %v1131_v27 = vadd.f32 %v1130_v22, %v4954_v12  ;;  %v1563_v22 = vmul.f32 %v6103_v57, %v6103_v57  ;;  %v2159_v12 = vadd.f32 %v2158_v37, %v1559_v43  ;;  %v4990_v57 = vld [vmem:[%s2639_s16 + $0xcd8] sm:$0xff]  ;;  %v6109_v43 = vld [vmem:[#allocation19_spill] sm:$0xff] }
 0x1cb   : > { %v871_v29 = vadd.f32 %v870_v1, %v4960_v60  ;;  %v1564_v1 = vmul.f32 %v6105_v36, %v6105_v36  ;;  %v1899_v60 = vadd.f32 %v1898_v49, %v1560_v45  ;;  %6108 = vst [vmem:[#allocation18_spill] sm:$0xff] %v4990_v57  ;;  %v4996_v36 = vld [vmem:[%s2639_s16 + $0xce0] sm:$0xff]  ;;  %v6111_v49 = vld [vmem:[#allocation20_spill] sm:$0xff] }
 0x1cc   : > { %v1132_v31 = vadd.f32 %v1131_v27, %v4966_v53  ;;  %v1565_v27 = vmul.f32 %v6107_v41, %v6107_v41  ;;  %v2160_v53 = vadd.f32 %v2159_v12, %v1561_v47  ;;  %6110 = vst [vmem:[#allocation19_spill] sm:$0xff] %v4996_v36  ;;  %v5002_v41 = vld [vmem:[%s2639_s16 + $0xce8] sm:$0xff]  ;;  %v6113_v47 = vld [vmem:[#allocation21_spill] sm:$0xff] }
 0x1cd   : > { %v872_v33 = vadd.f32 %v871_v29, %v4972_v55  ;;  %v1566_v29 = vmul.f32 %v6109_v43, %v6109_v43  ;;  %v1900_v55 = vadd.f32 %v1899_v60, %v1562_v32  ;;  %6112 = vst [vmem:[#allocation20_spill] sm:$0xff] %v5002_v41  ;;  %v5008_v43 = vld [vmem:[%s2639_s16 + $0xcf0] sm:$0xff]  ;;  %v6115_v32 = vld [vmem:[#allocation22_spill] sm:$0xff] }
 0x1ce   : > { %v1133_v35 = vadd.f32 %v1132_v31, %v4978_v8  ;;  %v1567_v31 = vmul.f32 %v6111_v49, %v6111_v49  ;;  %v2161_v8 = vadd.f32 %v2160_v53, %v1563_v22  ;;  %6114 = vst [vmem:[#allocation21_spill] sm:$0xff] %v5008_v43  ;;  %v5014_v49 = vld [vmem:[%s2639_s16 + $0xcf8] sm:$0xff]  ;;  %v6116_v22 = vld [vmem:[#allocation23_spill] sm:$0xff] }
 0x1cf   : > { %v873_v37 = vadd.f32 %v872_v33, %v4984_v26  ;;  %v1568_v33 = vmul.f32 %v6113_v47, %v6113_v47  ;;  %v1901_v26 = vadd.f32 %v1900_v55, %v1564_v1  ;;  %v5020_v47 = vld [vmem:[%s2639_s16 + $0xd00] sm:$0xff]  ;;  %v6117_v1 = vld [vmem:[#allocation24_spill] sm:$0xff] }
 0x1d0   : > { %v1134_v45 = vadd.f32 %v1133_v35, %v4990_v57  ;;  %v1569_v35 = vmul.f32 %v6115_v32, %v6115_v32  ;;  %v2162_v57 = vadd.f32 %v2161_v8, %v1565_v27  ;;  %v5026_v32 = vld [vmem:[%s2639_s16 + $0xd08] sm:$0xff]  ;;  %v6118_v27 = vld [vmem:[#allocation25_spill] sm:$0xff] }
 0x1d1   : > { %v874_v12 = vadd.f32 %v873_v37, %v4996_v36  ;;  %v1570_v37 = vmul.f32 %v6116_v22, %v6116_v22  ;;  %v1902_v36 = vadd.f32 %v1901_v26, %v1566_v29  ;;  %v5032_v22 = vld [vmem:[%s2639_s16 + $0xd10] sm:$0xff]  ;;  %v1573_v29 = vmul.f32 %v4666_v61, %v4666_v61  ;;  %v5050_v61 = vld [vmem:[%s2639_s16 + $0xd28] sm:$0xff] }
 0x1d2   : > { %v1135_v60 = vadd.f32 %v1134_v45, %v5002_v41  ;;  %v1571_v45 = vmul.f32 %v6117_v1, %v6117_v1  ;;  %v2163_v41 = vadd.f32 %v2162_v57, %v1567_v31  ;;  %v5038_v1 = vld [vmem:[%s2639_s16 + $0xd18] sm:$0xff]  ;;  %v1574_v31 = vmul.f32 %v4672_v59, %v4672_v59  ;;  %v5056_v59 = vld [vmem:[%s2639_s16 + $0xd30] sm:$0xff] }
 0x1d3   : > { %v875_v53 = vadd.f32 %v874_v12, %v5008_v43  ;;  %v1572_v12 = vmul.f32 %v6118_v27, %v6118_v27  ;;  %v1903_v43 = vadd.f32 %v1902_v36, %v1568_v33  ;;  %v5044_v27 = vld [vmem:[%s2639_s16 + $0xd20] sm:$0xff]  ;;  %v1575_v33 = vmul.f32 %v4678_v56, %v4678_v56  ;;  %v5062_v56 = vld [vmem:[%s2639_s16 + $0xd38] sm:$0xff] }
 0x1d4   : > { %v1136_v55 = vadd.f32 %v1135_v60, %v5014_v49  ;;  %v2164_v60 = vadd.f32 %v2163_v41, %v1569_v35  ;;  %v1576_v35 = vmul.f32 %v4684_v38, %v4684_v38  ;;  %v5068_v38 = vld [vmem:[%s2639_s16 + $0xd40] sm:$0xff] }
 0x1d5   : > { %v876_v8 = vadd.f32 %v875_v53, %v5020_v47  ;;  %v1904_v53 = vadd.f32 %v1903_v43, %v1570_v37  ;;  %v1577_v37 = vmul.f32 %v4690_v28, %v4690_v28  ;;  %v5074_v28 = vld [vmem:[%s2639_s16 + $0xd48] sm:$0xff] }
 0x1d6   : > { %v1137_v26 = vadd.f32 %v1136_v55, %v5026_v32  ;;  %v2165_v55 = vadd.f32 %v2164_v60, %v1571_v45  ;;  %v1578_v60 = vmul.f32 %v4696_v39, %v4696_v39  ;;  %v5080_v39 = vld [vmem:[%s2639_s16 + $0xd50] sm:$0xff] }
 0x1d7   : > { %v877_v57 = vadd.f32 %v876_v8, %v5032_v22  ;;  %v1905_v8 = vadd.f32 %v1904_v53, %v1572_v12  ;;  %v1579_v53 = vmul.f32 %v4702_v20, %v4702_v20  ;;  %v5086_v20 = vld [vmem:[%s2639_s16 + $0xd58] sm:$0xff] }
 0x1d8   : > { %v1138_v36 = vadd.f32 %v1137_v26, %v5038_v1  ;;  %v2166_v26 = vadd.f32 %v2165_v55, %v1573_v29  ;;  %v1580_v55 = vmul.f32 %v4708_v16, %v4708_v16  ;;  %v5092_v16 = vld [vmem:[%s2639_s16 + $0xd60] sm:$0xff] }
 0x1d9   : > { %v878_v41 = vadd.f32 %v877_v57, %v5044_v27  ;;  %v1906_v57 = vadd.f32 %v1905_v8, %v1574_v31  ;;  %v1581_v8 = vmul.f32 %v4714_v46, %v4714_v46  ;;  %v5098_v46 = vld [vmem:[%s2639_s16 + $0xd68] sm:$0xff] }
 0x1da   : > { %v1139_v43 = vadd.f32 %v1138_v36, %v5050_v61  ;;  %v2167_v36 = vadd.f32 %v2166_v26, %v1575_v33  ;;  %v1582_v26 = vmul.f32 %v4720_v42, %v4720_v42  ;;  %v5104_v42 = vld [vmem:[%s2639_s16 + $0xd70] sm:$0xff] }
 0x1db   : > { %v879_v45 = vadd.f32 %v878_v41, %v5056_v59  ;;  %v1907_v41 = vadd.f32 %v1906_v57, %v1576_v35  ;;  %v1583_v57 = vmul.f32 %v4726_v52, %v4726_v52  ;;  %v5110_v52 = vld [vmem:[%s2639_s16 + $0xd78] sm:$0xff] }
 0x1dc   : > { %v1140_v12 = vadd.f32 %v1139_v43, %v5062_v56  ;;  %v2168_v43 = vadd.f32 %v2167_v36, %v1577_v37  ;;  %v1584_v36 = vmul.f32 %v4732_v51, %v4732_v51  ;;  %v5116_v51 = vld [vmem:[%s2639_s16 + $0xd80] sm:$0xff] }
 0x1dd   : > { %v880_v29 = vadd.f32 %v879_v45, %v5068_v38  ;;  %v1908_v45 = vadd.f32 %v1907_v41, %v1578_v60  ;;  %v1585_v41 = vmul.f32 %v4738_v44, %v4738_v44  ;;  %v5122_v44 = vld [vmem:[%s2639_s16 + $0xd88] sm:$0xff] }
 0x1de   : > { %v1141_v31 = vadd.f32 %v1140_v12, %v5074_v28  ;;  %v2169_v12 = vadd.f32 %v2168_v43, %v1579_v53  ;;  %v1586_v43 = vmul.f32 %v4744_v40, %v4744_v40  ;;  %v5128_v40 = vld [vmem:[%s2639_s16 + $0xd90] sm:$0xff] }
 0x1df   : > { %v881_v33 = vadd.f32 %v880_v29, %v5080_v39  ;;  %v1909_v29 = vadd.f32 %v1908_v45, %v1580_v55  ;;  %v1587_v45 = vmul.f32 %v4750_v14, %v4750_v14  ;;  %v5134_v14 = vld [vmem:[%s2639_s16 + $0xd98] sm:$0xff] }
 0x1e0   : > { %v1142_v35 = vadd.f32 %v1141_v31, %v5086_v20  ;;  %v2170_v31 = vadd.f32 %v2169_v12, %v1581_v8  ;;  %v1588_v12 = vmul.f32 %v4756_v58, %v4756_v58  ;;  %v5140_v58 = vld [vmem:[%s2639_s16 + $0xda0] sm:$0xff] }
 0x1e1   : > { %v882_v37 = vadd.f32 %v881_v33, %v5092_v16  ;;  %v1910_v33 = vadd.f32 %v1909_v29, %v1582_v26  ;;  %v1589_v29 = vmul.f32 %v4762_v50, %v4762_v50  ;;  %v5146_v50 = vld [vmem:[%s2639_s16 + $0xda8] sm:$0xff] }
 0x1e2   : > { %v1143_v60 = vadd.f32 %v1142_v35, %v5098_v46  ;;  %v2171_v35 = vadd.f32 %v2170_v31, %v1583_v57  ;;  %v1590_v31 = vmul.f32 %v4768_v63, %v4768_v63  ;;  %v5152_v63 = vld [vmem:[%s2639_s16 + $0xdb0] sm:$0xff] }
 0x1e3   : > { %v883_v53 = vadd.f32 %v882_v37, %v5104_v42  ;;  %v1911_v37 = vadd.f32 %v1910_v33, %v1584_v36  ;;  %v1591_v33 = vmul.f32 %v4774_v10, %v4774_v10  ;;  %v5158_v10 = vld [vmem:[%s2639_s16 + $0xdb8] sm:$0xff] }
 0x1e4   : > { %v1144_v55 = vadd.f32 %v1143_v60, %v5110_v52  ;;  %v2172_v60 = vadd.f32 %v2171_v35, %v1585_v41  ;;  %v1592_v35 = vmul.f32 %v4780_v0, %v4780_v0  ;;  %v5164_v0 = vld [vmem:[%s2639_s16 + $0xdc0] sm:$0xff] }
 0x1e5   : > { %v884_v8 = vadd.f32 %v883_v53, %v5116_v51  ;;  %v1912_v53 = vadd.f32 %v1911_v37, %v1586_v43  ;;  %v1593_v37 = vmul.f32 %v4786_v7, %v4786_v7  ;;  %v5170_v7 = vld [vmem:[%s2639_s16 + $0xdc8] sm:$0xff] }
 0x1e6   : > { %v1145_v26 = vadd.f32 %v1144_v55, %v5122_v44  ;;  %v2173_v55 = vadd.f32 %v2172_v60, %v1587_v45  ;;  %v1594_v60 = vmul.f32 %v4792_v2, %v4792_v2  ;;  %v5176_v2 = vld [vmem:[%s2639_s16 + $0xdd0] sm:$0xff] }
 0x1e7   : > { %v885_v57 = vadd.f32 %v884_v8, %v5128_v40  ;;  %v1913_v8 = vadd.f32 %v1912_v53, %v1588_v12  ;;  %v1595_v53 = vmul.f32 %v4798_v54, %v4798_v54  ;;  %v5182_v54 = vld [vmem:[%s2639_s16 + $0xdd8] sm:$0xff] }
 0x1e8   : > { %v1146_v36 = vadd.f32 %v1145_v26, %v5134_v14  ;;  %v2174_v26 = vadd.f32 %v2173_v55, %v1589_v29  ;;  %v1596_v55 = vmul.f32 %v4804_v24, %v4804_v24  ;;  %v5188_v24 = vld [vmem:[%s2639_s16 + $0xde0] sm:$0xff] }
 0x1e9   : > { %v886_v41 = vadd.f32 %v885_v57, %v5140_v58  ;;  %v1914_v57 = vadd.f32 %v1913_v8, %v1590_v31  ;;  %v1597_v8 = vmul.f32 %v4810_v3, %v4810_v3  ;;  %v5194_v3 = vld [vmem:[%s2639_s16 + $0xde8] sm:$0xff] }
 0x1ea   : > { %v1147_v43 = vadd.f32 %v1146_v36, %v5146_v50  ;;  %v2175_v36 = vadd.f32 %v2174_v26, %v1591_v33  ;;  %v1598_v26 = vmul.f32 %v4816_v62, %v4816_v62  ;;  %v5200_v62 = vld [vmem:[%s2639_s16 + $0xdf0] sm:$0xff] }
 0x1eb   : > { %v887_v45 = vadd.f32 %v886_v41, %v5152_v63  ;;  %v1915_v41 = vadd.f32 %v1914_v57, %v1592_v35  ;;  %v1599_v57 = vmul.f32 %v4822_v9, %v4822_v9  ;;  %v5206_v9 = vld [vmem:[%s2639_s16 + $0xdf8] sm:$0xff] }
 0x1ec   : > { %v1148_v12 = vadd.f32 %v1147_v43, %v5158_v10  ;;  %v2176_v43 = vadd.f32 %v2175_v36, %v1593_v37  ;;  %v1600_v36 = vmul.f32 %v4828_v34, %v4828_v34  ;;  %v5212_v34 = vld [vmem:[%s2639_s16 + $0xe00] sm:$0xff] }
 0x1ed   : > { %v888_v29 = vadd.f32 %v887_v45, %v5164_v0  ;;  %v1916_v45 = vadd.f32 %v1915_v41, %v1594_v60  ;;  %v1601_v41 = vmul.f32 %v4834_v5, %v4834_v5  ;;  %v5218_v5 = vld [vmem:[%s2639_s16 + $0xe08] sm:$0xff] }
 0x1ee   : > { %v1149_v31 = vadd.f32 %v1148_v12, %v5170_v7  ;;  %v2177_v12 = vadd.f32 %v2176_v43, %v1595_v53  ;;  %v1602_v43 = vmul.f32 %v4840_v48, %v4840_v48  ;;  %v5224_v48 = vld [vmem:[%s2639_s16 + $0xe10] sm:$0xff] }
 0x1ef   : > { %v889_v33 = vadd.f32 %v888_v29, %v5176_v2  ;;  %v1917_v29 = vadd.f32 %v1916_v45, %v1596_v55  ;;  %v1603_v45 = vmul.f32 %v4846_v4, %v4846_v4  ;;  %v5230_v4 = vld [vmem:[%s2639_s16 + $0xe18] sm:$0xff] }
 0x1f0   : > { %v1150_v35 = vadd.f32 %v1149_v31, %v5182_v54  ;;  %v2178_v31 = vadd.f32 %v2177_v12, %v1597_v8  ;;  %v1604_v12 = vmul.f32 %v4852_v18, %v4852_v18  ;;  %v5236_v18 = vld [vmem:[%s2639_s16 + $0xe20] sm:$0xff] }
 0x1f1   : > { %v890_v37 = vadd.f32 %v889_v33, %v5188_v24  ;;  %v1918_v33 = vadd.f32 %v1917_v29, %v1598_v26  ;;  %v1605_v29 = vmul.f32 %v4858_v30, %v4858_v30  ;;  %v5242_v30 = vld [vmem:[%s2639_s16 + $0xe28] sm:$0xff] }
 0x1f2   : > { %v1151_v60 = vadd.f32 %v1150_v35, %v5194_v3  ;;  %v2179_v35 = vadd.f32 %v2178_v31, %v1599_v57  ;;  %v1606_v31 = vmul.f32 %v4864_v11, %v4864_v11  ;;  %v5248_v11 = vld [vmem:[%s2639_s16 + $0xe30] sm:$0xff] }
 0x1f3   : > { %v891_v53 = vadd.f32 %v890_v37, %v5200_v62  ;;  %v1919_v37 = vadd.f32 %v1918_v33, %v1600_v36  ;;  %v1607_v33 = vmul.f32 %v4870_v13, %v4870_v13  ;;  %v5254_v13 = vld [vmem:[%s2639_s16 + $0xe38] sm:$0xff] }
 0x1f4   : > { %v1152_v55 = vadd.f32 %v1151_v60, %v5206_v9  ;;  %v2180_v60 = vadd.f32 %v2179_v35, %v1601_v41  ;;  %v1608_v35 = vmul.f32 %v4876_v15, %v4876_v15  ;;  %v5260_v15 = vld [vmem:[%s2639_s16 + $0xe40] sm:$0xff] }
 0x1f5   : > { %v892_v8 = vadd.f32 %v891_v53, %v5212_v34  ;;  %v1920_v53 = vadd.f32 %v1919_v37, %v1602_v43  ;;  %v1609_v37 = vmul.f32 %v4882_v17, %v4882_v17  ;;  %6119 = vst [vmem:[#allocation22_spill] sm:$0xff] %v5260_v15  ;;  %v5266_v17 = vld [vmem:[%s2639_s16 + $0xe48] sm:$0xff] }
 0x1f6   : > { %v1153_v26 = vadd.f32 %v1152_v55, %v5218_v5  ;;  %v2181_v55 = vadd.f32 %v2180_v60, %v1603_v45  ;;  %v1610_v60 = vmul.f32 %v4888_v19, %v4888_v19  ;;  %6120 = vst [vmem:[#allocation23_spill] sm:$0xff] %v5266_v17  ;;  %v5272_v19 = vld [vmem:[%s2639_s16 + $0xe50] sm:$0xff] }
 0x1f7   : > { %v893_v57 = vadd.f32 %v892_v8, %v5224_v48  ;;  %v1921_v8 = vadd.f32 %v1920_v53, %v1604_v12  ;;  %v1611_v53 = vmul.f32 %v4894_v21, %v4894_v21  ;;  %6121 = vst [vmem:[#allocation24_spill] sm:$0xff] %v5272_v19  ;;  %v5278_v21 = vld [vmem:[%s2639_s16 + $0xe58] sm:$0xff] }
 0x1f8   : > { %v1154_v36 = vadd.f32 %v1153_v26, %v5230_v4  ;;  %v2182_v26 = vadd.f32 %v2181_v55, %v1605_v29  ;;  %v1612_v55 = vmul.f32 %v4900_v23, %v4900_v23  ;;  %6122 = vst [vmem:[#allocation25_spill] sm:$0xff] %v5278_v21  ;;  %v5284_v23 = vld [vmem:[%s2639_s16 + $0xe60] sm:$0xff] }
 0x1f9   : > { %v894_v41 = vadd.f32 %v893_v57, %v5236_v18  ;;  %v1922_v57 = vadd.f32 %v1921_v8, %v1606_v31  ;;  %v1613_v8 = vmul.f32 %v4906_v25, %v4906_v25  ;;  %v5290_v25 = vld [vmem:[%s2639_s16 + $0xe68] sm:$0xff] }
 0x1fa   : > { %v1155_v43 = vadd.f32 %v1154_v36, %v5242_v30  ;;  %v2183_v36 = vadd.f32 %v2182_v26, %v1607_v33  ;;  %v6123_v26 = vld [vmem:[#allocation26_spill] sm:$0xff] }
 0x1fb   : > { %v895_v45 = vadd.f32 %v894_v41, %v5248_v11  ;;  %v1923_v41 = vadd.f32 %v1922_v57, %v1608_v35  ;;  %6124 = vst [vmem:[#allocation26_spill] sm:$0xff] %v5284_v23  ;;  %v6125_v57 = vld [vmem:[#allocation27_spill] sm:$0xff] }
 0x1fc   : > { %v1156_v12 = vadd.f32 %v1155_v43, %v5254_v13  ;;  %v2184_v43 = vadd.f32 %v2183_v36, %v1609_v37  ;;  %6126 = vst [vmem:[#allocation27_spill] sm:$0xff] %v5290_v25  ;;  %v6127_v36 = vld [vmem:[#allocation28_spill] sm:$0xff] }
 0x1fd   : > { %v896_v29 = vadd.f32 %v895_v45, %v5260_v15  ;;  %v1614_v45 = vmul.f32 %v6123_v26, %v6123_v26  ;;  %v1924_v15 = vadd.f32 %v1923_v41, %v1610_v60  ;;  %v5296_v26 = vld [vmem:[%s2639_s16 + $0xe70] sm:$0xff]  ;;  %v6128_v41 = vld [vmem:[#allocation29_spill] sm:$0xff] }
 0x1fe   : > { %v1157_v31 = vadd.f32 %v1156_v12, %v5266_v17  ;;  %v1615_v12 = vmul.f32 %v6125_v57, %v6125_v57  ;;  %v2185_v17 = vadd.f32 %v2184_v43, %v1611_v53  ;;  %v5302_v57 = vld [vmem:[%s2639_s16 + $0xe78] sm:$0xff]  ;;  %v6130_v43 = vld [vmem:[#allocation10_spill] sm:$0xff] }
 0x1ff   : > { %v897_v33 = vadd.f32 %v896_v29, %v5272_v19  ;;  %v1616_v29 = vmul.f32 %v6127_v36, %v6127_v36  ;;  %v1925_v19 = vadd.f32 %v1924_v15, %v1612_v55  ;;  %6129 = vst [vmem:[#allocation28_spill] sm:$0xff] %v5302_v57  ;;  %v5308_v36 = vld [vmem:[%s2639_s16 + $0xe80] sm:$0xff]  ;;  %v6132_v55 = vld [vmem:[#allocation11_spill] sm:$0xff] }
 0x200   : > { %v1158_v35 = vadd.f32 %v1157_v31, %v5278_v21  ;;  %v1617_v31 = vmul.f32 %v6128_v41, %v6128_v41  ;;  %v2186_v21 = vadd.f32 %v2185_v17, %v1613_v8  ;;  %6131 = vst [vmem:[#allocation29_spill] sm:$0xff] %v5308_v36  ;;  %v5314_v41 = vld [vmem:[%s2639_s16 + $0xe88] sm:$0xff]  ;;  %v1620_v8 = vmul.f32 %v4948_v6, %v4948_v6  ;;  %v5332_v6 = vld [vmem:[%s2639_s16 + $0xea0] sm:$0xff] }
 0x201   : > { %v898_v37 = vadd.f32 %v897_v33, %v5284_v23  ;;  %v1618_v33 = vmul.f32 %v6130_v43, %v6130_v43  ;;  %v1926_v23 = vadd.f32 %v1925_v19, %v1614_v45  ;;  %6133 = vst [vmem:[#allocation10_spill] sm:$0xff] %v5314_v41  ;;  %v5320_v43 = vld [vmem:[%s2639_s16 + $0xe90] sm:$0xff] }
 0x202   : > { %v1159_v60 = vadd.f32 %v1158_v35, %v5290_v25  ;;  %v1619_v35 = vmul.f32 %v6132_v55, %v6132_v55  ;;  %v2187_v25 = vadd.f32 %v2186_v21, %v1615_v12  ;;  %6134 = vst [vmem:[#allocation11_spill] sm:$0xff] %v5320_v43  ;;  %v6135_v45 = vld [vmem:[#allocation12_spill] sm:$0xff]  ;;  %v6137_v12 = vld [vmem:[#allocation13_spill] sm:$0xff] }
 0x203   : > { %v899_v53 = vadd.f32 %v898_v37, %v5296_v26  ;;  %v1927_v37 = vadd.f32 %v1926_v23, %v1616_v29  ;;  %v5326_v55 = vld [vmem:[%s2639_s16 + $0xe98] sm:$0xff]  ;;  %6138 = vst [vmem:[#allocation13_spill] sm:$0xff] %v5332_v6  ;;  %v6139_v29 = vld [vmem:[#allocation14_spill] sm:$0xff] }
 0x204   : > { %v1160_v15 = vadd.f32 %v1159_v60, %v5302_v57  ;;  %v1621_v60 = vmul.f32 %v6135_v45, %v6135_v45  ;;  %v2188_v57 = vadd.f32 %v2187_v25, %v1617_v31  ;;  %6136 = vst [vmem:[#allocation12_spill] sm:$0xff] %v5326_v55  ;;  %v5338_v45 = vld [vmem:[%s2639_s16 + $0xea8] sm:$0xff] }
 0x205   : > { %v900_v17 = vadd.f32 %v899_v53, %v5308_v36  ;;  %v1622_v53 = vmul.f32 %v6137_v12, %v6137_v12  ;;  %v1928_v36 = vadd.f32 %v1927_v37, %v1618_v33  ;;  %6140 = vst [vmem:[#allocation14_spill] sm:$0xff] %v5338_v45  ;;  %v6141_v31 = vld [vmem:[#allocation15_spill] sm:$0xff]  ;;  %v6143_v37 = vld [vmem:[#allocation16_spill] sm:$0xff] }
 0x206   : > { %v1161_v19 = vadd.f32 %v1160_v15, %v5314_v41  ;;  %v1623_v15 = vmul.f32 %v6139_v29, %v6139_v29  ;;  %v2189_v41 = vadd.f32 %v2188_v57, %v1619_v35  ;;  %v5344_v12 = vld [vmem:[%s2639_s16 + $0xeb0] sm:$0xff]  ;;  %v5350_v29 = vld [vmem:[%s2639_s16 + $0xeb8] sm:$0xff] }
 0x207   : > { %v901_v21 = vadd.f32 %v900_v17, %v5320_v43  ;;  %v1624_v17 = vmul.f32 %v6141_v31, %v6141_v31  ;;  %v1929_v43 = vadd.f32 %v1928_v36, %v1620_v8  ;;  %6142 = vst [vmem:[#allocation15_spill] sm:$0xff] %v5344_v12  ;;  %6144 = vst [vmem:[#allocation16_spill] sm:$0xff] %v5350_v29  ;;  %v6145_v35 = vld [vmem:[#allocation17_spill] sm:$0xff]  ;;  %v6147_v8 = vld [vmem:[#allocation18_spill] sm:$0xff] }
 0x208   : > { %v1162_v23 = vadd.f32 %v1161_v19, %v5326_v55  ;;  %v1625_v19 = vmul.f32 %v6143_v37, %v6143_v37  ;;  %v2190_v55 = vadd.f32 %v2189_v41, %v1621_v60  ;;  %v5356_v31 = vld [vmem:[%s2639_s16 + $0xec0] sm:$0xff]  ;;  %v5362_v37 = vld [vmem:[%s2639_s16 + $0xec8] sm:$0xff] }
 0x209   : > { %v902_v25 = vadd.f32 %v901_v21, %v5332_v6  ;;  %v1626_v21 = vmul.f32 %v6145_v35, %v6145_v35  ;;  %v1930_v6 = vadd.f32 %v1929_v43, %v1622_v53  ;;  %6146 = vst [vmem:[#allocation17_spill] sm:$0xff] %v5356_v31  ;;  %v6148_v60 = vld [vmem:[#allocation19_spill] sm:$0xff]  ;;  %v6149_v53 = vld [vmem:[#allocation20_spill] sm:$0xff] }
 0x20a   : > { %v1163_v33 = vadd.f32 %v1162_v23, %v5338_v45  ;;  %v1627_v23 = vmul.f32 %v6147_v8, %v6147_v8  ;;  %v2191_v45 = vadd.f32 %v2190_v55, %v1623_v15  ;;  %v5368_v35 = vld [vmem:[%s2639_s16 + $0xed0] sm:$0xff]  ;;  %v5374_v8 = vld [vmem:[%s2639_s16 + $0xed8] sm:$0xff] }
 0x20b   : > { %v903_v57 = vadd.f32 %v902_v25, %v5344_v12  ;;  %v1628_v25 = vmul.f32 %v6148_v60, %v6148_v60  ;;  %v1931_v12 = vadd.f32 %v1930_v6, %v1624_v17  ;;  %v6150_v15 = vld [vmem:[#allocation21_spill] sm:$0xff]  ;;  %v1631_v17 = vmul.f32 %v5014_v49, %v5014_v49 }
 0x20c   : > { %v1164_v36 = vadd.f32 %v1163_v33, %v5350_v29  ;;  %v1629_v33 = vmul.f32 %v6149_v53, %v6149_v53  ;;  %v2192_v29 = vadd.f32 %v2191_v45, %v1625_v19  ;;  %v5380_v60 = vld [vmem:[%s2639_s16 + $0xee0] sm:$0xff]  ;;  %v5386_v53 = vld [vmem:[%s2639_s16 + $0xee8] sm:$0xff]  ;;  %v1632_v19 = vmul.f32 %v5020_v47, %v5020_v47  ;;  %v5398_v49 = vld [vmem:[%s2639_s16 + $0xef8] sm:$0xff] }
 0x20d   : > { %v904_v41 = vadd.f32 %v903_v57, %v5356_v31  ;;  %v1630_v57 = vmul.f32 %v6150_v15, %v6150_v15  ;;  %v1932_v31 = vadd.f32 %v1931_v12, %v1626_v21  ;;  %v5392_v15 = vld [vmem:[%s2639_s16 + $0xef0] sm:$0xff]  ;;  %v1633_v21 = vmul.f32 %v5026_v32, %v5026_v32  ;;  %v5404_v47 = vld [vmem:[%s2639_s16 + $0xf00] sm:$0xff]  ;;  %v5410_v32 = vld [vmem:[%s2639_s16 + $0xf08] sm:$0xff] }
 0x20e   : > { %v1165_v43 = vadd.f32 %v1164_v36, %v5362_v37  ;;  %v2193_v36 = vadd.f32 %v2192_v29, %v1627_v23  ;;  %v1634_v23 = vmul.f32 %v5032_v22, %v5032_v22  ;;  %v5416_v22 = vld [vmem:[%s2639_s16 + $0xf10] sm:$0xff] }
 0x20f   : > { %v905_v55 = vadd.f32 %v904_v41, %v5368_v35  ;;  %v1933_v41 = vadd.f32 %v1932_v31, %v1628_v25  ;;  %v1635_v25 = vmul.f32 %v5038_v1, %v5038_v1  ;;  %v5422_v1 = vld [vmem:[%s2639_s16 + $0xf18] sm:$0xff] }
 0x210   : > { %v1166_v6 = vadd.f32 %v1165_v43, %v5374_v8  ;;  %v2194_v43 = vadd.f32 %v2193_v36, %v1629_v33  ;;  %v1636_v36 = vmul.f32 %v5044_v27, %v5044_v27  ;;  %v5428_v27 = vld [vmem:[%s2639_s16 + $0xf20] sm:$0xff] }
 0x211   : > { %v906_v45 = vadd.f32 %v905_v55, %v5380_v60  ;;  %v1934_v55 = vadd.f32 %v1933_v41, %v1630_v57  ;;  %v1637_v41 = vmul.f32 %v5050_v61, %v5050_v61  ;;  %v5434_v61 = vld [vmem:[%s2639_s16 + $0xf28] sm:$0xff] }
 0x212   : > { %v1167_v12 = vadd.f32 %v1166_v6, %v5386_v53  ;;  %v2195_v6 = vadd.f32 %v2194_v43, %v1631_v17  ;;  %v1638_v43 = vmul.f32 %v5056_v59, %v5056_v59  ;;  %v5440_v59 = vld [vmem:[%s2639_s16 + $0xf30] sm:$0xff] }
 0x213   : > { %v907_v29 = vadd.f32 %v906_v45, %v5392_v15  ;;  %v1935_v45 = vadd.f32 %v1934_v55, %v1632_v19  ;;  %v1639_v55 = vmul.f32 %v5062_v56, %v5062_v56  ;;  %v5446_v56 = vld [vmem:[%s2639_s16 + $0xf38] sm:$0xff] }
 0x214   : > { %v1168_v31 = vadd.f32 %v1167_v12, %v5398_v49  ;;  %v2196_v12 = vadd.f32 %v2195_v6, %v1633_v21  ;;  %v1640_v6 = vmul.f32 %v5068_v38, %v5068_v38  ;;  %v5452_v38 = vld [vmem:[%s2639_s16 + $0xf40] sm:$0xff] }
 0x215   : > { %v908_v33 = vadd.f32 %v907_v29, %v5404_v47  ;;  %v1936_v29 = vadd.f32 %v1935_v45, %v1634_v23  ;;  %v1641_v45 = vmul.f32 %v5074_v28, %v5074_v28  ;;  %v5458_v28 = vld [vmem:[%s2639_s16 + $0xf48] sm:$0xff] }
 0x216   : > { %v1169_v57 = vadd.f32 %v1168_v31, %v5410_v32  ;;  %v2197_v31 = vadd.f32 %v2196_v12, %v1635_v25  ;;  %v1642_v12 = vmul.f32 %v5080_v39, %v5080_v39  ;;  %v5464_v39 = vld [vmem:[%s2639_s16 + $0xf50] sm:$0xff] }
 0x217   : > { %v909_v17 = vadd.f32 %v908_v33, %v5416_v22  ;;  %v1937_v33 = vadd.f32 %v1936_v29, %v1636_v36  ;;  %v1643_v29 = vmul.f32 %v5086_v20, %v5086_v20  ;;  %v5470_v20 = vld [vmem:[%s2639_s16 + $0xf58] sm:$0xff] }
 0x218   : > { %v1170_v19 = vadd.f32 %v1169_v57, %v5422_v1  ;;  %v2198_v57 = vadd.f32 %v2197_v31, %v1637_v41  ;;  %v1644_v31 = vmul.f32 %v5092_v16, %v5092_v16  ;;  %v5476_v16 = vld [vmem:[%s2639_s16 + $0xf60] sm:$0xff] }
 0x219   : > { %v910_v21 = vadd.f32 %v909_v17, %v5428_v27  ;;  %v1938_v17 = vadd.f32 %v1937_v33, %v1638_v43  ;;  %v1645_v33 = vmul.f32 %v5098_v46, %v5098_v46  ;;  %v5482_v46 = vld [vmem:[%s2639_s16 + $0xf68] sm:$0xff] }
 0x21a   : > { %v1171_v23 = vadd.f32 %v1170_v19, %v5434_v61  ;;  %v2199_v19 = vadd.f32 %v2198_v57, %v1639_v55  ;;  %v1646_v57 = vmul.f32 %v5104_v42, %v5104_v42  ;;  %v5488_v42 = vld [vmem:[%s2639_s16 + $0xf70] sm:$0xff] }
 0x21b   : > { %v911_v25 = vadd.f32 %v910_v21, %v5440_v59  ;;  %v1939_v21 = vadd.f32 %v1938_v17, %v1640_v6  ;;  %v1647_v17 = vmul.f32 %v5110_v52, %v5110_v52  ;;  %v5494_v52 = vld [vmem:[%s2639_s16 + $0xf78] sm:$0xff] }
 0x21c   : > { %v1172_v36 = vadd.f32 %v1171_v23, %v5446_v56  ;;  %v2200_v23 = vadd.f32 %v2199_v19, %v1641_v45  ;;  %v1648_v19 = vmul.f32 %v5116_v51, %v5116_v51  ;;  %v5500_v51 = vld [vmem:[%s2639_s16 + $0xf80] sm:$0xff] }
 0x21d   : > { %v912_v41 = vadd.f32 %v911_v25, %v5452_v38  ;;  %v1940_v25 = vadd.f32 %v1939_v21, %v1642_v12  ;;  %v1649_v21 = vmul.f32 %v5122_v44, %v5122_v44  ;;  %v5506_v44 = vld [vmem:[%s2639_s16 + $0xf88] sm:$0xff] }
 0x21e   : > { %v1173_v43 = vadd.f32 %v1172_v36, %v5458_v28  ;;  %v2201_v36 = vadd.f32 %v2200_v23, %v1643_v29  ;;  %v1650_v23 = vmul.f32 %v5128_v40, %v5128_v40  ;;  %v5512_v40 = vld [vmem:[%s2639_s16 + $0xf90] sm:$0xff] }
 0x21f   : > { %v913_v55 = vadd.f32 %v912_v41, %v5464_v39  ;;  %v1941_v41 = vadd.f32 %v1940_v25, %v1644_v31  ;;  %v1651_v25 = vmul.f32 %v5134_v14, %v5134_v14  ;;  %v5518_v14 = vld [vmem:[%s2639_s16 + $0xf98] sm:$0xff] }
 0x220   : > { %v1174_v6 = vadd.f32 %v1173_v43, %v5470_v20  ;;  %v2202_v43 = vadd.f32 %v2201_v36, %v1645_v33  ;;  %v1652_v36 = vmul.f32 %v5140_v58, %v5140_v58  ;;  %v5524_v58 = vld [vmem:[%s2639_s16 + $0xfa0] sm:$0xff] }
 0x221   : > { %v914_v45 = vadd.f32 %v913_v55, %v5476_v16  ;;  %v1942_v55 = vadd.f32 %v1941_v41, %v1646_v57  ;;  %v1653_v41 = vmul.f32 %v5146_v50, %v5146_v50  ;;  %v5530_v50 = vld [vmem:[%s2639_s16 + $0xfa8] sm:$0xff] }
 0x222   : > { %v1175_v12 = vadd.f32 %v1174_v6, %v5482_v46  ;;  %v2203_v6 = vadd.f32 %v2202_v43, %v1647_v17  ;;  %v1654_v43 = vmul.f32 %v5152_v63, %v5152_v63  ;;  %v5536_v63 = vld [vmem:[%s2639_s16 + $0xfb0] sm:$0xff] }
 0x223   : > { %v915_v29 = vadd.f32 %v914_v45, %v5488_v42  ;;  %v1943_v45 = vadd.f32 %v1942_v55, %v1648_v19  ;;  %v1655_v55 = vmul.f32 %v5158_v10, %v5158_v10  ;;  %v5542_v10 = vld [vmem:[%s2639_s16 + $0xfb8] sm:$0xff] }
 0x224   : > { %v1176_v31 = vadd.f32 %v1175_v12, %v5494_v52  ;;  %v2204_v12 = vadd.f32 %v2203_v6, %v1649_v21  ;;  %v1656_v6 = vmul.f32 %v5164_v0, %v5164_v0  ;;  %v5548_v0 = vld [vmem:[%s2639_s16 + $0xfc0] sm:$0xff] }
 0x225   : > { %v916_v33 = vadd.f32 %v915_v29, %v5500_v51  ;;  %v1944_v29 = vadd.f32 %v1943_v45, %v1650_v23  ;;  %v1657_v45 = vmul.f32 %v5170_v7, %v5170_v7  ;;  %v5554_v7 = vld [vmem:[%s2639_s16 + $0xfc8] sm:$0xff] }
 0x226   : > { %v1177_v57 = vadd.f32 %v1176_v31, %v5506_v44  ;;  %v2205_v31 = vadd.f32 %v2204_v12, %v1651_v25  ;;  %v1658_v12 = vmul.f32 %v5176_v2, %v5176_v2  ;;  %6151 = vst [vmem:[#allocation18_spill] sm:$0xff] %v5554_v7  ;;  %v5560_v2 = vld [vmem:[%s2639_s16 + $0xfd0] sm:$0xff] }
 0x227   : > { %v917_v17 = vadd.f32 %v916_v33, %v5512_v40  ;;  %v1945_v33 = vadd.f32 %v1944_v29, %v1652_v36  ;;  %v1659_v29 = vmul.f32 %v5182_v54, %v5182_v54  ;;  %v5566_v54 = vld [vmem:[%s2639_s16 + $0xfd8] sm:$0xff] }
 0x228   : > { %v1178_v19 = vadd.f32 %v1177_v57, %v5518_v14  ;;  %v2206_v57 = vadd.f32 %v2205_v31, %v1653_v41  ;;  %v1660_v31 = vmul.f32 %v5188_v24, %v5188_v24  ;;  %6152 = vst [vmem:[#allocation19_spill] sm:$0xff] %v5566_v54  ;;  %v5572_v24 = vld [vmem:[%s2639_s16 + $0xfe0] sm:$0xff] }
 0x229   : > { %v918_v21 = vadd.f32 %v917_v17, %v5524_v58  ;;  %v1946_v17 = vadd.f32 %v1945_v33, %v1654_v43  ;;  %v1661_v33 = vmul.f32 %v5194_v3, %v5194_v3  ;;  %6153 = vst [vmem:[#allocation20_spill] sm:$0xff] %v5572_v24 }
 0x22a   : > { %v1179_v23 = vadd.f32 %v1178_v19, %v5530_v50  ;;  %v2207_v19 = vadd.f32 %v2206_v57, %v1655_v55  ;;  %v1662_v57 = vmul.f32 %v5200_v62, %v5200_v62 }
 0x22b   : > { %v919_v25 = vadd.f32 %v918_v21, %v5536_v63  ;;  %v1947_v21 = vadd.f32 %v1946_v17, %v1656_v6  ;;  %v1663_v17 = vmul.f32 %v5206_v9, %v5206_v9 }
 0x22c   : > { %v1180_v36 = vadd.f32 %v1179_v23, %v5542_v10  ;;  %v2208_v23 = vadd.f32 %v2207_v19, %v1657_v45  ;;  %v1664_v45 = vmul.f32 %v5212_v34, %v5212_v34  ;;  %v1667_v34 = vmul.f32 %v5230_v4, %v5230_v4 }
 0x22d   : > { %v920_v41 = vadd.f32 %v919_v25, %v5548_v0  ;;  %v1948_v25 = vadd.f32 %v1947_v21, %v1658_v12  ;;  %v1665_v12 = vmul.f32 %v5218_v5, %v5218_v5 }
 0x22e   : > { %v1181_v43 = vadd.f32 %v1180_v36, %v5554_v7  ;;  %v2209_v36 = vadd.f32 %v2208_v23, %v1659_v29  ;;  %v5578_v7 = vld [vmem:[%s2639_s16 + $0xfe8] sm:$0xff]  ;;  %v1666_v29 = vmul.f32 %v5224_v48, %v5224_v48  ;;  %v1670_v48 = vmul.f32 %v5248_v11, %v5248_v11 }
 0x22f   : > { %v921_v55 = vadd.f32 %v920_v41, %v5560_v2  ;;  %6154 = vst [vmem:[#allocation21_spill] sm:$0xff] %v5578_v7  ;;  %v1949_v19 = vadd.f32 %v1948_v25, %v1660_v31  ;;  %v5584_v41 = vld [vmem:[%s2639_s16 + $0xff0] sm:$0xff] }
 0x230   : > { %v1182_v6 = vadd.f32 %v1181_v43, %v5566_v54  ;;  %6155 = vst [vmem:[#allocation30_spill] sm:$0xff] %v5584_v41  ;;  %v2210_v21 = vadd.f32 %v2209_v36, %v1661_v33  ;;  %v5590_v43 = vld [vmem:[%s2639_s16 + $0xff8] sm:$0xff]  ;;  %v1669_v36 = vmul.f32 %v5242_v30, %v5242_v30 }
 0x231   : > { %v922_v3 = vadd.f32 %v921_v55, %v5572_v24  ;;  %6156 = vst [vmem:[#allocation31_spill] sm:$0xff] %v5590_v43  ;;  %v1950_v23 = vadd.f32 %v1949_v19, %v1662_v57  ;;  %v1671_v57 = vmul.f32 %v5254_v13, %v5254_v13 }
 0x232   : > { %v1183_v62 = vadd.f32 %v1182_v6, %v5578_v7  ;;  %v2211_v31 = vadd.f32 %v2210_v21, %v1663_v17  ;;  %v1668_v6 = vmul.f32 %v5236_v18, %v5236_v18  ;;  %v2556_v17 = vmov 1966171168  }
 0x233   : > { %v923_v9 = vadd.f32 %v922_v3, %v5584_v41  ;;  %v1951_v5 = vadd.f32 %v1950_v23, %v1664_v45  ;;  %v1197_v21 = vlaneseq  ;;  %v6157_v45 = vld [vmem:[#allocation22_spill] sm:$0xff] }
 0x234   : > { %v1184_v55 = vadd.f32 %v1183_v62, %v5590_v43  ;;  %v2212_v3 = vadd.f32 %v2211_v31, %v1665_v12  ;;  %v1195_v62 = vunpack.c.l.s4 %v2556_v17  ;;  %v1672_v23 = vmul.f32 %v6157_v45, %v6157_v45  ;;  %v6158_v12 = vld [vmem:[#allocation23_spill] sm:$0xff]  ;;  %v6161_v45 = vld [vmem:[#allocation26_spill] sm:$0xff] }
 0x235   : > { %v924_v25 = vrot.slane %v923_v9, 4  ;;  %v1952_v19 = vadd.f32 %v1951_v5, %v1666_v29  ;;  %v6160_v29 = vld [vmem:[#allocation25_spill] sm:$0xff]  ;;  %vm5638_vm1 = vcmp.lt.s32.totalorder %v1197_v21, 256 }
 0x236   : > { %v1185_v33 = vrot.slane %v1184_v55, 4  ;;  %v2213_v43 = vadd.f32 %v2212_v3, %v1667_v34  ;;  %v1196_v34 = vunpack.c.0.s8 %v1195_v62  ;;  %v1198_v3 = vshrl.u32 %v1197_v21, 7 }
 0x237   : > { %v925_v41 = vadd.f32 %v924_v25, %v923_v9  ;;  %v1953_v7 = vadd.f32 %v1952_v19, %v1668_v6  ;;  %v1673_v9 = vmul.f32 %v6158_v12, %v6158_v12  ;;  %v6159_v25 = vld [vmem:[#allocation24_spill] sm:$0xff]  ;;  %v1676_v6 = vmul.f32 %v6161_v45, %v6161_v45  ;;  %v6162_v12 = vld [vmem:[#allocation27_spill] sm:$0xff] }
 0x238   : > { %v1186_v4 = vadd.f32 %v1185_v33, %v1184_v55  ;;  %v2214_v31 = vadd.f32 %v2213_v43, %v1669_v36  ;;  %v1674_v13 = vmul.f32 %v6159_v25, %v6159_v25  ;;  %v1675_v55 = vmul.f32 %v6160_v29, %v6160_v29 }
 0x239   : > { %v926_v18 = vrot.slane %v925_v41, 2  ;;  %v1954_v5 = vadd.f32 %v1953_v7, %v1670_v48  ;;  %v5620_v48 = vsub.s32 %v1196_v34, %v1198_v3  ;;  %v1689_v21 = vmul.f32 %v5362_v37, %v5362_v37 }
 0x23a   : > { %v1187_v30 = vrot.slane %v1186_v4, 2  ;;  %v2215_v17 = vadd.f32 %v2214_v31, %v1671_v57  ;;  %v1694_v37 = vmul.f32 %v5392_v15, %v5392_v15  ;;  %v1699_v15 = vmul.f32 %v5422_v1, %v5422_v1 }
 0x23b   : > { %v927_v11 = vadd.f32 %v926_v18, %v925_v41  ;;  %v1955_v19 = vadd.f32 %v1954_v5, %v1672_v23  ;;  %v1677_v41 = vmul.f32 %v6162_v12, %v6162_v12  ;;  %v1678_v18 = vmul.f32 %v5296_v26, %v5296_v26  ;;  %v6165_v5 = vld [vmem:[#allocation10_spill] sm:$0xff] }
 0x23c   : > { %v1188_v33 = vadd.f32 %v1187_v30, %v1186_v4  ;;  %v2216_v43 = vadd.f32 %v2215_v17, %v1673_v9  ;;  %v6163_v4 = vld [vmem:[#allocation28_spill] sm:$0xff]  ;;  %v6164_v30 = vld [vmem:[#allocation29_spill] sm:$0xff]  ;;  %v1681_v9 = vmul.f32 %v6165_v5, %v6165_v5  ;;  %v6169_v12 = vld [vmem:[#allocation14_spill] sm:$0xff]  ;;  %v1704_v1 = vmul.f32 %v5452_v38, %v5452_v38 }
 0x23d   : > { %v928_v24 = vrot.slane %v927_v11, 1  ;;  %v1956_v25 = vadd.f32 %v1955_v19, %v1674_v13  ;;  %v1679_v57 = vmul.f32 %v6163_v4, %v6163_v4  ;;  %v1680_v23 = vmul.f32 %v6164_v30, %v6164_v30  ;;  %v6168_v17 = vld [vmem:[#allocation13_spill] sm:$0xff] }
 0x23e   : > { %v1189_v54 = vrot.slane %v1188_v33, 1  ;;  %v2217_v62 = vadd.f32 %v2216_v43, %v1675_v55  ;;  %v668_v55 = vld [vmem:[#allocation2] sm:$0x3]  ;;  %v1684_v45 = vmul.f32 %v6168_v17, %v6168_v17  ;;  %v1709_v38 = vmul.f32 %v5482_v46, %v5482_v46 }
 0x23f   : > { %v929_v36 = vadd.f32 %v928_v24, %v927_v11  ;;  %v1957_v31 = vadd.f32 %v1956_v25, %v1676_v6  ;;  %v6166_v11 = vld [vmem:[#allocation11_spill] sm:$0xff]  ;;  %v1714_v46 = vmul.f32 %v5512_v40, %v5512_v40  ;;  %v1719_v40 = vmul.f32 %v5542_v10, %v5542_v10 }
 0x240   : > { %v1190_v7 = vadd.f32 %v1189_v54, %v1188_v33  ;;  %v2218_v24 = vadd.f32 %v2217_v62, %v1677_v41  ;;  %v1682_v26 = vmul.f32 %v6166_v11, %v6166_v11  ;;  %v6167_v33 = vld [vmem:[#allocation12_spill] sm:$0xff]  ;;  %v1685_v41 = vmul.f32 %v6169_v12, %v6169_v12 }
 0x241   : > { %v1958_v13 = vadd.f32 %v1957_v31, %v1678_v18  ;;  %v1683_v34 = vmul.f32 %v6167_v33, %v6167_v33  ;;  %v6172_v18 = vld [vmem:[#allocation15_spill] sm:$0xff]  ;;  %v1691_v11 = vmul.f32 %v5374_v8, %v5374_v8  ;;  %v1693_v33 = vmul.f32 %v5386_v53, %v5386_v53 }
 0x242   : > { %v1193_v29 = vcombine.low %v929_v36, %v1190_v7  ;;  %v2219_v3 = vadd.f32 %v2218_v24, %v1679_v57  ;;  %v1686_v25 = vmul.f32 %v6172_v18, %v6172_v18  ;;  %v6173_v57 = vld [vmem:[#allocation16_spill] sm:$0xff]  ;;  %v1696_v8 = vmul.f32 %v5404_v47, %v5404_v47 }
 0x243   : > { %v1959_v6 = vadd.f32 %v1958_v13, %v1680_v23  ;;  %v1687_v62 = vmul.f32 %v6173_v57, %v6173_v57  ;;  %v6174_v23 = vld [vmem:[#allocation17_spill] sm:$0xff]  ;;  %v1692_v13 = vmul.f32 %v5380_v60, %v5380_v60  ;;  %v1697_v60 = vmul.f32 %v5410_v32, %v5410_v32 }
 0x244   : > { %v1200_v54 = vrot.slane %v1193_v29, %v5620_v48  ;;  %v2220_v43 = vadd.f32 %v2219_v3, %v1681_v9  ;;  %v1688_v31 = vmul.f32 %v6174_v23, %v6174_v23  ;;  %v1690_v9 = vmul.f32 %v5368_v35, %v5368_v35 }
 0x245   : > { %v1960_v7 = vadd.f32 %v1959_v6, %v1682_v26  ;;  %v1695_v35 = vmul.f32 %v5398_v49, %v5398_v49  ;;  %v1698_v53 = vmul.f32 %v5416_v22, %v5416_v22  ;;  %v1700_v49 = vmul.f32 %v5428_v27, %v5428_v27 }
 0x246   : > { %v1207_v19 = vrot.slane %v1200_v54, %v5620_v48  ;;  %v2221_v30 = vadd.f32 %v2220_v43, %v1683_v34  ;;  %v1701_v47 = vmul.f32 %v5434_v61, %v5434_v61  ;;  %v1702_v32 = vmul.f32 %v5440_v59, %v5440_v59 }
 0x247   : > { %v1961_v29 = vadd.f32 %v1960_v7, %v1684_v45  ;;  %v1703_v22 = vmul.f32 %v5446_v56, %v5446_v56  ;;  %v1705_v27 = vmul.f32 %v5458_v28, %v5458_v28  ;;  %v1706_v61 = vmul.f32 %v5464_v39, %v5464_v39 }
 0x248   : > { %v1209_v4 = vadd.f32 %v1207_v19, %v668_v55  ;;  %v2222_v5 = vadd.f32 %v2221_v30, %v1685_v41  ;;  %v1707_v59 = vmul.f32 %v5470_v20, %v5470_v20  ;;  %v1708_v56 = vmul.f32 %v5476_v16, %v5476_v16 }
 0x249   : > { %v1962_v24 = vadd.f32 %v1961_v29, %v1686_v25  ;;  %v1710_v28 = vmul.f32 %v5488_v42, %v5488_v42  ;;  %v1711_v39 = vmul.f32 %v5494_v52, %v5494_v52  ;;  %v1712_v20 = vmul.f32 %v5500_v51, %v5500_v51 }
 0x24a   : > { %1214 = vst.msk [vmem:[#allocation2] sm:$0x3] %vm5638_vm1, %v1209_v4  ;;  %v2223_v26 = vadd.f32 %v2222_v5, %v1687_v62  ;;  %v1713_v16 = vmul.f32 %v5506_v44, %v5506_v44  ;;  %v1715_v42 = vmul.f32 %v5518_v14, %v5518_v14  ;;  %v1716_v52 = vmul.f32 %v5524_v58, %v5524_v58 }
 0x24b   : > { %v1963_v54 = vadd.f32 %v1962_v24, %v1688_v31  ;;  %v1717_v51 = vmul.f32 %v5530_v50, %v5530_v50  ;;  %v1718_v44 = vmul.f32 %v5536_v63, %v5536_v63  ;;  %v1720_v14 = vmul.f32 %v5548_v0, %v5548_v0 }
 0x24c   : > { %v2224_v34 = vadd.f32 %v2223_v26, %v1689_v21  ;;  %v1722_v50 = vmul.f32 %v5560_v2, %v5560_v2 }
 0x24d   : > { %v1964_v3 = vadd.f32 %v1963_v54, %v1690_v9 }
 0x24e   : > { %v2225_v55 = vadd.f32 %v2224_v34, %v1691_v11 }
 0x24f   : > { %v1965_v17 = vadd.f32 %v1964_v3, %v1692_v13  ;;  %v6176_v3 = vld [vmem:[#allocation19_spill] sm:$0xff] }
 0x250   : > { %v2226_v45 = vadd.f32 %v2225_v55, %v1693_v33  ;;  %v6175_v33 = vld [vmem:[#allocation18_spill] sm:$0xff]  ;;  %v1723_v63 = vmul.f32 %v6176_v3, %v6176_v3  ;;  %v6177_v55 = vld [vmem:[#allocation20_spill] sm:$0xff] }
 0x251   : > { %v1966_v6 = vadd.f32 %v1965_v17, %v1694_v37  ;;  %v1721_v58 = vmul.f32 %v6175_v33, %v6175_v33  ;;  %v1724_v10 = vmul.f32 %v6177_v55, %v6177_v55  ;;  %v6178_v17 = vld [vmem:[#allocation21_spill] sm:$0xff] }
 0x252   : > { %v2227_v19 = vadd.f32 %v2226_v45, %v1695_v35  ;;  %v1725_v0 = vmul.f32 %v6178_v17, %v6178_v17  ;;  %v6179_v45 = vld [vmem:[#allocation30_spill] sm:$0xff] }
 0x253   : > { %v1967_v12 = vadd.f32 %v1966_v6, %v1696_v8 }
 0x254   : > { %v2228_v41 = vadd.f32 %v2227_v19, %v1697_v60 }
 0x255   : > { %v1968_v43 = vadd.f32 %v1967_v12, %v1698_v53  ;;  %v1726_v53 = vmul.f32 %v6179_v45, %v6179_v45 }
 0x256   : > { %v2229_v18 = vadd.f32 %v2228_v41, %v1699_v15  ;;  %v6180_v15 = vld [vmem:[#allocation31_spill] sm:$0xff] }
 0x257   : > { %v1969_v25 = vadd.f32 %v1968_v43, %v1700_v49  ;;  %v1727_v2 = vmul.f32 %v6180_v15, %v6180_v15 }
 0x258   : > { %v2230_v7 = vadd.f32 %v2229_v18, %v1701_v47 }
 0x259   : > { %v1970_v4 = vadd.f32 %v1969_v25, %v1702_v32 }
 0x25a   : > { %v2231_v57 = vadd.f32 %v2230_v7, %v1703_v22 }
 0x25b   : > { %v1971_v62 = vadd.f32 %v1970_v4, %v1704_v1 }
 0x25c   : > { %v2232_v30 = vadd.f32 %v2231_v57, %v1705_v27 }
 0x25d   : > { %v1972_v23 = vadd.f32 %v1971_v62, %v1706_v61 }
 0x25e   : > { %v2233_v31 = vadd.f32 %v2232_v30, %v1707_v59 }
 0x25f   : > { %v1973_v29 = vadd.f32 %v1972_v23, %v1708_v56 }
 0x260   : > { %v2234_v21 = vadd.f32 %v2233_v31, %v1709_v38  ;;  %v1215_v38 = vld [vmem:[#allocation3] sm:$0x3] }
 0x261   : > { %v1974_v5 = vadd.f32 %v1973_v29, %v1710_v28 }
 0x262   : > { %v2235_v9 = vadd.f32 %v2234_v21, %v1711_v39 }
 0x263   : > { %v1975_v24 = vadd.f32 %v1974_v5, %v1712_v20 }
 0x264   : > { %v2236_v11 = vadd.f32 %v2235_v9, %v1713_v16 }
 0x265   : > { %v1976_v26 = vadd.f32 %v1975_v24, %v1714_v46 }
 0x266   : > { %v2237_v13 = vadd.f32 %v2236_v11, %v1715_v42 }
 0x267   : > { %v1977_v54 = vadd.f32 %v1976_v26, %v1716_v52 }
 0x268   : > { %v2238_v34 = vadd.f32 %v2237_v13, %v1717_v51 }
 0x269   : > { %v1978_v37 = vadd.f32 %v1977_v54, %v1718_v44 }
 0x26a   : > { %v2239_v35 = vadd.f32 %v2238_v34, %v1719_v40 }
 0x26b   : > { %v1979_v8 = vadd.f32 %v1978_v37, %v1720_v14 }
 0x26c   : > { %v2240_v60 = vadd.f32 %v2239_v35, %v1721_v58 }
 0x26d   : > { %v1980_v6 = vadd.f32 %v1979_v8, %v1722_v50 }
 0x26e   : > { %v2241_v19 = vadd.f32 %v2240_v60, %v1723_v63 }
 0x26f   : > { %v1981_v49 = vadd.f32 %v1980_v6, %v1724_v10 }
 0x270   : > { %v2242_v12 = vadd.f32 %v2241_v19, %v1725_v0 }
 0x271   : > { %v1982_v47 = vadd.f32 %v1981_v49, %v1726_v53 }
 0x272   : > { %v2243_v41 = vadd.f32 %v2242_v12, %v1727_v2 }
 0x273   : > { %v1983_v32 = vrot.slane %v1982_v47, 4 }
 0x274   : > { %v2244_v43 = vrot.slane %v2243_v41, 4 }
 0x275   : > { %v1984_v22 = vadd.f32 %v1983_v32, %v1982_v47 }
 0x276   : > { %v2245_v18 = vadd.f32 %v2244_v43, %v2243_v41 }
 0x277   : > { %v1985_v1 = vrot.slane %v1984_v22, 2 }
 0x278   : > { %v2246_v25 = vrot.slane %v2245_v18, 2 }
 0x279   : > { %v1986_v27 = vadd.f32 %v1985_v1, %v1984_v22 }
 0x27a   : > { %v2247_v7 = vadd.f32 %v2246_v25, %v2245_v18 }
 0x27b   : > { %v1987_v61 = vrot.slane %v1986_v27, 1 }
 0x27c   : > { %v2248_v4 = vrot.slane %v2247_v7, 1 }
 0x27d   : > { %v1988_v59 = vadd.f32 %v1987_v61, %v1986_v27 }
 0x27e   : > { %v2249_v57 = vadd.f32 %v2248_v4, %v2247_v7 }
 0x280   : > { %v2252_v56 = vcombine.low %v1988_v59, %v2249_v57 }
 0x282   : > { %v2259_v62 = vrot.slane %v2252_v56, %v5620_v48 }
 0x284   : > { %v2266_v30 = vrot.slane %v2259_v62, %v5620_v48  ;;  %2273 = sbr.rel (%p2369_p7) target bundleno = 677 (0x2a5), region = 36 }
 0x286   : > { %v2268_v28 = vadd.f32 %v2266_v30, %v1215_v38 }
 0x288   : > { %2269 = vst.msk [vmem:[#allocation3] sm:$0x3] %vm5638_vm1, %v2268_v28 }
 0x289   : > { %v2274_v23 = vld [vmem:[#allocation2] sm:$0x3] }
 0x28a   : > { %v2275_v31 = vmul.f32 0.00024414063, %v2274_v23 }
 0x28c   : > { %v2278_v29 = vmul.f32 %v2275_v31, %v2275_v31  ;;  %2280 = vst.msk [vmem:[#allocation7] ss:$2 sm:$0x3] %vm5638_vm1, %v2275_v31 }
 0x28f   : > { %v2276_v39 = vld [vmem:[#allocation3] sm:$0x3] }
 0x290   : > { %v2277_v20 = vmul.f32 0.00024414063, %v2276_v39 }
 0x292   : > { %v2279_v16 = vsub.f32 %v2277_v20, %v2278_v29 }
 0x294   : > { %v2281_v21 = vadd.f32 1e-05, %v2279_v16 }
 0x296   : > { %2442 = vrsqrt.f32 %v2281_v21 }
 0x2a3   : > { %v2443_v46 = vpop.eup %2442 }
 0x2a4   : > { %2284 = vst.msk [vmem:[#allocation7 + $0x1] ss:$2 sm:$0x3] %vm5638_vm1, %v2443_v46 }
 0x2a5 PF: > { %p5739_p9 = scmp.eq.s32.totalorder %s2359_s12, 1  ;;  %s2557_s17 = smov [#allocation7]  }
 0x2a6   : > { %s2295_s19 = sshll.u32 %s2557_s17, 4  ;;  %s2296_s19 = int_to_ptr.vmem [resolvable:$true] %s2295_s19 }
 0x2a7   : > { %s2472_s20 = scalar_lea.vmem %s2296_s19, 64  ;;  %p2479_p13 = scmp.lt.s32.totalorder %s2296_s19, %s2296_s19 }
 0x2a8   : > { %p2473_p10 = scmp.ne.s32.totalorder %s2296_s19, %s2472_s20  ;;  %p2480_p0 = scmp.lt.s32.totalorder %s2472_s20, %s2472_s20 }
 0x2aa   : > { %p2474_p11 = pnand %p2473_p10, %p5739_p9  ;;  %p2481_p1 = por %p2480_p0, %p2479_p13 }
 0x2ac   : > { %p2475_p12 = pneg %p2474_p11 }
 0x2ae   : > { %p2482_p2 = pnand %p2481_p1, %p2475_p12 }
 0x2b0   : > { %2485 = shalt.err (!%p2482_p2)
}
 0x2b1   : > { %2379 = dma.vmem_to_hbm [thread:$0]  (%p5739_p9), %s2296_s19, 64, %s5773_s1, [#allocation6]  }
 0x2b2   : > { %2525 = dma.done.wait (%p5739_p9), [#allocation6], 64  }
 0x2b3   : > { %2527 = vsyncadd (%p5739_p9), [#allocation6], 4294967232 }
 0x2b4 PF: > { %s15_s11 = sadd.s32 1, %s2550_s11   ;;  %s6182_s6 = smov %s2534_s7 }
 0x2b5   : > { %p12_p3 = scmp.ge.s32.totalorder %s15_s11, 4   ;;  %s6183_s7 = smov %s2538_s8 }
 0x2b6   : > { %s6184_s8 = smov %s2619_s18  ;;  %s6185_s9 = smov %s2546_s10 }
 0x2b7   : > { %s6186_s10 = smov %s6188_s13  ;;  %14 = sbr.rel (!%p12_p3) target bundleno = 5 (0x5), region = 71 }
 0x2bc   :  { %2308 = vsyncpa [#allocation5], 1 }
 0x2bd   :  { %2310 = vsyncpa [#allocation5 + $0x1], 1 }
 0x2be   :  { %2311 = vsyncpa [#allocation6], 1 }
 0x2bf   :  { %2313 = vsyncpa [#allocation6 + $0x1], 1 }

</bundles_post_ra>
